<compile_context>
chip_gen: v6e
topology: v6e:2x2x1
jax: 0.10.0
libtpu: 0.0.40
codegen_flags: <defaults>
</compile_context>

<pallas_src>
import functools
import math

import jax
import jax.numpy as jnp
import numpy as np
from jax.experimental import pallas as pl
from jax.experimental.pallas import tpu as pltpu


# ----------------------------------------------------------------------------
# Generation-aware tiling / VMEM budget
# ----------------------------------------------------------------------------
@functools.lru_cache(maxsize=None)
def _big_vmem():
    """True on v5/v6 (128 MiB physical VMEM); False on v7x (64 MiB) / unknown."""
    try:
        kind = jax.devices()[0].device_kind.lower()
    except Exception:
        return False
    return ("v5" in kind) or ("v6" in kind)


def _vmem_limit_bytes():
    return (64 if _big_vmem() else 32) * 1024 * 1024


def _pref_row_tile():
    return 1024 if _big_vmem() else 512


def _pref_window_tokens():
    return 1024 if _big_vmem() else 512


def _cparams():
    return pltpu.CompilerParams(dimension_semantics=("parallel",),
                                vmem_limit_bytes=_vmem_limit_bytes())


def _row_tile(rows, pref):
    """Row tile: multiple of 8, <= pref, leaving >=2 grid steps when possible."""
    if rows <= 8:
        return rows
    tm = min(pref, rows)
    if tm >= rows:                       # would collapse to a single grid step
        tm = (rows + 1) // 2
    tm = max(8, (tm // 8) * 8)
    return tm


def _choose_window_block(nW, NW_total, N, target_tokens):
    """Largest divisor of nW with <=target tokens per step and >=2 grid steps."""
    best = 1
    for d in range(1, nW + 1):
        if nW % d == 0 and d * N <= target_tokens and NW_total // d >= 2:
            best = d
    return best


# ----------------------------------------------------------------------------
# In-kernel math helpers
# ----------------------------------------------------------------------------
def _layernorm(x, g, b, eps=1e-5):
    mean = jnp.mean(x, axis=-1, keepdims=True)
    var = jnp.mean(jnp.square(x - mean), axis=-1, keepdims=True)
    return (x - mean) * jax.lax.rsqrt(var + eps) * g + b


def _gelu_tanh(x):
    # TODO(synk): PyTorch nn.GELU default uses exact erf; tanh approximation is
    # used here for guaranteed TPU lowering (~1e-3 difference).
    c = math.sqrt(2.0 / math.pi)
    return 0.5 * x * (1.0 + jnp.tanh(c * (x + 0.044715 * x * x * x)))


# ----------------------------------------------------------------------------
# Pallas kernels
# ----------------------------------------------------------------------------
def mlp_residual_kernel(s_ref, a_ref, g_ref, b_ref, w1_ref, b1_ref, w2_ref,
                        b2_ref, o_ref):
    """x1 = shortcut + attn_out; out = x1 + fc2(gelu(fc1(LN(x1)))) on (TM, C)."""
    x = s_ref[...].astype(jnp.float32) + a_ref[...].astype(jnp.float32)
    xn = _layernorm(x, g_ref[...], b_ref[...])
    h = jnp.dot(xn.astype(jnp.bfloat16), w1_ref[...],
                preferred_element_type=jnp.float32) + b1_ref[...]
    h = _gelu_tanh(h)
    y = jnp.dot(h.astype(jnp.bfloat16), w2_ref[...],
                preferred_element_type=jnp.float32) + b2_ref[...]
    o_ref[...] = (x + y).astype(o_ref.dtype)


def matmul_bias_kernel(x_ref, w_ref, b_ref, o_ref):
    x = x_ref[...].astype(jnp.bfloat16)
    y = jnp.dot(x, w_ref[...], preferred_element_type=jnp.float32) + b_ref[...]
    o_ref[...] = y.astype(o_ref.dtype)


def window_attention_kernel(*refs, num_heads, scale, with_mask):
    """Fused norm1 + QKV + MHSA (+rel-pos bias [+shift mask]) + softmax + proj.

    Blocks: x (Wb, N, C); wq/wk/wv (nH, C, hd) head-major bf16; rel_bias
    (nH, N, N); optional mask (Wb, N, N).  QKV / proj matmuls run on the
    flattened (Wb*N, C) slab; per-head score/AV matmuls are batched 3-D dots.
    """
    if with_mask:
        (x_ref, g_ref, b_ref, wq_ref, wk_ref, wv_ref, bq_ref, bk_ref, bv_ref,
         bias_ref, mask_ref, wproj_ref, bproj_ref, o_ref) = refs
    else:
        (x_ref, g_ref, b_ref, wq_ref, wk_ref, wv_ref, bq_ref, bk_ref, bv_ref,
         bias_ref, wproj_ref, bproj_ref, o_ref) = refs
        mask_ref = None

    x = x_ref[...].astype(jnp.float32)                 # (Wb, N, C)
    Wb, N, C = x.shape
    hd = C // num_heads

    xn = _layernorm(x, g_ref[...], b_ref[...])         # f32
    xn2 = xn.reshape(Wb * N, C).astype(jnp.bfloat16)   # flat 2-D slab

    heads = []
    for h in range(num_heads):                         # static, short
        # per-head matmuls slice the grid-constant weight (leading axis, free)
        q = jnp.dot(xn2, wq_ref[h], preferred_element_type=jnp.float32) + bq_ref[h]
        k = jnp.dot(xn2, wk_ref[h], preferred_element_type=jnp.float32) + bk_ref[h]
        v = jnp.dot(xn2, wv_ref[h], preferred_element_type=jnp.float32) + bv_ref[h]
        q = (q * scale).reshape(Wb, N, hd).astype(jnp.bfloat16)
        k = k.reshape(Wb, N, hd).astype(jnp.bfloat16)
        v = v.reshape(Wb, N, hd).astype(jnp.bfloat16)

        s = jnp.einsum("wnd,wmd->wnm", q, k,
                       preferred_element_type=jnp.float32)   # (Wb, N, N) f32
        s = s + bias_ref[h]
        if mask_ref is not None:
            s = s + mask_ref[...]
        s = s - jnp.max(s, axis=-1, keepdims=True)
        p = jnp.exp(s)
        # exact reciprocal for parity; use approx=True for a small EUP win.
        p = p * pl.reciprocal(jnp.sum(p, axis=-1, keepdims=True), approx=False)
        o_h = jnp.einsum("wnm,wmd->wnd", p.astype(jnp.bfloat16), v,
                         preferred_element_type=jnp.float32)  # (Wb, N, hd)
        heads.append(o_h)

    # one full-K output projection instead of num_heads K=hd matmuls
    attn = jnp.concatenate(heads, axis=-1).reshape(Wb * N, C)
    y = jnp.dot(attn.astype(jnp.bfloat16), wproj_ref[...],
                preferred_element_type=jnp.float32) + bproj_ref[...]
    o_ref[...] = y.reshape(Wb, N, C).astype(o_ref.dtype)


# ----------------------------------------------------------------------------
# Pallas wrappers (row / window tiled, pipelined)
# ----------------------------------------------------------------------------
def mlp_residual(shortcut2d, attn2d, g, be, w1, b1, w2, b2):
    rows, C = shortcut2d.shape
    hidden = w1.shape[1]
    tm = _row_tile(rows, _pref_row_tile())
    return pl.pallas_call(
        mlp_residual_kernel,
        out_shape=jax.ShapeDtypeStruct((rows, C), shortcut2d.dtype),
        grid=(pl.cdiv(rows, tm),),
        in_specs=[
            pl.BlockSpec((tm, C), lambda i: (i, 0)),
            pl.BlockSpec((tm, C), lambda i: (i, 0)),
            pl.BlockSpec((1, C), lambda i: (0, 0)),
            pl.BlockSpec((1, C), lambda i: (0, 0)),
            pl.BlockSpec((C, hidden), lambda i: (0, 0)),
            pl.BlockSpec((1, hidden), lambda i: (0, 0)),
            pl.BlockSpec((hidden, C), lambda i: (0, 0)),
            pl.BlockSpec((1, C), lambda i: (0, 0)),
        ],
        out_specs=pl.BlockSpec((tm, C), lambda i: (i, 0)),
        compiler_params=_cparams(),
    )(shortcut2d, attn2d, g, be, w1, b1, w2, b2)


def matmul_bias(x2d, w, b):
    rows, Cin = x2d.shape
    Cout = w.shape[1]
    tm = _row_tile(rows, _pref_row_tile())
    return pl.pallas_call(
        matmul_bias_kernel,
        out_shape=jax.ShapeDtypeStruct((rows, Cout), x2d.dtype),
        grid=(pl.cdiv(rows, tm),),
        in_specs=[
            pl.BlockSpec((tm, Cin), lambda i: (i, 0)),
            pl.BlockSpec((Cin, Cout), lambda i: (0, 0)),
            pl.BlockSpec((1, Cout), lambda i: (0, 0)),
        ],
        out_specs=pl.BlockSpec((tm, Cout), lambda i: (i, 0)),
        compiler_params=_cparams(),
    )(x2d, w, b)


def window_attention(xw, g1, be1, wq, wk, wv, bq, bk, bv, rel_bias, mask,
                     wproj, bproj, *, num_heads, scale, w_blk):
    NW_total, N, C = xw.shape
    nH = num_heads
    hd = C // nH
    assert NW_total % w_blk == 0

    operands = [xw, g1, be1, wq, wk, wv, bq, bk, bv, rel_bias]
    in_specs = [
        pl.BlockSpec((w_blk, N, C), lambda i: (i, 0, 0)),
        pl.BlockSpec((1, C), lambda i: (0, 0)),
        pl.BlockSpec((1, C), lambda i: (0, 0)),
        pl.BlockSpec((nH, C, hd), lambda i: (0, 0, 0)),
        pl.BlockSpec((nH, C, hd), lambda i: (0, 0, 0)),
        pl.BlockSpec((nH, C, hd), lambda i: (0, 0, 0)),
        pl.BlockSpec((nH, 1, hd), lambda i: (0, 0, 0)),
        pl.BlockSpec((nH, 1, hd), lambda i: (0, 0, 0)),
        pl.BlockSpec((nH, 1, hd), lambda i: (0, 0, 0)),
        pl.BlockSpec((nH, N, N), lambda i: (0, 0, 0)),      # VMEM-resident
    ]

    with_mask = mask is not None
    if with_mask:
        nW = mask.shape[0]
        # windows are batch-major, w_blk divides nW, so each grid step stays
        # inside one batch element and masks pair correctly with windows.
        assert nW % w_blk == 0
        mb = nW // w_blk
        operands.append(mask)
        in_specs.append(pl.BlockSpec((w_blk, N, N),
                                     lambda i, mb=mb: (i % mb, 0, 0)))

    operands += [wproj, bproj]
    in_specs += [pl.BlockSpec((C, C), lambda i: (0, 0)),
                 pl.BlockSpec((1, C), lambda i: (0, 0))]

    kernel = functools.partial(window_attention_kernel, num_heads=num_heads,
                               scale=scale, with_mask=with_mask)
    return pl.pallas_call(
        kernel,
        out_shape=jax.ShapeDtypeStruct((NW_total, N, C), xw.dtype),
        grid=(NW_total // w_blk,),
        in_specs=in_specs,
        out_specs=pl.BlockSpec((w_blk, N, C), lambda i: (i, 0, 0)),
        compiler_params=_cparams(),
    )(*operands)


# ----------------------------------------------------------------------------
# Glue: window partition / reverse, rel-pos index, shifted-window mask
# ----------------------------------------------------------------------------
def window_partition_j(x, ws):
    B, H, W, C = x.shape
    x = x.reshape(B, H // ws, ws, W // ws, ws, C)
    return x.transpose(0, 1, 3, 2, 4, 5).reshape(-1, ws, ws, C)


def window_reverse_j(windows, ws, H, W):
    B = windows.shape[0] // ((H // ws) * (W // ws))
    x = windows.reshape(B, H // ws, W // ws, ws, ws, -1)
    return x.transpose(0, 1, 3, 2, 4, 5).reshape(B, H, W, -1)


def relative_position_index(ws):
    coords = np.stack(np.meshgrid(np.arange(ws), np.arange(ws), indexing="ij"))
    coords_flatten = coords.reshape(2, -1)
    rel = coords_flatten[:, :, None] - coords_flatten[:, None, :]
    rel = rel.transpose(1, 2, 0).astype(np.int64)
    rel[:, :, 0] += ws - 1
    rel[:, :, 1] += ws - 1
    rel[:, :, 0] *= 2 * ws - 1
    return rel.sum(-1)  # (N, N)


def shifted_window_mask(H, W, ws, shift):
    img_mask = np.zeros((1, H, W, 1), dtype=np.float32)
    h_slices = (slice(0, -ws), slice(-ws, -shift), slice(-shift, None))
    w_slices = (slice(0, -ws), slice(-ws, -shift), slice(-shift, None))
    cnt = 0
    for h in h_slices:
        for w in w_slices:
            img_mask[:, h, w, :] = cnt
            cnt += 1
    mw = img_mask.reshape(1, H // ws, ws, W // ws, ws, 1)
    mw = mw.transpose(0, 1, 3, 2, 4, 5).reshape(-1, ws * ws)
    attn_mask = mw[:, None, :] - mw[:, :, None]
    attn_mask = np.where(attn_mask != 0, -100.0, 0.0).astype(np.float32)
    return attn_mask  # (nW, N, N)


# ----------------------------------------------------------------------------
# Swin block / stage forward
# ----------------------------------------------------------------------------
def swin_block_forward(x, p, *, H, W, window_size, shift_size, num_heads):
    B, L, C = x.shape
    ws = window_size
    N = ws * ws
    nW = (H // ws) * (W // ws)
    shortcut = x

    # norm1 is fused inside the attention kernel (LN is per-token, so applying
    # it after the roll/partition permutation is equivalent).
    xi = x.reshape(B, H, W, C)
    if shift_size > 0:
        xi = jnp.roll(xi, shift=(-shift_size, -shift_size), axis=(1, 2))
    xw = window_partition_j(xi, ws).reshape(-1, N, C)

    w_blk = _choose_window_block(nW, xw.shape[0], N, _pref_window_tokens())
    scale = (C // num_heads) ** (-0.5)
    mask = p["attn_mask"] if shift_size > 0 else None
    aw = window_attention(xw, p["g1"], p["be1"], p["wq"], p["wk"], p["wv"],
                          p["bq"], p["bk"], p["bv"], p["rel_bias"], mask,
                          p["wproj"], p["bproj"], num_heads=num_heads,
                          scale=scale, w_blk=w_blk)

    xr = window_reverse_j(aw.reshape(-1, ws, ws, C), ws, H, W)
    if shift_size > 0:
        xr = jnp.roll(xr, shift=(shift_size, shift_size), axis=(1, 2))
    attn_out = xr.reshape(B * L, C)

    # attention residual + norm2 + MLP + residual fused in one row-tiled kernel
    x = mlp_residual(shortcut.reshape(B * L, C), attn_out, p["g2"], p["be2"],
                     p["w1"], p["b1"], p["w2"], p["b2"]).reshape(B, L, C)
    return x


def conv2x2_stride2_nhwc(x_tokens, w_mat, b, *, H, W):
    """2x2/stride-2 conv from the (B, L, C) token tensor (NHWC im2col matmul)."""
    B, L, C = x_tokens.shape
    Ho, Wo = H // 2, W // 2
    xi = x_tokens.reshape(B, H, W, C)
    # patch feature order (dy, dx, c); C stays the contiguous lane dim.
    patches = (xi.reshape(B, Ho, 2, Wo, 2, C)
               .transpose(0, 1, 3, 2, 4, 5)
               .reshape(B * Ho * Wo, 4 * C))
    y = matmul_bias(patches, w_mat, b)
    return y.reshape(B, Ho, Wo, -1)


def hybrid_swin_stage_forward(x_nchw, params, *, H, W, window_size, num_heads,
                              shift_sizes, use_shortcut=True):
    B, C, _, _ = x_nchw.shape
    # Tokenizer: (B, C, H, W) -> (B, H*W, C); tokens also double as the stage
    # shortcut (same data as NCHW, just channels-last), so the shortcut add
    # happens in token layout without detokenizing.
    tokens = x_nchw.reshape(B, C, H * W).transpose(0, 2, 1)
    x = tokens
    for blk, shift in zip(params["blocks"], shift_sizes):
        x = swin_block_forward(x, blk, H=H, W=W, window_size=window_size,
                               shift_size=shift, num_heads=num_heads)
    if use_shortcut:
        x = x + tokens
    # TODO(synk): conv_module is injected externally in the original code; a
    # representative Conv2d(dim, 2*dim, kernel_size=2, stride=2) is used.
    y = conv2x2_stride2_nhwc(x, params["conv_w"], params["conv_b"], H=H, W=W)
    # Module output layout is NCHW.
    return y.transpose(0, 3, 1, 2)


# ----------------------------------------------------------------------------
# Deterministic parameter construction (static config returned separately)
# ----------------------------------------------------------------------------
def init_params(key, *, dim, depth, num_heads, window_size, mlp_ratio, H, W):
    C = dim
    hidden = int(C * mlp_ratio)
    ws = window_size
    N = ws * ws
    nH = num_heads
    hd = C // nH
    rel_index = relative_position_index(ws)            # (N, N) numpy int
    blocks = []
    shift_sizes = []
    for i in range(depth):
        key, *ks = jax.random.split(key, 6)
        shift = 0 if i % 2 == 0 else ws // 2
        shift_sizes.append(shift)

        rpb = 0.02 * jax.random.normal(
            ks[1], ((2 * ws - 1) * (2 * ws - 1), nH), jnp.float32)
        # hoisted rel-pos bias gather -> (nH, N, N), constant per block
        rel_bias = rpb[rel_index.reshape(-1)].reshape(N, N, nH)
        rel_bias = jnp.transpose(rel_bias, (2, 0, 1))

        # QKV weight (C, 3C) split head-major: feature f = which*C + h*hd + j
        wqkv = 0.02 * jax.random.normal(ks[0], (C, 3 * C), jnp.float32)
        wqkv_r = wqkv.reshape(C, 3, nH, hd)
        wq = jnp.transpose(wqkv_r[:, 0], (1, 0, 2)).astype(jnp.bfloat16)
        wk = jnp.transpose(wqkv_r[:, 1], (1, 0, 2)).astype(jnp.bfloat16)
        wv = jnp.transpose(wqkv_r[:, 2], (1, 0, 2)).astype(jnp.bfloat16)
        bqkv = jnp.zeros((3, nH, 1, hd), jnp.float32)

        blk = {
            "g1": jnp.ones((1, C), jnp.float32),
            "be1": jnp.zeros((1, C), jnp.float32),
            "wq": wq, "wk": wk, "wv": wv,
            "bq": bqkv[0], "bk": bqkv[1], "bv": bqkv[2],
            "rel_bias": rel_bias,
            "wproj": (0.02 * jax.random.normal(ks[2], (C, C), jnp.float32)
                      ).astype(jnp.bfloat16),
            "bproj": jnp.zeros((1, C), jnp.float32),
            "g2": jnp.ones((1, C), jnp.float32),
            "be2": jnp.zeros((1, C), jnp.float32),
            "w1": (0.02 * jax.random.normal(ks[3], (C, hidden), jnp.float32)
                   ).astype(jnp.bfloat16),
            "b1": jnp.zeros((1, hidden), jnp.float32),
            "w2": (0.02 * jax.random.normal(ks[4], (hidden, C), jnp.float32)
                   ).astype(jnp.bfloat16),
            "b2": jnp.zeros((1, C), jnp.float32),
        }
        if shift > 0:
            blk["attn_mask"] = jnp.asarray(shifted_window_mask(H, W, ws, shift))
        blocks.append(blk)

    key, kc = jax.random.split(key)
    # conv weight (Cout, Cin, 2, 2) -> im2col matrix (kh*kw*Cin, Cout)
    conv_w4 = 0.02 * jax.random.normal(kc, (2 * C, C, 2, 2), jnp.float32)
    conv_w = jnp.transpose(conv_w4, (2, 3, 1, 0)).reshape(4 * C, 2 * C)
    params = {
        "blocks": blocks,
        "conv_w": conv_w.astype(jnp.bfloat16),
        "conv_b": jnp.zeros((1, 2 * C), jnp.float32),
    }
    return params, tuple(shift_sizes)


# ----------------------------------------------------------------------------
if __name__ == "__main__":
    B, C, H, W = 2, 16, 8, 8
    depth, num_heads, window_size, mlp_ratio = 2, 2, 4, 4.0

    key = jax.random.PRNGKey(0)
    key, kx = jax.random.split(key)
    x = jax.random.normal(kx, (B, C, H, W), jnp.float32)

    params, shift_sizes = init_params(key, dim=C, depth=depth,
                                      num_heads=num_heads,
                                      window_size=window_size,
                                      mlp_ratio=mlp_ratio, H=H, W=W)

    fwd = jax.jit(functools.partial(hybrid_swin_stage_forward,
                                    H=H, W=W, window_size=window_size,
                                    num_heads=num_heads,
                                    shift_sizes=shift_sizes,
                                    use_shortcut=True))
    out = fwd(x, params)
    out = jax.block_until_ready(out)

    assert out.shape == (B, 2 * C, H // 2, W // 2), out.shape
    assert bool(jnp.all(jnp.isfinite(out)))
    print("KERNEL_OK")
</pallas_src>

<mosaic_0001>
module attributes {stable_mosaic.version = 11 : i64} {
  func.func @window_attention_kernel(%arg0: i32, %arg1: memref<4x16x16xf32, #tpu.memory_space<vmem>>, %arg2: memref<1x16xf32, #tpu.memory_space<vmem>>, %arg3: memref<1x16xf32, #tpu.memory_space<vmem>>, %arg4: memref<2x16x8xbf16, #tpu.memory_space<vmem>>, %arg5: memref<2x16x8xbf16, #tpu.memory_space<vmem>>, %arg6: memref<2x16x8xbf16, #tpu.memory_space<vmem>>, %arg7: memref<2x1x8xf32, #tpu.memory_space<vmem>>, %arg8: memref<2x1x8xf32, #tpu.memory_space<vmem>>, %arg9: memref<2x1x8xf32, #tpu.memory_space<vmem>>, %arg10: memref<2x16x16xf32, #tpu.memory_space<vmem>>, %arg11: memref<16x16xbf16, #tpu.memory_space<vmem>>, %arg12: memref<1x16xf32, #tpu.memory_space<vmem>>, %arg13: memref<4x16x16xf32, #tpu.memory_space<vmem>>) attributes {dimension_semantics = [#tpu.dimension_semantics<parallel>], iteration_bounds = array<i64: 2>, scalar_prefetch = 0 : i64, scratch_operands = 0 : i64, tpu.core_type = #tpu.core_type<tc>, window_params = [{transform_indices = @transform_0, window_bounds = array<i64: 4, 16, 16>}, {pipeline_mode = #tpu.pipeline_mode<synchronous>, transform_indices = @transform_1, window_bounds = array<i64: 1, 16>}, {pipeline_mode = #tpu.pipeline_mode<synchronous>, transform_indices = @transform_2, window_bounds = array<i64: 1, 16>}, {pipeline_mode = #tpu.pipeline_mode<synchronous>, transform_indices = @transform_3, window_bounds = array<i64: 2, 16, 8>}, {pipeline_mode = #tpu.pipeline_mode<synchronous>, transform_indices = @transform_4, window_bounds = array<i64: 2, 16, 8>}, {pipeline_mode = #tpu.pipeline_mode<synchronous>, transform_indices = @transform_5, window_bounds = array<i64: 2, 16, 8>}, {pipeline_mode = #tpu.pipeline_mode<synchronous>, transform_indices = @transform_6, window_bounds = array<i64: 2, 1, 8>}, {pipeline_mode = #tpu.pipeline_mode<synchronous>, transform_indices = @transform_7, window_bounds = array<i64: 2, 1, 8>}, {pipeline_mode = #tpu.pipeline_mode<synchronous>, transform_indices = @transform_8, window_bounds = array<i64: 2, 1, 8>}, {pipeline_mode = #tpu.pipeline_mode<synchronous>, transform_indices = @transform_9, window_bounds = array<i64: 2, 16, 16>}, {pipeline_mode = #tpu.pipeline_mode<synchronous>, transform_indices = @transform_10, window_bounds = array<i64: 16, 16>}, {pipeline_mode = #tpu.pipeline_mode<synchronous>, transform_indices = @transform_11, window_bounds = array<i64: 1, 16>}, {transform_indices = @transform_12, window_bounds = array<i64: 4, 16, 16>}]} {
    %c0 = arith.constant 0 : index
    %c0_0 = arith.constant 0 : index
    %c0_1 = arith.constant 0 : index
    %0 = vector.load %arg1[%c0, %c0_0, %c0_1] : memref<4x16x16xf32, #tpu.memory_space<vmem>>, vector<4x16x16xf32>
    %c0_2 = arith.constant 0 : index
    %c0_3 = arith.constant 0 : index
    %1 = vector.load %arg2[%c0_2, %c0_3] : memref<1x16xf32, #tpu.memory_space<vmem>>, vector<1x16xf32>
    %c0_4 = arith.constant 0 : index
    %c0_5 = arith.constant 0 : index
    %2 = vector.load %arg3[%c0_4, %c0_5] : memref<1x16xf32, #tpu.memory_space<vmem>>, vector<1x16xf32>
    %cst = arith.constant dense<0.000000e+00> : vector<4x16xf32>
    %3 = vector.multi_reduction <add>, %0, %cst [2] : vector<4x16x16xf32> to vector<4x16xf32>
    %4 = vector.shape_cast %3 : vector<4x16xf32> to vector<4x16x1xf32>
    %cst_6 = arith.constant 1.600000e+01 : f32
    %5 = vector.broadcast %cst_6 : f32 to vector<4x16x1xf32>
    %6 = arith.divf %4, %5 : vector<4x16x1xf32>
    %7 = vector.broadcast %6 : vector<4x16x1xf32> to vector<4x16x16xf32>
    %8 = arith.subf %0, %7 : vector<4x16x16xf32>
    %9 = arith.mulf %8, %8 : vector<4x16x16xf32>
    %cst_7 = arith.constant dense<0.000000e+00> : vector<4x16xf32>
    %10 = vector.multi_reduction <add>, %9, %cst_7 [2] : vector<4x16x16xf32> to vector<4x16xf32>
    %11 = vector.shape_cast %10 : vector<4x16xf32> to vector<4x16x1xf32>
    %cst_8 = arith.constant 1.600000e+01 : f32
    %12 = vector.broadcast %cst_8 : f32 to vector<4x16x1xf32>
    %13 = arith.divf %11, %12 : vector<4x16x1xf32>
    %14 = vector.broadcast %6 : vector<4x16x1xf32> to vector<4x16x16xf32>
    %15 = arith.subf %0, %14 : vector<4x16x16xf32>
    %cst_9 = arith.constant 9.99999974E-6 : f32
    %16 = vector.broadcast %cst_9 : f32 to vector<4x16x1xf32>
    %17 = arith.addf %13, %16 : vector<4x16x1xf32>
    %18 = math.rsqrt %17 : vector<4x16x1xf32>
    %19 = vector.broadcast %18 : vector<4x16x1xf32> to vector<4x16x16xf32>
    %20 = arith.mulf %15, %19 : vector<4x16x16xf32>
    %21 = vector.shape_cast %1 : vector<1x16xf32> to vector<1x1x16xf32>
    %22 = vector.broadcast %21 : vector<1x1x16xf32> to vector<4x16x16xf32>
    %23 = arith.mulf %20, %22 : vector<4x16x16xf32>
    %24 = vector.shape_cast %2 : vector<1x16xf32> to vector<1x1x16xf32>
    %25 = vector.broadcast %24 : vector<1x1x16xf32> to vector<4x16x16xf32>
    %26 = arith.addf %23, %25 : vector<4x16x16xf32>
    %27 = vector.shape_cast %26 : vector<4x16x16xf32> to vector<64x16xf32>
    %28 = arith.truncf %27 : vector<64x16xf32> to vector<64x16xbf16>
    %c0_10 = arith.constant 0 : index
    %c0_11 = arith.constant 0 : index
    %c0_12 = arith.constant 0 : index
    %29 = vector.load %arg4[%c0_10, %c0_11, %c0_12] : memref<2x16x8xbf16, #tpu.memory_space<vmem>>, vector<1x16x8xbf16>
    %30 = vector.shape_cast %29 : vector<1x16x8xbf16> to vector<16x8xbf16>
    %cst_13 = arith.constant dense<0.000000e+00> : vector<64x8xf32>
    %31 = tpu.matmul %28, %30, %cst_13 {dimension_numbers = #tpu.dot_dimension_numbers<[1], [0], [0], [1], [0, 0, 1, 1], [], []>} : vector<64x16xbf16>, vector<16x8xbf16>, vector<64x8xf32> -> vector<64x8xf32>
    %c0_14 = arith.constant 0 : index
    %c0_15 = arith.constant 0 : index
    %c0_16 = arith.constant 0 : index
    %32 = vector.load %arg7[%c0_14, %c0_15, %c0_16] : memref<2x1x8xf32, #tpu.memory_space<vmem>>, vector<1x1x8xf32>
    %33 = vector.shape_cast %32 : vector<1x1x8xf32> to vector<1x8xf32>
    %34 = vector.broadcast %33 : vector<1x8xf32> to vector<64x8xf32>
    %35 = arith.addf %31, %34 : vector<64x8xf32>
    %c0_17 = arith.constant 0 : index
    %c0_18 = arith.constant 0 : index
    %c0_19 = arith.constant 0 : index
    %36 = vector.load %arg5[%c0_17, %c0_18, %c0_19] : memref<2x16x8xbf16, #tpu.memory_space<vmem>>, vector<1x16x8xbf16>
    %37 = vector.shape_cast %36 : vector<1x16x8xbf16> to vector<16x8xbf16>
    %cst_20 = arith.constant dense<0.000000e+00> : vector<64x8xf32>
    %38 = tpu.matmul %28, %37, %cst_20 {dimension_numbers = #tpu.dot_dimension_numbers<[1], [0], [0], [1], [0, 0, 1, 1], [], []>} : vector<64x16xbf16>, vector<16x8xbf16>, vector<64x8xf32> -> vector<64x8xf32>
    %c0_21 = arith.constant 0 : index
    %c0_22 = arith.constant 0 : index
    %c0_23 = arith.constant 0 : index
    %39 = vector.load %arg8[%c0_21, %c0_22, %c0_23] : memref<2x1x8xf32, #tpu.memory_space<vmem>>, vector<1x1x8xf32>
    %40 = vector.shape_cast %39 : vector<1x1x8xf32> to vector<1x8xf32>
    %41 = vector.broadcast %40 : vector<1x8xf32> to vector<64x8xf32>
    %42 = arith.addf %38, %41 : vector<64x8xf32>
    %c0_24 = arith.constant 0 : index
    %c0_25 = arith.constant 0 : index
    %c0_26 = arith.constant 0 : index
    %43 = vector.load %arg6[%c0_24, %c0_25, %c0_26] : memref<2x16x8xbf16, #tpu.memory_space<vmem>>, vector<1x16x8xbf16>
    %44 = vector.shape_cast %43 : vector<1x16x8xbf16> to vector<16x8xbf16>
    %cst_27 = arith.constant dense<0.000000e+00> : vector<64x8xf32>
    %45 = tpu.matmul %28, %44, %cst_27 {dimension_numbers = #tpu.dot_dimension_numbers<[1], [0], [0], [1], [0, 0, 1, 1], [], []>} : vector<64x16xbf16>, vector<16x8xbf16>, vector<64x8xf32> -> vector<64x8xf32>
    %c0_28 = arith.constant 0 : index
    %c0_29 = arith.constant 0 : index
    %c0_30 = arith.constant 0 : index
    %46 = vector.load %arg9[%c0_28, %c0_29, %c0_30] : memref<2x1x8xf32, #tpu.memory_space<vmem>>, vector<1x1x8xf32>
    %47 = vector.shape_cast %46 : vector<1x1x8xf32> to vector<1x8xf32>
    %48 = vector.broadcast %47 : vector<1x8xf32> to vector<64x8xf32>
    %49 = arith.addf %45, %48 : vector<64x8xf32>
    %cst_31 = arith.constant 0.353553385 : f32
    %50 = vector.broadcast %cst_31 : f32 to vector<64x8xf32>
    %51 = arith.mulf %35, %50 : vector<64x8xf32>
    %52 = vector.shape_cast %51 : vector<64x8xf32> to vector<4x16x8xf32>
    %53 = arith.truncf %52 : vector<4x16x8xf32> to vector<4x16x8xbf16>
    %54 = vector.shape_cast %42 : vector<64x8xf32> to vector<4x16x8xf32>
    %55 = arith.truncf %54 : vector<4x16x8xf32> to vector<4x16x8xbf16>
    %56 = vector.shape_cast %49 : vector<64x8xf32> to vector<4x16x8xf32>
    %57 = arith.truncf %56 : vector<4x16x8xf32> to vector<4x16x8xbf16>
    "tpu.trace_start"() <{level = 10 : i32, message = "wnd,wmd->wnm"}> : () -> ()
    %cst_32 = arith.constant dense<0.000000e+00> : vector<4x16x16xf32>
    %58 = tpu.matmul %53, %55, %cst_32 {dimension_numbers = #tpu.dot_dimension_numbers<[2], [2], [1], [1], [0, 0, 0, 1, 1, 1], [0], [0]>} : vector<4x16x8xbf16>, vector<4x16x8xbf16>, vector<4x16x16xf32> -> vector<4x16x16xf32>
    "tpu.trace_stop"() : () -> ()
    %c0_33 = arith.constant 0 : index
    %c0_34 = arith.constant 0 : index
    %c0_35 = arith.constant 0 : index
    %59 = vector.load %arg10[%c0_33, %c0_34, %c0_35] : memref<2x16x16xf32, #tpu.memory_space<vmem>>, vector<1x16x16xf32>
    %60 = vector.shape_cast %59 : vector<1x16x16xf32> to vector<16x16xf32>
    %61 = vector.shape_cast %60 : vector<16x16xf32> to vector<1x16x16xf32>
    %62 = vector.broadcast %61 : vector<1x16x16xf32> to vector<4x16x16xf32>
    %63 = arith.addf %58, %62 : vector<4x16x16xf32>
    %cst_36 = arith.constant dense<0xFF800000> : vector<4x16xf32>
    %64 = vector.multi_reduction <maximumf>, %63, %cst_36 [2] : vector<4x16x16xf32> to vector<4x16xf32>
    %65 = vector.shape_cast %64 : vector<4x16xf32> to vector<4x16x1xf32>
    %66 = vector.broadcast %65 : vector<4x16x1xf32> to vector<4x16x16xf32>
    %67 = arith.subf %63, %66 : vector<4x16x16xf32>
    %68 = math.exp %67 : vector<4x16x16xf32>
    %cst_37 = arith.constant dense<0.000000e+00> : vector<4x16xf32>
    %69 = vector.multi_reduction <add>, %68, %cst_37 [2] : vector<4x16x16xf32> to vector<4x16xf32>
    %70 = vector.shape_cast %69 : vector<4x16xf32> to vector<4x16x1xf32>
    %71 = tpu.reciprocal %70 : vector<4x16x1xf32> -> vector<4x16x1xf32>
    %72 = vector.broadcast %71 : vector<4x16x1xf32> to vector<4x16x16xf32>
    %73 = arith.mulf %68, %72 : vector<4x16x16xf32>
    %74 = arith.truncf %73 : vector<4x16x16xf32> to vector<4x16x16xbf16>
    "tpu.trace_start"() <{level = 10 : i32, message = "wnm,wmd->wnd"}> : () -> ()
    %cst_38 = arith.constant dense<0.000000e+00> : vector<4x16x8xf32>
    %75 = tpu.matmul %74, %57, %cst_38 {dimension_numbers = #tpu.dot_dimension_numbers<[2], [1], [1], [2], [0, 0, 0, 1, 1, 2], [0], [0]>} : vector<4x16x16xbf16>, vector<4x16x8xbf16>, vector<4x16x8xf32> -> vector<4x16x8xf32>
    "tpu.trace_stop"() : () -> ()
    %c1 = arith.constant 1 : index
    %c0_39 = arith.constant 0 : index
    %c0_40 = arith.constant 0 : index
    %76 = vector.load %arg4[%c1, %c0_39, %c0_40] : memref<2x16x8xbf16, #tpu.memory_space<vmem>>, vector<1x16x8xbf16>
    %77 = vector.shape_cast %76 : vector<1x16x8xbf16> to vector<16x8xbf16>
    %cst_41 = arith.constant dense<0.000000e+00> : vector<64x8xf32>
    %78 = tpu.matmul %28, %77, %cst_41 {dimension_numbers = #tpu.dot_dimension_numbers<[1], [0], [0], [1], [0, 0, 1, 1], [], []>} : vector<64x16xbf16>, vector<16x8xbf16>, vector<64x8xf32> -> vector<64x8xf32>
    %c1_42 = arith.constant 1 : index
    %c0_43 = arith.constant 0 : index
    %c0_44 = arith.constant 0 : index
    %79 = vector.load %arg7[%c1_42, %c0_43, %c0_44] : memref<2x1x8xf32, #tpu.memory_space<vmem>>, vector<1x1x8xf32>
    %80 = vector.shape_cast %79 : vector<1x1x8xf32> to vector<1x8xf32>
    %81 = vector.broadcast %80 : vector<1x8xf32> to vector<64x8xf32>
    %82 = arith.addf %78, %81 : vector<64x8xf32>
    %c1_45 = arith.constant 1 : index
    %c0_46 = arith.constant 0 : index
    %c0_47 = arith.constant 0 : index
    %83 = vector.load %arg5[%c1_45, %c0_46, %c0_47] : memref<2x16x8xbf16, #tpu.memory_space<vmem>>, vector<1x16x8xbf16>
    %84 = vector.shape_cast %83 : vector<1x16x8xbf16> to vector<16x8xbf16>
    %cst_48 = arith.constant dense<0.000000e+00> : vector<64x8xf32>
    %85 = tpu.matmul %28, %84, %cst_48 {dimension_numbers = #tpu.dot_dimension_numbers<[1], [0], [0], [1], [0, 0, 1, 1], [], []>} : vector<64x16xbf16>, vector<16x8xbf16>, vector<64x8xf32> -> vector<64x8xf32>
    %c1_49 = arith.constant 1 : index
    %c0_50 = arith.constant 0 : index
    %c0_51 = arith.constant 0 : index
    %86 = vector.load %arg8[%c1_49, %c0_50, %c0_51] : memref<2x1x8xf32, #tpu.memory_space<vmem>>, vector<1x1x8xf32>
    %87 = vector.shape_cast %86 : vector<1x1x8xf32> to vector<1x8xf32>
    %88 = vector.broadcast %87 : vector<1x8xf32> to vector<64x8xf32>
    %89 = arith.addf %85, %88 : vector<64x8xf32>
    %c1_52 = arith.constant 1 : index
    %c0_53 = arith.constant 0 : index
    %c0_54 = arith.constant 0 : index
    %90 = vector.load %arg6[%c1_52, %c0_53, %c0_54] : memref<2x16x8xbf16, #tpu.memory_space<vmem>>, vector<1x16x8xbf16>
    %91 = vector.shape_cast %90 : vector<1x16x8xbf16> to vector<16x8xbf16>
    %cst_55 = arith.constant dense<0.000000e+00> : vector<64x8xf32>
    %92 = tpu.matmul %28, %91, %cst_55 {dimension_numbers = #tpu.dot_dimension_numbers<[1], [0], [0], [1], [0, 0, 1, 1], [], []>} : vector<64x16xbf16>, vector<16x8xbf16>, vector<64x8xf32> -> vector<64x8xf32>
    %c1_56 = arith.constant 1 : index
    %c0_57 = arith.constant 0 : index
    %c0_58 = arith.constant 0 : index
    %93 = vector.load %arg9[%c1_56, %c0_57, %c0_58] : memref<2x1x8xf32, #tpu.memory_space<vmem>>, vector<1x1x8xf32>
    %94 = vector.shape_cast %93 : vector<1x1x8xf32> to vector<1x8xf32>
    %95 = vector.broadcast %94 : vector<1x8xf32> to vector<64x8xf32>
    %96 = arith.addf %92, %95 : vector<64x8xf32>
    %cst_59 = arith.constant 0.353553385 : f32
    %97 = vector.broadcast %cst_59 : f32 to vector<64x8xf32>
    %98 = arith.mulf %82, %97 : vector<64x8xf32>
    %99 = vector.shape_cast %98 : vector<64x8xf32> to vector<4x16x8xf32>
    %100 = arith.truncf %99 : vector<4x16x8xf32> to vector<4x16x8xbf16>
    %101 = vector.shape_cast %89 : vector<64x8xf32> to vector<4x16x8xf32>
    %102 = arith.truncf %101 : vector<4x16x8xf32> to vector<4x16x8xbf16>
    %103 = vector.shape_cast %96 : vector<64x8xf32> to vector<4x16x8xf32>
    %104 = arith.truncf %103 : vector<4x16x8xf32> to vector<4x16x8xbf16>
    "tpu.trace_start"() <{level = 10 : i32, message = "wnd,wmd->wnm"}> : () -> ()
    %cst_60 = arith.constant dense<0.000000e+00> : vector<4x16x16xf32>
    %105 = tpu.matmul %100, %102, %cst_60 {dimension_numbers = #tpu.dot_dimension_numbers<[2], [2], [1], [1], [0, 0, 0, 1, 1, 1], [0], [0]>} : vector<4x16x8xbf16>, vector<4x16x8xbf16>, vector<4x16x16xf32> -> vector<4x16x16xf32>
    "tpu.trace_stop"() : () -> ()
    %c1_61 = arith.constant 1 : index
    %c0_62 = arith.constant 0 : index
    %c0_63 = arith.constant 0 : index
    %106 = vector.load %arg10[%c1_61, %c0_62, %c0_63] : memref<2x16x16xf32, #tpu.memory_space<vmem>>, vector<1x16x16xf32>
    %107 = vector.shape_cast %106 : vector<1x16x16xf32> to vector<16x16xf32>
    %108 = vector.shape_cast %107 : vector<16x16xf32> to vector<1x16x16xf32>
    %109 = vector.broadcast %108 : vector<1x16x16xf32> to vector<4x16x16xf32>
    %110 = arith.addf %105, %109 : vector<4x16x16xf32>
    %cst_64 = arith.constant dense<0xFF800000> : vector<4x16xf32>
    %111 = vector.multi_reduction <maximumf>, %110, %cst_64 [2] : vector<4x16x16xf32> to vector<4x16xf32>
    %112 = vector.shape_cast %111 : vector<4x16xf32> to vector<4x16x1xf32>
    %113 = vector.broadcast %112 : vector<4x16x1xf32> to vector<4x16x16xf32>
    %114 = arith.subf %110, %113 : vector<4x16x16xf32>
    %115 = math.exp %114 : vector<4x16x16xf32>
    %cst_65 = arith.constant dense<0.000000e+00> : vector<4x16xf32>
    %116 = vector.multi_reduction <add>, %115, %cst_65 [2] : vector<4x16x16xf32> to vector<4x16xf32>
    %117 = vector.shape_cast %116 : vector<4x16xf32> to vector<4x16x1xf32>
    %118 = tpu.reciprocal %117 : vector<4x16x1xf32> -> vector<4x16x1xf32>
    %119 = vector.broadcast %118 : vector<4x16x1xf32> to vector<4x16x16xf32>
    %120 = arith.mulf %115, %119 : vector<4x16x16xf32>
    %121 = arith.truncf %120 : vector<4x16x16xf32> to vector<4x16x16xbf16>
    "tpu.trace_start"() <{level = 10 : i32, message = "wnm,wmd->wnd"}> : () -> ()
    %cst_66 = arith.constant dense<0.000000e+00> : vector<4x16x8xf32>
    %122 = tpu.matmul %121, %104, %cst_66 {dimension_numbers = #tpu.dot_dimension_numbers<[2], [1], [1], [2], [0, 0, 0, 1, 1, 2], [0], [0]>} : vector<4x16x16xbf16>, vector<4x16x8xbf16>, vector<4x16x8xf32> -> vector<4x16x8xf32>
    "tpu.trace_stop"() : () -> ()
    %123 = tpu.concatenate %75, %122 in 2 : vector<4x16x8xf32>, vector<4x16x8xf32> -> vector<4x16x16xf32>
    %124 = vector.shape_cast %123 : vector<4x16x16xf32> to vector<64x16xf32>
    %125 = arith.truncf %124 : vector<64x16xf32> to vector<64x16xbf16>
    %c0_67 = arith.constant 0 : index
    %c0_68 = arith.constant 0 : index
    %126 = vector.load %arg11[%c0_67, %c0_68] : memref<16x16xbf16, #tpu.memory_space<vmem>>, vector<16x16xbf16>
    %cst_69 = arith.constant dense<0.000000e+00> : vector<64x16xf32>
    %127 = tpu.matmul %125, %126, %cst_69 {dimension_numbers = #tpu.dot_dimension_numbers<[1], [0], [0], [1], [0, 0, 1, 1], [], []>} : vector<64x16xbf16>, vector<16x16xbf16>, vector<64x16xf32> -> vector<64x16xf32>
    %c0_70 = arith.constant 0 : index
    %c0_71 = arith.constant 0 : index
    %128 = vector.load %arg12[%c0_70, %c0_71] : memref<1x16xf32, #tpu.memory_space<vmem>>, vector<1x16xf32>
    %129 = vector.broadcast %128 : vector<1x16xf32> to vector<64x16xf32>
    %130 = arith.addf %127, %129 : vector<64x16xf32>
    %131 = vector.shape_cast %130 : vector<64x16xf32> to vector<4x16x16xf32>
    %c0_72 = arith.constant 0 : index
    %c0_73 = arith.constant 0 : index
    %c0_74 = arith.constant 0 : index
    %132 = vector.load %arg13[%c0_72, %c0_73, %c0_74] : memref<4x16x16xf32, #tpu.memory_space<vmem>>, vector<4x16x16xf32>
    tpu.vector_store %arg13[%c0_72, %c0_73, %c0_74], %131 {strides = array<i32>} : memref<4x16x16xf32, #tpu.memory_space<vmem>>, vector<4x16x16xf32>,
    return
  }
  func.func @transform_0(%arg0: i32) -> (i32, i32, i32) {
    %c0_i32 = arith.constant 0 : i32
    %c0_i32_0 = arith.constant 0 : i32
    %c0_i32_1 = arith.constant 0 : i32
    return %arg0, %c0_i32, %c0_i32_0 : i32, i32, i32
  }
  func.func @transform_1(%arg0: i32) -> (i32, i32) {
    %c0_i32 = arith.constant 0 : i32
    %c0_i32_0 = arith.constant 0 : i32
    %c0_i32_1 = arith.constant 0 : i32
    return %c0_i32, %c0_i32_0 : i32, i32
  }
  func.func @transform_2(%arg0: i32) -> (i32, i32) {
    %c0_i32 = arith.constant 0 : i32
    %c0_i32_0 = arith.constant 0 : i32
    %c0_i32_1 = arith.constant 0 : i32
    return %c0_i32, %c0_i32_0 : i32, i32
  }
  func.func @transform_3(%arg0: i32) -> (i32, i32, i32) {
    %c0_i32 = arith.constant 0 : i32
    %c0_i32_0 = arith.constant 0 : i32
    %c0_i32_1 = arith.constant 0 : i32
    %c0_i32_2 = arith.constant 0 : i32
    return %c0_i32, %c0_i32_0, %c0_i32_1 : i32, i32, i32
  }
  func.func @transform_4(%arg0: i32) -> (i32, i32, i32) {
    %c0_i32 = arith.constant 0 : i32
    %c0_i32_0 = arith.constant 0 : i32
    %c0_i32_1 = arith.constant 0 : i32
    %c0_i32_2 = arith.constant 0 : i32
    return %c0_i32, %c0_i32_0, %c0_i32_1 : i32, i32, i32
  }
  func.func @transform_5(%arg0: i32) -> (i32, i32, i32) {
    %c0_i32 = arith.constant 0 : i32
    %c0_i32_0 = arith.constant 0 : i32
    %c0_i32_1 = arith.constant 0 : i32
    %c0_i32_2 = arith.constant 0 : i32
    return %c0_i32, %c0_i32_0, %c0_i32_1 : i32, i32, i32
  }
  func.func @transform_6(%arg0: i32) -> (i32, i32, i32) {
    %c0_i32 = arith.constant 0 : i32
    %c0_i32_0 = arith.constant 0 : i32
    %c0_i32_1 = arith.constant 0 : i32
    %c0_i32_2 = arith.constant 0 : i32
    return %c0_i32, %c0_i32_0, %c0_i32_1 : i32, i32, i32
  }
  func.func @transform_7(%arg0: i32) -> (i32, i32, i32) {
    %c0_i32 = arith.constant 0 : i32
    %c0_i32_0 = arith.constant 0 : i32
    %c0_i32_1 = arith.constant 0 : i32
    %c0_i32_2 = arith.constant 0 : i32
    return %c0_i32, %c0_i32_0, %c0_i32_1 : i32, i32, i32
  }
  func.func @transform_8(%arg0: i32) -> (i32, i32, i32) {
    %c0_i32 = arith.constant 0 : i32
    %c0_i32_0 = arith.constant 0 : i32
    %c0_i32_1 = arith.constant 0 : i32
    %c0_i32_2 = arith.constant 0 : i32
    return %c0_i32, %c0_i32_0, %c0_i32_1 : i32, i32, i32
  }
  func.func @transform_9(%arg0: i32) -> (i32, i32, i32) {
    %c0_i32 = arith.constant 0 : i32
    %c0_i32_0 = arith.constant 0 : i32
    %c0_i32_1 = arith.constant 0 : i32
    %c0_i32_2 = arith.constant 0 : i32
    return %c0_i32, %c0_i32_0, %c0_i32_1 : i32, i32, i32
  }
  func.func @transform_10(%arg0: i32) -> (i32, i32) {
    %c0_i32 = arith.constant 0 : i32
    %c0_i32_0 = arith.constant 0 : i32
    %c0_i32_1 = arith.constant 0 : i32
    return %c0_i32, %c0_i32_0 : i32, i32
  }
  func.func @transform_11(%arg0: i32) -> (i32, i32) {
    %c0_i32 = arith.constant 0 : i32
    %c0_i32_0 = arith.constant 0 : i32
    %c0_i32_1 = arith.constant 0 : i32
    return %c0_i32, %c0_i32_0 : i32, i32
  }
  func.func @transform_12(%arg0: i32) -> (i32, i32, i32) {
    %c0_i32 = arith.constant 0 : i32
    %c0_i32_0 = arith.constant 0 : i32
    %c0_i32_1 = arith.constant 0 : i32
    return %arg0, %c0_i32, %c0_i32_0 : i32, i32, i32
  }
}

module attributes {stable_mosaic.version = 11 : i64} {
  func.func @mlp_residual_kernel(%arg0: i32, %arg1: memref<64x16xf32, #tpu.memory_space<vmem>>, %arg2: memref<64x16xf32, #tpu.memory_space<vmem>>, %arg3: memref<1x16xf32, #tpu.memory_space<vmem>>, %arg4: memref<1x16xf32, #tpu.memory_space<vmem>>, %arg5: memref<16x64xbf16, #tpu.memory_space<vmem>>, %arg6: memref<1x64xf32, #tpu.memory_space<vmem>>, %arg7: memref<64x16xbf16, #tpu.memory_space<vmem>>, %arg8: memref<1x16xf32, #tpu.memory_space<vmem>>, %arg9: memref<64x16xf32, #tpu.memory_space<vmem>>) attributes {dimension_semantics = [#tpu.dimension_semantics<parallel>], iteration_bounds = array<i64: 2>, scalar_prefetch = 0 : i64, scratch_operands = 0 : i64, tpu.core_type = #tpu.core_type<tc>, window_params = [{transform_indices = @transform_0, window_bounds = array<i64: 64, 16>}, {transform_indices = @transform_1, window_bounds = array<i64: 64, 16>}, {pipeline_mode = #tpu.pipeline_mode<synchronous>, transform_indices = @transform_2, window_bounds = array<i64: 1, 16>}, {pipeline_mode = #tpu.pipeline_mode<synchronous>, transform_indices = @transform_3, window_bounds = array<i64: 1, 16>}, {pipeline_mode = #tpu.pipeline_mode<synchronous>, transform_indices = @transform_4, window_bounds = array<i64: 16, 64>}, {pipeline_mode = #tpu.pipeline_mode<synchronous>, transform_indices = @transform_5, window_bounds = array<i64: 1, 64>}, {pipeline_mode = #tpu.pipeline_mode<synchronous>, transform_indices = @transform_6, window_bounds = array<i64: 64, 16>}, {pipeline_mode = #tpu.pipeline_mode<synchronous>, transform_indices = @transform_7, window_bounds = array<i64: 1, 16>}, {transform_indices = @transform_8, window_bounds = array<i64: 64, 16>}]} {
    %c0 = arith.constant 0 : index
    %c0_0 = arith.constant 0 : index
    %0 = vector.load %arg1[%c0, %c0_0] : memref<64x16xf32, #tpu.memory_space<vmem>>, vector<64x16xf32>
    %c0_1 = arith.constant 0 : index
    %c0_2 = arith.constant 0 : index
    %1 = vector.load %arg2[%c0_1, %c0_2] : memref<64x16xf32, #tpu.memory_space<vmem>>, vector<64x16xf32>
    %2 = arith.addf %0, %1 : vector<64x16xf32>
    %c0_3 = arith.constant 0 : index
    %c0_4 = arith.constant 0 : index
    %3 = vector.load %arg3[%c0_3, %c0_4] : memref<1x16xf32, #tpu.memory_space<vmem>>, vector<1x16xf32>
    %c0_5 = arith.constant 0 : index
    %c0_6 = arith.constant 0 : index
    %4 = vector.load %arg4[%c0_5, %c0_6] : memref<1x16xf32, #tpu.memory_space<vmem>>, vector<1x16xf32>
    %cst = arith.constant dense<0.000000e+00> : vector<64xf32>
    %5 = vector.multi_reduction <add>, %2, %cst [1] : vector<64x16xf32> to vector<64xf32>
    %6 = vector.shape_cast %5 : vector<64xf32> to vector<64x1xf32>
    %cst_7 = arith.constant 1.600000e+01 : f32
    %7 = vector.broadcast %cst_7 : f32 to vector<64x1xf32>
    %8 = arith.divf %6, %7 : vector<64x1xf32>
    %9 = vector.broadcast %8 : vector<64x1xf32> to vector<64x16xf32>
    %10 = arith.subf %2, %9 : vector<64x16xf32>
    %11 = arith.mulf %10, %10 : vector<64x16xf32>
    %cst_8 = arith.constant dense<0.000000e+00> : vector<64xf32>
    %12 = vector.multi_reduction <add>, %11, %cst_8 [1] : vector<64x16xf32> to vector<64xf32>
    %13 = vector.shape_cast %12 : vector<64xf32> to vector<64x1xf32>
    %cst_9 = arith.constant 1.600000e+01 : f32
    %14 = vector.broadcast %cst_9 : f32 to vector<64x1xf32>
    %15 = arith.divf %13, %14 : vector<64x1xf32>
    %16 = vector.broadcast %8 : vector<64x1xf32> to vector<64x16xf32>
    %17 = arith.subf %2, %16 : vector<64x16xf32>
    %cst_10 = arith.constant 9.99999974E-6 : f32
    %18 = vector.broadcast %cst_10 : f32 to vector<64x1xf32>
    %19 = arith.addf %15, %18 : vector<64x1xf32>
    %20 = math.rsqrt %19 : vector<64x1xf32>
    %21 = vector.broadcast %20 : vector<64x1xf32> to vector<64x16xf32>
    %22 = arith.mulf %17, %21 : vector<64x16xf32>
    %23 = vector.broadcast %3 : vector<1x16xf32> to vector<64x16xf32>
    %24 = arith.mulf %22, %23 : vector<64x16xf32>
    %25 = vector.broadcast %4 : vector<1x16xf32> to vector<64x16xf32>
    %26 = arith.addf %24, %25 : vector<64x16xf32>
    %27 = arith.truncf %26 : vector<64x16xf32> to vector<64x16xbf16>
    %c0_11 = arith.constant 0 : index
    %c0_12 = arith.constant 0 : index
    %28 = vector.load %arg5[%c0_11, %c0_12] : memref<16x64xbf16, #tpu.memory_space<vmem>>, vector<16x64xbf16>
    %cst_13 = arith.constant dense<0.000000e+00> : vector<64x64xf32>
    %29 = tpu.matmul %27, %28, %cst_13 {dimension_numbers = #tpu.dot_dimension_numbers<[1], [0], [0], [1], [0, 0, 1, 1], [], []>} : vector<64x16xbf16>, vector<16x64xbf16>, vector<64x64xf32> -> vector<64x64xf32>
    %c0_14 = arith.constant 0 : index
    %c0_15 = arith.constant 0 : index
    %30 = vector.load %arg6[%c0_14, %c0_15] : memref<1x64xf32, #tpu.memory_space<vmem>>, vector<1x64xf32>
    %31 = vector.broadcast %30 : vector<1x64xf32> to vector<64x64xf32>
    %32 = arith.addf %29, %31 : vector<64x64xf32>
    %cst_16 = arith.constant 5.000000e-01 : f32
    %33 = vector.broadcast %cst_16 : f32 to vector<64x64xf32>
    %34 = arith.mulf %33, %32 : vector<64x64xf32>
    %cst_17 = arith.constant 4.471500e-02 : f32
    %35 = vector.broadcast %cst_17 : f32 to vector<64x64xf32>
    %36 = arith.mulf %35, %32 : vector<64x64xf32>
    %37 = arith.mulf %36, %32 : vector<64x64xf32>
    %38 = arith.mulf %37, %32 : vector<64x64xf32>
    %39 = arith.addf %32, %38 : vector<64x64xf32>
    %cst_18 = arith.constant 0.797884583 : f32
    %40 = vector.broadcast %cst_18 : f32 to vector<64x64xf32>
    %41 = arith.mulf %40, %39 : vector<64x64xf32>
    %42 = math.tanh %41 : vector<64x64xf32>
    %cst_19 = arith.constant 1.000000e+00 : f32
    %43 = vector.broadcast %cst_19 : f32 to vector<64x64xf32>
    %44 = arith.addf %43, %42 : vector<64x64xf32>
    %45 = arith.mulf %34, %44 : vector<64x64xf32>
    %46 = arith.truncf %45 : vector<64x64xf32> to vector<64x64xbf16>
    %c0_20 = arith.constant 0 : index
    %c0_21 = arith.constant 0 : index
    %47 = vector.load %arg7[%c0_20, %c0_21] : memref<64x16xbf16, #tpu.memory_space<vmem>>, vector<64x16xbf16>
    %cst_22 = arith.constant dense<0.000000e+00> : vector<64x16xf32>
    %48 = tpu.matmul %46, %47, %cst_22 {dimension_numbers = #tpu.dot_dimension_numbers<[1], [0], [0], [1], [0, 0, 1, 1], [], []>} : vector<64x64xbf16>, vector<64x16xbf16>, vector<64x16xf32> -> vector<64x16xf32>
    %c0_23 = arith.constant 0 : index
    %c0_24 = arith.constant 0 : index
    %49 = vector.load %arg8[%c0_23, %c0_24] : memref<1x16xf32, #tpu.memory_space<vmem>>, vector<1x16xf32>
    %50 = vector.broadcast %49 : vector<1x16xf32> to vector<64x16xf32>
    %51 = arith.addf %48, %50 : vector<64x16xf32>
    %52 = arith.addf %2, %51 : vector<64x16xf32>
    %c0_25 = arith.constant 0 : index
    %c0_26 = arith.constant 0 : index
    %53 = vector.load %arg9[%c0_25, %c0_26] : memref<64x16xf32, #tpu.memory_space<vmem>>, vector<64x16xf32>
    tpu.vector_store %arg9[%c0_25, %c0_26], %52 {strides = array<i32>} : memref<64x16xf32, #tpu.memory_space<vmem>>, vector<64x16xf32>,
    return
  }
  func.func @transform_0(%arg0: i32) -> (i32, i32) {
    %c0_i32 = arith.constant 0 : i32
    %c0_i32_0 = arith.constant 0 : i32
    return %arg0, %c0_i32 : i32, i32
  }
  func.func @transform_1(%arg0: i32) -> (i32, i32) {
    %c0_i32 = arith.constant 0 : i32
    %c0_i32_0 = arith.constant 0 : i32
    return %arg0, %c0_i32 : i32, i32
  }
  func.func @transform_2(%arg0: i32) -> (i32, i32) {
    %c0_i32 = arith.constant 0 : i32
    %c0_i32_0 = arith.constant 0 : i32
    %c0_i32_1 = arith.constant 0 : i32
    return %c0_i32, %c0_i32_0 : i32, i32
  }
  func.func @transform_3(%arg0: i32) -> (i32, i32) {
    %c0_i32 = arith.constant 0 : i32
    %c0_i32_0 = arith.constant 0 : i32
    %c0_i32_1 = arith.constant 0 : i32
    return %c0_i32, %c0_i32_0 : i32, i32
  }
  func.func @transform_4(%arg0: i32) -> (i32, i32) {
    %c0_i32 = arith.constant 0 : i32
    %c0_i32_0 = arith.constant 0 : i32
    %c0_i32_1 = arith.constant 0 : i32
    return %c0_i32, %c0_i32_0 : i32, i32
  }
  func.func @transform_5(%arg0: i32) -> (i32, i32) {
    %c0_i32 = arith.constant 0 : i32
    %c0_i32_0 = arith.constant 0 : i32
    %c0_i32_1 = arith.constant 0 : i32
    return %c0_i32, %c0_i32_0 : i32, i32
  }
  func.func @transform_6(%arg0: i32) -> (i32, i32) {
    %c0_i32 = arith.constant 0 : i32
    %c0_i32_0 = arith.constant 0 : i32
    %c0_i32_1 = arith.constant 0 : i32
    return %c0_i32, %c0_i32_0 : i32, i32
  }
  func.func @transform_7(%arg0: i32) -> (i32, i32) {
    %c0_i32 = arith.constant 0 : i32
    %c0_i32_0 = arith.constant 0 : i32
    %c0_i32_1 = arith.constant 0 : i32
    return %c0_i32, %c0_i32_0 : i32, i32
  }
  func.func @transform_8(%arg0: i32) -> (i32, i32) {
    %c0_i32 = arith.constant 0 : i32
    %c0_i32_0 = arith.constant 0 : i32
    return %arg0, %c0_i32 : i32, i32
  }
}

module attributes {stable_mosaic.version = 11 : i64} {
  func.func @window_attention_kernel(%arg0: i32, %arg1: memref<4x16x16xf32, #tpu.memory_space<vmem>>, %arg2: memref<1x16xf32, #tpu.memory_space<vmem>>, %arg3: memref<1x16xf32, #tpu.memory_space<vmem>>, %arg4: memref<2x16x8xbf16, #tpu.memory_space<vmem>>, %arg5: memref<2x16x8xbf16, #tpu.memory_space<vmem>>, %arg6: memref<2x16x8xbf16, #tpu.memory_space<vmem>>, %arg7: memref<2x1x8xf32, #tpu.memory_space<vmem>>, %arg8: memref<2x1x8xf32, #tpu.memory_space<vmem>>, %arg9: memref<2x1x8xf32, #tpu.memory_space<vmem>>, %arg10: memref<2x16x16xf32, #tpu.memory_space<vmem>>, %arg11: memref<4x16x16xf32, #tpu.memory_space<vmem>>, %arg12: memref<16x16xbf16, #tpu.memory_space<vmem>>, %arg13: memref<1x16xf32, #tpu.memory_space<vmem>>, %arg14: memref<4x16x16xf32, #tpu.memory_space<vmem>>) attributes {dimension_semantics = [#tpu.dimension_semantics<parallel>], iteration_bounds = array<i64: 2>, scalar_prefetch = 0 : i64, scratch_operands = 0 : i64, tpu.core_type = #tpu.core_type<tc>, window_params = [{transform_indices = @transform_0, window_bounds = array<i64: 4, 16, 16>}, {pipeline_mode = #tpu.pipeline_mode<synchronous>, transform_indices = @transform_1, window_bounds = array<i64: 1, 16>}, {pipeline_mode = #tpu.pipeline_mode<synchronous>, transform_indices = @transform_2, window_bounds = array<i64: 1, 16>}, {pipeline_mode = #tpu.pipeline_mode<synchronous>, transform_indices = @transform_3, window_bounds = array<i64: 2, 16, 8>}, {pipeline_mode = #tpu.pipeline_mode<synchronous>, transform_indices = @transform_4, window_bounds = array<i64: 2, 16, 8>}, {pipeline_mode = #tpu.pipeline_mode<synchronous>, transform_indices = @transform_5, window_bounds = array<i64: 2, 16, 8>}, {pipeline_mode = #tpu.pipeline_mode<synchronous>, transform_indices = @transform_6, window_bounds = array<i64: 2, 1, 8>}, {pipeline_mode = #tpu.pipeline_mode<synchronous>, transform_indices = @transform_7, window_bounds = array<i64: 2, 1, 8>}, {pipeline_mode = #tpu.pipeline_mode<synchronous>, transform_indices = @transform_8, window_bounds = array<i64: 2, 1, 8>}, {pipeline_mode = #tpu.pipeline_mode<synchronous>, transform_indices = @transform_9, window_bounds = array<i64: 2, 16, 16>}, {transform_indices = @transform_10, window_bounds = array<i64: 4, 16, 16>}, {pipeline_mode = #tpu.pipeline_mode<synchronous>, transform_indices = @transform_11, window_bounds = array<i64: 16, 16>}, {pipeline_mode = #tpu.pipeline_mode<synchronous>, transform_indices = @transform_12, window_bounds = array<i64: 1, 16>}, {transform_indices = @transform_13, window_bounds = array<i64: 4, 16, 16>}]} {
    %c0 = arith.constant 0 : index
    %c0_0 = arith.constant 0 : index
    %c0_1 = arith.constant 0 : index
    %0 = vector.load %arg1[%c0, %c0_0, %c0_1] : memref<4x16x16xf32, #tpu.memory_space<vmem>>, vector<4x16x16xf32>
    %c0_2 = arith.constant 0 : index
    %c0_3 = arith.constant 0 : index
    %1 = vector.load %arg2[%c0_2, %c0_3] : memref<1x16xf32, #tpu.memory_space<vmem>>, vector<1x16xf32>
    %c0_4 = arith.constant 0 : index
    %c0_5 = arith.constant 0 : index
    %2 = vector.load %arg3[%c0_4, %c0_5] : memref<1x16xf32, #tpu.memory_space<vmem>>, vector<1x16xf32>
    %cst = arith.constant dense<0.000000e+00> : vector<4x16xf32>
    %3 = vector.multi_reduction <add>, %0, %cst [2] : vector<4x16x16xf32> to vector<4x16xf32>
    %4 = vector.shape_cast %3 : vector<4x16xf32> to vector<4x16x1xf32>
    %cst_6 = arith.constant 1.600000e+01 : f32
    %5 = vector.broadcast %cst_6 : f32 to vector<4x16x1xf32>
    %6 = arith.divf %4, %5 : vector<4x16x1xf32>
    %7 = vector.broadcast %6 : vector<4x16x1xf32> to vector<4x16x16xf32>
    %8 = arith.subf %0, %7 : vector<4x16x16xf32>
    %9 = arith.mulf %8, %8 : vector<4x16x16xf32>
    %cst_7 = arith.constant dense<0.000000e+00> : vector<4x16xf32>
    %10 = vector.multi_reduction <add>, %9, %cst_7 [2] : vector<4x16x16xf32> to vector<4x16xf32>
    %11 = vector.shape_cast %10 : vector<4x16xf32> to vector<4x16x1xf32>
    %cst_8 = arith.constant 1.600000e+01 : f32
    %12 = vector.broadcast %cst_8 : f32 to vector<4x16x1xf32>
    %13 = arith.divf %11, %12 : vector<4x16x1xf32>
    %14 = vector.broadcast %6 : vector<4x16x1xf32> to vector<4x16x16xf32>
    %15 = arith.subf %0, %14 : vector<4x16x16xf32>
    %cst_9 = arith.constant 9.99999974E-6 : f32
    %16 = vector.broadcast %cst_9 : f32 to vector<4x16x1xf32>
    %17 = arith.addf %13, %16 : vector<4x16x1xf32>
    %18 = math.rsqrt %17 : vector<4x16x1xf32>
    %19 = vector.broadcast %18 : vector<4x16x1xf32> to vector<4x16x16xf32>
    %20 = arith.mulf %15, %19 : vector<4x16x16xf32>
    %21 = vector.shape_cast %1 : vector<1x16xf32> to vector<1x1x16xf32>
    %22 = vector.broadcast %21 : vector<1x1x16xf32> to vector<4x16x16xf32>
    %23 = arith.mulf %20, %22 : vector<4x16x16xf32>
    %24 = vector.shape_cast %2 : vector<1x16xf32> to vector<1x1x16xf32>
    %25 = vector.broadcast %24 : vector<1x1x16xf32> to vector<4x16x16xf32>
    %26 = arith.addf %23, %25 : vector<4x16x16xf32>
    %27 = vector.shape_cast %26 : vector<4x16x16xf32> to vector<64x16xf32>
    %28 = arith.truncf %27 : vector<64x16xf32> to vector<64x16xbf16>
    %c0_10 = arith.constant 0 : index
    %c0_11 = arith.constant 0 : index
    %c0_12 = arith.constant 0 : index
    %29 = vector.load %arg4[%c0_10, %c0_11, %c0_12] : memref<2x16x8xbf16, #tpu.memory_space<vmem>>, vector<1x16x8xbf16>
    %30 = vector.shape_cast %29 : vector<1x16x8xbf16> to vector<16x8xbf16>
    %cst_13 = arith.constant dense<0.000000e+00> : vector<64x8xf32>
    %31 = tpu.matmul %28, %30, %cst_13 {dimension_numbers = #tpu.dot_dimension_numbers<[1], [0], [0], [1], [0, 0, 1, 1], [], []>} : vector<64x16xbf16>, vector<16x8xbf16>, vector<64x8xf32> -> vector<64x8xf32>
    %c0_14 = arith.constant 0 : index
    %c0_15 = arith.constant 0 : index
    %c0_16 = arith.constant 0 : index
    %32 = vector.load %arg7[%c0_14, %c0_15, %c0_16] : memref<2x1x8xf32, #tpu.memory_space<vmem>>, vector<1x1x8xf32>
    %33 = vector.shape_cast %32 : vector<1x1x8xf32> to vector<1x8xf32>
    %34 = vector.broadcast %33 : vector<1x8xf32> to vector<64x8xf32>
    %35 = arith.addf %31, %34 : vector<64x8xf32>
    %c0_17 = arith.constant 0 : index
    %c0_18 = arith.constant 0 : index
    %c0_19 = arith.constant 0 : index
    %36 = vector.load %arg5[%c0_17, %c0_18, %c0_19] : memref<2x16x8xbf16, #tpu.memory_space<vmem>>, vector<1x16x8xbf16>
    %37 = vector.shape_cast %36 : vector<1x16x8xbf16> to vector<16x8xbf16>
    %cst_20 = arith.constant dense<0.000000e+00> : vector<64x8xf32>
    %38 = tpu.matmul %28, %37, %cst_20 {dimension_numbers = #tpu.dot_dimension_numbers<[1], [0], [0], [1], [0, 0, 1, 1], [], []>} : vector<64x16xbf16>, vector<16x8xbf16>, vector<64x8xf32> -> vector<64x8xf32>
    %c0_21 = arith.constant 0 : index
    %c0_22 = arith.constant 0 : index
    %c0_23 = arith.constant 0 : index
    %39 = vector.load %arg8[%c0_21, %c0_22, %c0_23] : memref<2x1x8xf32, #tpu.memory_space<vmem>>, vector<1x1x8xf32>
    %40 = vector.shape_cast %39 : vector<1x1x8xf32> to vector<1x8xf32>
    %41 = vector.broadcast %40 : vector<1x8xf32> to vector<64x8xf32>
    %42 = arith.addf %38, %41 : vector<64x8xf32>
    %c0_24 = arith.constant 0 : index
    %c0_25 = arith.constant 0 : index
    %c0_26 = arith.constant 0 : index
    %43 = vector.load %arg6[%c0_24, %c0_25, %c0_26] : memref<2x16x8xbf16, #tpu.memory_space<vmem>>, vector<1x16x8xbf16>
    %44 = vector.shape_cast %43 : vector<1x16x8xbf16> to vector<16x8xbf16>
    %cst_27 = arith.constant dense<0.000000e+00> : vector<64x8xf32>
    %45 = tpu.matmul %28, %44, %cst_27 {dimension_numbers = #tpu.dot_dimension_numbers<[1], [0], [0], [1], [0, 0, 1, 1], [], []>} : vector<64x16xbf16>, vector<16x8xbf16>, vector<64x8xf32> -> vector<64x8xf32>
    %c0_28 = arith.constant 0 : index
    %c0_29 = arith.constant 0 : index
    %c0_30 = arith.constant 0 : index
    %46 = vector.load %arg9[%c0_28, %c0_29, %c0_30] : memref<2x1x8xf32, #tpu.memory_space<vmem>>, vector<1x1x8xf32>
    %47 = vector.shape_cast %46 : vector<1x1x8xf32> to vector<1x8xf32>
    %48 = vector.broadcast %47 : vector<1x8xf32> to vector<64x8xf32>
    %49 = arith.addf %45, %48 : vector<64x8xf32>
    %cst_31 = arith.constant 0.353553385 : f32
    %50 = vector.broadcast %cst_31 : f32 to vector<64x8xf32>
    %51 = arith.mulf %35, %50 : vector<64x8xf32>
    %52 = vector.shape_cast %51 : vector<64x8xf32> to vector<4x16x8xf32>
    %53 = arith.truncf %52 : vector<4x16x8xf32> to vector<4x16x8xbf16>
    %54 = vector.shape_cast %42 : vector<64x8xf32> to vector<4x16x8xf32>
    %55 = arith.truncf %54 : vector<4x16x8xf32> to vector<4x16x8xbf16>
    %56 = vector.shape_cast %49 : vector<64x8xf32> to vector<4x16x8xf32>
    %57 = arith.truncf %56 : vector<4x16x8xf32> to vector<4x16x8xbf16>
    "tpu.trace_start"() <{level = 10 : i32, message = "wnd,wmd->wnm"}> : () -> ()
    %cst_32 = arith.constant dense<0.000000e+00> : vector<4x16x16xf32>
    %58 = tpu.matmul %53, %55, %cst_32 {dimension_numbers = #tpu.dot_dimension_numbers<[2], [2], [1], [1], [0, 0, 0, 1, 1, 1], [0], [0]>} : vector<4x16x8xbf16>, vector<4x16x8xbf16>, vector<4x16x16xf32> -> vector<4x16x16xf32>
    "tpu.trace_stop"() : () -> ()
    %c0_33 = arith.constant 0 : index
    %c0_34 = arith.constant 0 : index
    %c0_35 = arith.constant 0 : index
    %59 = vector.load %arg10[%c0_33, %c0_34, %c0_35] : memref<2x16x16xf32, #tpu.memory_space<vmem>>, vector<1x16x16xf32>
    %60 = vector.shape_cast %59 : vector<1x16x16xf32> to vector<16x16xf32>
    %61 = vector.shape_cast %60 : vector<16x16xf32> to vector<1x16x16xf32>
    %62 = vector.broadcast %61 : vector<1x16x16xf32> to vector<4x16x16xf32>
    %63 = arith.addf %58, %62 : vector<4x16x16xf32>
    %c0_36 = arith.constant 0 : index
    %c0_37 = arith.constant 0 : index
    %c0_38 = arith.constant 0 : index
    %64 = vector.load %arg11[%c0_36, %c0_37, %c0_38] : memref<4x16x16xf32, #tpu.memory_space<vmem>>, vector<4x16x16xf32>
    %65 = arith.addf %63, %64 : vector<4x16x16xf32>
    %cst_39 = arith.constant dense<0xFF800000> : vector<4x16xf32>
    %66 = vector.multi_reduction <maximumf>, %65, %cst_39 [2] : vector<4x16x16xf32> to vector<4x16xf32>
    %67 = vector.shape_cast %66 : vector<4x16xf32> to vector<4x16x1xf32>
    %68 = vector.broadcast %67 : vector<4x16x1xf32> to vector<4x16x16xf32>
    %69 = arith.subf %65, %68 : vector<4x16x16xf32>
    %70 = math.exp %69 : vector<4x16x16xf32>
    %cst_40 = arith.constant dense<0.000000e+00> : vector<4x16xf32>
    %71 = vector.multi_reduction <add>, %70, %cst_40 [2] : vector<4x16x16xf32> to vector<4x16xf32>
    %72 = vector.shape_cast %71 : vector<4x16xf32> to vector<4x16x1xf32>
    %73 = tpu.reciprocal %72 : vector<4x16x1xf32> -> vector<4x16x1xf32>
    %74 = vector.broadcast %73 : vector<4x16x1xf32> to vector<4x16x16xf32>
    %75 = arith.mulf %70, %74 : vector<4x16x16xf32>
    %76 = arith.truncf %75 : vector<4x16x16xf32> to vector<4x16x16xbf16>
    "tpu.trace_start"() <{level = 10 : i32, message = "wnm,wmd->wnd"}> : () -> ()
    %cst_41 = arith.constant dense<0.000000e+00> : vector<4x16x8xf32>
    %77 = tpu.matmul %76, %57, %cst_41 {dimension_numbers = #tpu.dot_dimension_numbers<[2], [1], [1], [2], [0, 0, 0, 1, 1, 2], [0], [0]>} : vector<4x16x16xbf16>, vector<4x16x8xbf16>, vector<4x16x8xf32> -> vector<4x16x8xf32>
    "tpu.trace_stop"() : () -> ()
    %c1 = arith.constant 1 : index
    %c0_42 = arith.constant 0 : index
    %c0_43 = arith.constant 0 : index
    %78 = vector.load %arg4[%c1, %c0_42, %c0_43] : memref<2x16x8xbf16, #tpu.memory_space<vmem>>, vector<1x16x8xbf16>
    %79 = vector.shape_cast %78 : vector<1x16x8xbf16> to vector<16x8xbf16>
    %cst_44 = arith.constant dense<0.000000e+00> : vector<64x8xf32>
    %80 = tpu.matmul %28, %79, %cst_44 {dimension_numbers = #tpu.dot_dimension_numbers<[1], [0], [0], [1], [0, 0, 1, 1], [], []>} : vector<64x16xbf16>, vector<16x8xbf16>, vector<64x8xf32> -> vector<64x8xf32>
    %c1_45 = arith.constant 1 : index
    %c0_46 = arith.constant 0 : index
    %c0_47 = arith.constant 0 : index
    %81 = vector.load %arg7[%c1_45, %c0_46, %c0_47] : memref<2x1x8xf32, #tpu.memory_space<vmem>>, vector<1x1x8xf32>
    %82 = vector.shape_cast %81 : vector<1x1x8xf32> to vector<1x8xf32>
    %83 = vector.broadcast %82 : vector<1x8xf32> to vector<64x8xf32>
    %84 = arith.addf %80, %83 : vector<64x8xf32>
    %c1_48 = arith.constant 1 : index
    %c0_49 = arith.constant 0 : index
    %c0_50 = arith.constant 0 : index
    %85 = vector.load %arg5[%c1_48, %c0_49, %c0_50] : memref<2x16x8xbf16, #tpu.memory_space<vmem>>, vector<1x16x8xbf16>
    %86 = vector.shape_cast %85 : vector<1x16x8xbf16> to vector<16x8xbf16>
    %cst_51 = arith.constant dense<0.000000e+00> : vector<64x8xf32>
    %87 = tpu.matmul %28, %86, %cst_51 {dimension_numbers = #tpu.dot_dimension_numbers<[1], [0], [0], [1], [0, 0, 1, 1], [], []>} : vector<64x16xbf16>, vector<16x8xbf16>, vector<64x8xf32> -> vector<64x8xf32>
    %c1_52 = arith.constant 1 : index
    %c0_53 = arith.constant 0 : index
    %c0_54 = arith.constant 0 : index
    %88 = vector.load %arg8[%c1_52, %c0_53, %c0_54] : memref<2x1x8xf32, #tpu.memory_space<vmem>>, vector<1x1x8xf32>
    %89 = vector.shape_cast %88 : vector<1x1x8xf32> to vector<1x8xf32>
    %90 = vector.broadcast %89 : vector<1x8xf32> to vector<64x8xf32>
    %91 = arith.addf %87, %90 : vector<64x8xf32>
    %c1_55 = arith.constant 1 : index
    %c0_56 = arith.constant 0 : index
    %c0_57 = arith.constant 0 : index
    %92 = vector.load %arg6[%c1_55, %c0_56, %c0_57] : memref<2x16x8xbf16, #tpu.memory_space<vmem>>, vector<1x16x8xbf16>
    %93 = vector.shape_cast %92 : vector<1x16x8xbf16> to vector<16x8xbf16>
    %cst_58 = arith.constant dense<0.000000e+00> : vector<64x8xf32>
    %94 = tpu.matmul %28, %93, %cst_58 {dimension_numbers = #tpu.dot_dimension_numbers<[1], [0], [0], [1], [0, 0, 1, 1], [], []>} : vector<64x16xbf16>, vector<16x8xbf16>, vector<64x8xf32> -> vector<64x8xf32>
    %c1_59 = arith.constant 1 : index
    %c0_60 = arith.constant 0 : index
    %c0_61 = arith.constant 0 : index
    %95 = vector.load %arg9[%c1_59, %c0_60, %c0_61] : memref<2x1x8xf32, #tpu.memory_space<vmem>>, vector<1x1x8xf32>
    %96 = vector.shape_cast %95 : vector<1x1x8xf32> to vector<1x8xf32>
    %97 = vector.broadcast %96 : vector<1x8xf32> to vector<64x8xf32>
    %98 = arith.addf %94, %97 : vector<64x8xf32>
    %cst_62 = arith.constant 0.353553385 : f32
    %99 = vector.broadcast %cst_62 : f32 to vector<64x8xf32>
    %100 = arith.mulf %84, %99 : vector<64x8xf32>
    %101 = vector.shape_cast %100 : vector<64x8xf32> to vector<4x16x8xf32>
    %102 = arith.truncf %101 : vector<4x16x8xf32> to vector<4x16x8xbf16>
    %103 = vector.shape_cast %91 : vector<64x8xf32> to vector<4x16x8xf32>
    %104 = arith.truncf %103 : vector<4x16x8xf32> to vector<4x16x8xbf16>
    %105 = vector.shape_cast %98 : vector<64x8xf32> to vector<4x16x8xf32>
    %106 = arith.truncf %105 : vector<4x16x8xf32> to vector<4x16x8xbf16>
    "tpu.trace_start"() <{level = 10 : i32, message = "wnd,wmd->wnm"}> : () -> ()
    %cst_63 = arith.constant dense<0.000000e+00> : vector<4x16x16xf32>
    %107 = tpu.matmul %102, %104, %cst_63 {dimension_numbers = #tpu.dot_dimension_numbers<[2], [2], [1], [1], [0, 0, 0, 1, 1, 1], [0], [0]>} : vector<4x16x8xbf16>, vector<4x16x8xbf16>, vector<4x16x16xf32> -> vector<4x16x16xf32>
    "tpu.trace_stop"() : () -> ()
    %c1_64 = arith.constant 1 : index
    %c0_65 = arith.constant 0 : index
    %c0_66 = arith.constant 0 : index
    %108 = vector.load %arg10[%c1_64, %c0_65, %c0_66] : memref<2x16x16xf32, #tpu.memory_space<vmem>>, vector<1x16x16xf32>
    %109 = vector.shape_cast %108 : vector<1x16x16xf32> to vector<16x16xf32>
    %110 = vector.shape_cast %109 : vector<16x16xf32> to vector<1x16x16xf32>
    %111 = vector.broadcast %110 : vector<1x16x16xf32> to vector<4x16x16xf32>
    %112 = arith.addf %107, %111 : vector<4x16x16xf32>
    %c0_67 = arith.constant 0 : index
    %c0_68 = arith.constant 0 : index
    %c0_69 = arith.constant 0 : index
    %113 = vector.load %arg11[%c0_67, %c0_68, %c0_69] : memref<4x16x16xf32, #tpu.memory_space<vmem>>, vector<4x16x16xf32>
    %114 = arith.addf %112, %113 : vector<4x16x16xf32>
    %cst_70 = arith.constant dense<0xFF800000> : vector<4x16xf32>
    %115 = vector.multi_reduction <maximumf>, %114, %cst_70 [2] : vector<4x16x16xf32> to vector<4x16xf32>
    %116 = vector.shape_cast %115 : vector<4x16xf32> to vector<4x16x1xf32>
    %117 = vector.broadcast %116 : vector<4x16x1xf32> to vector<4x16x16xf32>
    %118 = arith.subf %114, %117 : vector<4x16x16xf32>
    %119 = math.exp %118 : vector<4x16x16xf32>
    %cst_71 = arith.constant dense<0.000000e+00> : vector<4x16xf32>
    %120 = vector.multi_reduction <add>, %119, %cst_71 [2] : vector<4x16x16xf32> to vector<4x16xf32>
    %121 = vector.shape_cast %120 : vector<4x16xf32> to vector<4x16x1xf32>
    %122 = tpu.reciprocal %121 : vector<4x16x1xf32> -> vector<4x16x1xf32>
    %123 = vector.broadcast %122 : vector<4x16x1xf32> to vector<4x16x16xf32>
    %124 = arith.mulf %119, %123 : vector<4x16x16xf32>
    %125 = arith.truncf %124 : vector<4x16x16xf32> to vector<4x16x16xbf16>
    "tpu.trace_start"() <{level = 10 : i32, message = "wnm,wmd->wnd"}> : () -> ()
    %cst_72 = arith.constant dense<0.000000e+00> : vector<4x16x8xf32>
    %126 = tpu.matmul %125, %106, %cst_72 {dimension_numbers = #tpu.dot_dimension_numbers<[2], [1], [1], [2], [0, 0, 0, 1, 1, 2], [0], [0]>} : vector<4x16x16xbf16>, vector<4x16x8xbf16>, vector<4x16x8xf32> -> vector<4x16x8xf32>
    "tpu.trace_stop"() : () -> ()
    %127 = tpu.concatenate %77, %126 in 2 : vector<4x16x8xf32>, vector<4x16x8xf32> -> vector<4x16x16xf32>
    %128 = vector.shape_cast %127 : vector<4x16x16xf32> to vector<64x16xf32>
    %129 = arith.truncf %128 : vector<64x16xf32> to vector<64x16xbf16>
    %c0_73 = arith.constant 0 : index
    %c0_74 = arith.constant 0 : index
    %130 = vector.load %arg12[%c0_73, %c0_74] : memref<16x16xbf16, #tpu.memory_space<vmem>>, vector<16x16xbf16>
    %cst_75 = arith.constant dense<0.000000e+00> : vector<64x16xf32>
    %131 = tpu.matmul %129, %130, %cst_75 {dimension_numbers = #tpu.dot_dimension_numbers<[1], [0], [0], [1], [0, 0, 1, 1], [], []>} : vector<64x16xbf16>, vector<16x16xbf16>, vector<64x16xf32> -> vector<64x16xf32>
    %c0_76 = arith.constant 0 : index
    %c0_77 = arith.constant 0 : index
    %132 = vector.load %arg13[%c0_76, %c0_77] : memref<1x16xf32, #tpu.memory_space<vmem>>, vector<1x16xf32>
    %133 = vector.broadcast %132 : vector<1x16xf32> to vector<64x16xf32>
    %134 = arith.addf %131, %133 : vector<64x16xf32>
    %135 = vector.shape_cast %134 : vector<64x16xf32> to vector<4x16x16xf32>
    %c0_78 = arith.constant 0 : index
    %c0_79 = arith.constant 0 : index
    %c0_80 = arith.constant 0 : index
    %136 = vector.load %arg14[%c0_78, %c0_79, %c0_80] : memref<4x16x16xf32, #tpu.memory_space<vmem>>, vector<4x16x16xf32>
    tpu.vector_store %arg14[%c0_78, %c0_79, %c0_80], %135 {strides = array<i32>} : memref<4x16x16xf32, #tpu.memory_space<vmem>>, vector<4x16x16xf32>,
    return
  }
  func.func @transform_0(%arg0: i32) -> (i32, i32, i32) {
    %c0_i32 = arith.constant 0 : i32
    %c0_i32_0 = arith.constant 0 : i32
    %c0_i32_1 = arith.constant 0 : i32
    return %arg0, %c0_i32, %c0_i32_0 : i32, i32, i32
  }
  func.func @transform_1(%arg0: i32) -> (i32, i32) {
    %c0_i32 = arith.constant 0 : i32
    %c0_i32_0 = arith.constant 0 : i32
    %c0_i32_1 = arith.constant 0 : i32
    return %c0_i32, %c0_i32_0 : i32, i32
  }
  func.func @transform_2(%arg0: i32) -> (i32, i32) {
    %c0_i32 = arith.constant 0 : i32
    %c0_i32_0 = arith.constant 0 : i32
    %c0_i32_1 = arith.constant 0 : i32
    return %c0_i32, %c0_i32_0 : i32, i32
  }
  func.func @transform_3(%arg0: i32) -> (i32, i32, i32) {
    %c0_i32 = arith.constant 0 : i32
    %c0_i32_0 = arith.constant 0 : i32
    %c0_i32_1 = arith.constant 0 : i32
    %c0_i32_2 = arith.constant 0 : i32
    return %c0_i32, %c0_i32_0, %c0_i32_1 : i32, i32, i32
  }
  func.func @transform_4(%arg0: i32) -> (i32, i32, i32) {
    %c0_i32 = arith.constant 0 : i32
    %c0_i32_0 = arith.constant 0 : i32
    %c0_i32_1 = arith.constant 0 : i32
    %c0_i32_2 = arith.constant 0 : i32
    return %c0_i32, %c0_i32_0, %c0_i32_1 : i32, i32, i32
  }
  func.func @transform_5(%arg0: i32) -> (i32, i32, i32) {
    %c0_i32 = arith.constant 0 : i32
    %c0_i32_0 = arith.constant 0 : i32
    %c0_i32_1 = arith.constant 0 : i32
    %c0_i32_2 = arith.constant 0 : i32
    return %c0_i32, %c0_i32_0, %c0_i32_1 : i32, i32, i32
  }
  func.func @transform_6(%arg0: i32) -> (i32, i32, i32) {
    %c0_i32 = arith.constant 0 : i32
    %c0_i32_0 = arith.constant 0 : i32
    %c0_i32_1 = arith.constant 0 : i32
    %c0_i32_2 = arith.constant 0 : i32
    return %c0_i32, %c0_i32_0, %c0_i32_1 : i32, i32, i32
  }
  func.func @transform_7(%arg0: i32) -> (i32, i32, i32) {
    %c0_i32 = arith.constant 0 : i32
    %c0_i32_0 = arith.constant 0 : i32
    %c0_i32_1 = arith.constant 0 : i32
    %c0_i32_2 = arith.constant 0 : i32
    return %c0_i32, %c0_i32_0, %c0_i32_1 : i32, i32, i32
  }
  func.func @transform_8(%arg0: i32) -> (i32, i32, i32) {
    %c0_i32 = arith.constant 0 : i32
    %c0_i32_0 = arith.constant 0 : i32
    %c0_i32_1 = arith.constant 0 : i32
    %c0_i32_2 = arith.constant 0 : i32
    return %c0_i32, %c0_i32_0, %c0_i32_1 : i32, i32, i32
  }
  func.func @transform_9(%arg0: i32) -> (i32, i32, i32) {
    %c0_i32 = arith.constant 0 : i32
    %c0_i32_0 = arith.constant 0 : i32
    %c0_i32_1 = arith.constant 0 : i32
    %c0_i32_2 = arith.constant 0 : i32
    return %c0_i32, %c0_i32_0, %c0_i32_1 : i32, i32, i32
  }
  func.func @transform_10(%arg0: i32) -> (i32, i32, i32) {
    %c1_i32 = arith.constant 1 : i32
    %c0_i32 = arith.constant 0 : i32
    %0 = arith.cmpi eq, %c1_i32, %c0_i32 : i32
    %c1_i32_0 = arith.constant 1 : i32
    %1 = arith.select %0, %c1_i32_0, %c1_i32 : i32
    %2 = arith.remsi %arg0, %1 : i32
    %c0_i32_1 = arith.constant 0 : i32
    %3 = arith.cmpi ne, %2, %c0_i32_1 : i32
    %c0_i32_2 = arith.constant 0 : i32
    %4 = arith.cmpi slt, %2, %c0_i32_2 : i32
    %c0_i32_3 = arith.constant 0 : i32
    %5 = arith.cmpi slt, %1, %c0_i32_3 : i32
    %6 = arith.xori %4, %5 : i1
    %7 = arith.andi %6, %3 : i1
    %8 = arith.addi %2, %1 : i32
    %9 = arith.select %7, %8, %2 : i32
    %c0_i32_4 = arith.constant 0 : i32
    %c0_i32_5 = arith.constant 0 : i32
    %c0_i32_6 = arith.constant 0 : i32
    return %9, %c0_i32_4, %c0_i32_5 : i32, i32, i32
  }
  func.func @transform_11(%arg0: i32) -> (i32, i32) {
    %c0_i32 = arith.constant 0 : i32
    %c0_i32_0 = arith.constant 0 : i32
    %c0_i32_1 = arith.constant 0 : i32
    return %c0_i32, %c0_i32_0 : i32, i32
  }
  func.func @transform_12(%arg0: i32) -> (i32, i32) {
    %c0_i32 = arith.constant 0 : i32
    %c0_i32_0 = arith.constant 0 : i32
    %c0_i32_1 = arith.constant 0 : i32
    return %c0_i32, %c0_i32_0 : i32, i32
  }
  func.func @transform_13(%arg0: i32) -> (i32, i32, i32) {
    %c0_i32 = arith.constant 0 : i32
    %c0_i32_0 = arith.constant 0 : i32
    %c0_i32_1 = arith.constant 0 : i32
    return %arg0, %c0_i32, %c0_i32_0 : i32, i32, i32
  }
}

module attributes {stable_mosaic.version = 11 : i64} {
  func.func @matmul_bias_kernel(%arg0: i32, %arg1: memref<16x64xf32, #tpu.memory_space<vmem>>, %arg2: memref<64x32xbf16, #tpu.memory_space<vmem>>, %arg3: memref<1x32xf32, #tpu.memory_space<vmem>>, %arg4: memref<16x32xf32, #tpu.memory_space<vmem>>) attributes {dimension_semantics = [#tpu.dimension_semantics<parallel>], iteration_bounds = array<i64: 2>, scalar_prefetch = 0 : i64, scratch_operands = 0 : i64, tpu.core_type = #tpu.core_type<tc>, window_params = [{transform_indices = @transform_0, window_bounds = array<i64: 16, 64>}, {pipeline_mode = #tpu.pipeline_mode<synchronous>, transform_indices = @transform_1, window_bounds = array<i64: 64, 32>}, {pipeline_mode = #tpu.pipeline_mode<synchronous>, transform_indices = @transform_2, window_bounds = array<i64: 1, 32>}, {transform_indices = @transform_3, window_bounds = array<i64: 16, 32>}]} {
    %c0 = arith.constant 0 : index
    %c0_0 = arith.constant 0 : index
    %0 = vector.load %arg1[%c0, %c0_0] : memref<16x64xf32, #tpu.memory_space<vmem>>, vector<16x64xf32>
    %1 = arith.truncf %0 : vector<16x64xf32> to vector<16x64xbf16>
    %c0_1 = arith.constant 0 : index
    %c0_2 = arith.constant 0 : index
    %2 = vector.load %arg2[%c0_1, %c0_2] : memref<64x32xbf16, #tpu.memory_space<vmem>>, vector<64x32xbf16>
    %cst = arith.constant dense<0.000000e+00> : vector<16x32xf32>
    %3 = tpu.matmul %1, %2, %cst {dimension_numbers = #tpu.dot_dimension_numbers<[1], [0], [0], [1], [0, 0, 1, 1], [], []>} : vector<16x64xbf16>, vector<64x32xbf16>, vector<16x32xf32> -> vector<16x32xf32>
    %c0_3 = arith.constant 0 : index
    %c0_4 = arith.constant 0 : index
    %4 = vector.load %arg3[%c0_3, %c0_4] : memref<1x32xf32, #tpu.memory_space<vmem>>, vector<1x32xf32>
    %5 = vector.broadcast %4 : vector<1x32xf32> to vector<16x32xf32>
    %6 = arith.addf %3, %5 : vector<16x32xf32>
    %c0_5 = arith.constant 0 : index
    %c0_6 = arith.constant 0 : index
    %7 = vector.load %arg4[%c0_5, %c0_6] : memref<16x32xf32, #tpu.memory_space<vmem>>, vector<16x32xf32>
    tpu.vector_store %arg4[%c0_5, %c0_6], %6 {strides = array<i32>} : memref<16x32xf32, #tpu.memory_space<vmem>>, vector<16x32xf32>,
    return
  }
  func.func @transform_0(%arg0: i32) -> (i32, i32) {
    %c0_i32 = arith.constant 0 : i32
    %c0_i32_0 = arith.constant 0 : i32
    return %arg0, %c0_i32 : i32, i32
  }
  func.func @transform_1(%arg0: i32) -> (i32, i32) {
    %c0_i32 = arith.constant 0 : i32
    %c0_i32_0 = arith.constant 0 : i32
    %c0_i32_1 = arith.constant 0 : i32
    return %c0_i32, %c0_i32_0 : i32, i32
  }
  func.func @transform_2(%arg0: i32) -> (i32, i32) {
    %c0_i32 = arith.constant 0 : i32
    %c0_i32_0 = arith.constant 0 : i32
    %c0_i32_1 = arith.constant 0 : i32
    return %c0_i32, %c0_i32_0 : i32, i32
  }
  func.func @transform_3(%arg0: i32) -> (i32, i32) {
    %c0_i32 = arith.constant 0 : i32
    %c0_i32_0 = arith.constant 0 : i32
    return %arg0, %c0_i32 : i32, i32
  }
}

</mosaic_0001>

<bundles_post_ra>
// kernel: hybrid_swin_stage_forward.6
= control target key start
LH: loop header
LB: loop body
LE: loop exit
PB: predicated region body
PF: predicated region fallthrough
CT: control target
= control target key end

     0   :  { %s1040_s27 = smov 0   ;;  %s1232_s0 = inlined_call_operand.vmem [shape: f32[128,16], index: 0, kind: input, shape index: {}]   ;;  %s1233_s1 = inlined_call_operand.vmem [shape: f32[128,16], index: 1, kind: input, shape index: {}]   ;;  %s1234_s2 = inlined_call_operand.vmem [shape: f32[1,16], index: 2, kind: input, shape index: {}]   ;;  %s1235_s3 = inlined_call_operand.vmem [shape: f32[1,16], index: 3, kind: input, shape index: {}]   ;;  %s1236_s4 = inlined_call_operand.vmem [shape: bf16[16,64], index: 4, kind: input, shape index: {}]   ;;  %s1237_s5 = inlined_call_operand.vmem [shape: f32[1,64], index: 5, kind: input, shape index: {}]   ;;  %s1238_s6 = inlined_call_operand.vmem [shape: bf16[64,16], index: 6, kind: input, shape index: {}]   ;;  %s1239_s7 = inlined_call_operand.vmem [shape: f32[1,16], index: 7, kind: input, shape index: {}]   ;;  %s1240_s8 = inlined_call_operand.vmem [shape: f32[128,16], index: 8, kind: output, shape index: {}]  }
   0x1 LB: > { %s865_s28 = sadd.s32 4294967295, %s993_s27   ;;  %p869_p0 = scmp.ge.s32.totalorder %s993_s27, 1  ;;  %s993_s27 = sphi %s1040_s27, %s18_s27  }
   0x2   : > { %p274_p1 = scmp.lt.s32.totalorder %s993_s27, 3 }
   0x4   : > { %p275_p2 = pnand %p869_p0, %p274_p1 }
   0x5   : > { %s870_s29 = sshll.u32 (!%p275_p2), %s865_s28, 3 }
   0x6   : > { %278 = sbr.rel (%p275_p2) target bundleno = 780 (0x30c), region = 52  ;;  %p314_p3 = scmp.lt.s32.totalorder (!%p275_p2), %s870_s29, 15 }
   0xb   : > { %s1242_s29 = smov (!%p314_p3, %s870_s29), 15  ;;  %vm358_vm0 = vcmask 130048   ;;  %vm703_vm1 = vcmask 523264  }
   0xc   : > { %s1048_s30 = sshll.u32 %s1242_s29, 3 }
   0xd   : > { %s317_s11 = scalar_lea.vmem %s1232_s0, %s1048_s30  ;;  %s323_s14 = scalar_lea.vmem %s1233_s1, %s1048_s30 }
   0xe   : > { %v332_v0 = vld [vmem:[%s317_s11] sm:$0xff]  ;;  %v334_v2 = vld [vmem:[%s317_s11 + $0x10] sm:$0xff]  ;;  %v333_v5 = vld [vmem:[%s317_s11 + $0x8] sm:$0xff]  ;;  %s329_s15 = scalar_lea.vmem %s1240_s8, %s1048_s30 }
   0xf   : > { %v340_v1 = vld [vmem:[%s323_s14] sm:$0xff]  ;;  %v342_v4 = vld [vmem:[%s323_s14 + $0x10] sm:$0xff]  ;;  %v341_v6 = vld [vmem:[%s323_s14 + $0x8] sm:$0xff] }
  0x10   : > { %v1058_v3 = vadd.f32 %v340_v1, %v332_v0  ;;  %v1060_v7 = vadd.f32 %v342_v4, %v334_v2  ;;  %v1062_v8 = vadd.f32 %v341_v6, %v333_v5  ;;  %v335_v9 = vld [vmem:[%s317_s11 + $0x18] sm:$0xff]  ;;  %v336_v11 = vld [vmem:[%s317_s11 + $0x20] sm:$0xff]  ;;  %v337_v15 = vld [vmem:[%s317_s11 + $0x28] sm:$0xff] }
  0x11   : > { %v343_v10 = vld [vmem:[%s323_s14 + $0x18] sm:$0xff]  ;;  %v344_v14 = vld [vmem:[%s323_s14 + $0x20] sm:$0xff]  ;;  %v345_v16 = vld [vmem:[%s323_s14 + $0x28] sm:$0xff] }
  0x12   : > { %v359_v12 = vsel %vm358_vm0, %v1058_v3, 0.0  ;;  %v1066_v13 = vadd.f32 %v343_v10, %v335_v9  ;;  %v365_v17 = vsel %vm358_vm0, %v1060_v7, 0.0  ;;  %v362_v18 = vsel %vm358_vm0, %v1062_v8, 0.0  ;;  %v338_v22 = vld [vmem:[%s317_s11 + $0x30] sm:$0xff]  ;;  %v339_v24 = vld [vmem:[%s317_s11 + $0x38] sm:$0xff] }
  0x13   : > { %360 = vadd.xlane.f32.xlu0 %v359_v12  ;;  %366 = vadd.xlane.f32.xlu1 %v365_v17  ;;  %v1072_v19 = vadd.f32 %v344_v14, %v336_v11  ;;  %v1076_v21 = vadd.f32 %v345_v16, %v337_v15  ;;  %v346_v23 = vld [vmem:[%s323_s14 + $0x30] sm:$0xff]  ;;  %v347_v25 = vld [vmem:[%s323_s14 + $0x38] sm:$0xff]  ;;  %v950_v11 = vld [vmem:[%s1236_s4] sm:$0xff]  }
  0x14   : > { %v368_v20 = vsel %vm358_vm0, %v1066_v13, 0.0  ;;  %v1080_v27 = vadd.f32 %v346_v23, %v338_v22  ;;  %v1084_v29 = vadd.f32 %v347_v25, %v339_v24  ;;  %908 = vmatprep.subr.bf16.mxu0 %v950_v11 }
  0x15   : > { %v371_v26 = vsel %vm358_vm0, %v1072_v19, 0.0  ;;  %v374_v28 = vsel %vm358_vm0, %v1076_v21, 0.0  ;;  %909 = vmatpush3.bf16.msra.mxu0 %v950_v11 }
  0x16   : > { %v377_v30 = vsel %vm358_vm0, %v1080_v27, 0.0  ;;  %v380_v31 = vsel %vm358_vm0, %v1084_v29, 0.0 }
  0x17   : > { %363 = vadd.xlane.f32.xlu0 %v362_v18  ;;  %369 = vadd.xlane.f32.xlu1 %v368_v20 }
  0x1b   : > { %372 = vadd.xlane.f32.xlu0 %v371_v26  ;;  %375 = vadd.xlane.f32.xlu1 %v374_v28 }
  0x1f   : > { %378 = vadd.xlane.f32.xlu0 %v377_v30  ;;  %381 = vadd.xlane.f32.xlu1 %v380_v31 }
  0x9c   : > { %v361_v32 = vpop.xlane.xlu0 %360  ;;  %v367_v34 = vpop.xlane.xlu1 %366 }
  0x9d   : > { %v384_v33 = vmul.f32 0.0625, %v361_v32  ;;  %v386_v35 = vmul.f32 0.0625, %v367_v34 }
  0x9f   : > { %v1091_v36 = vsub.f32 %v1058_v3, %v384_v33  ;;  %v1094_v37 = vsub.f32 %v1060_v7, %v386_v35 }
  0xa0   : > { %v364_v38 = vpop.xlane.xlu0 %363  ;;  %v370_v40 = vpop.xlane.xlu1 %369 }
  0xa1   : > { %v385_v39 = vmul.f32 0.0625, %v364_v38  ;;  %v400_v41 = vmul.f32 %v1091_v36, %v1091_v36  ;;  %v387_v42 = vmul.f32 0.0625, %v370_v40  ;;  %v402_v43 = vmul.f32 %v1094_v37, %v1094_v37 }
  0xa3   : > { %v1101_v44 = vsub.f32 %v1062_v8, %v385_v39  ;;  %v408_v45 = vsel %vm358_vm0, %v400_v41, 0.0  ;;  %v1105_v46 = vsub.f32 %v1066_v13, %v387_v42  ;;  %v414_v50 = vsel %vm358_vm0, %v402_v43, 0.0 }
  0xa4   : > { %409 = vadd.xlane.f32.xlu0 %v408_v45  ;;  %v373_v47 = vpop.xlane.xlu0 %372  ;;  %v376_v49 = vpop.xlane.xlu1 %375 }
  0xa5   : > { %v388_v48 = vmul.f32 0.0625, %v373_v47  ;;  %v401_v51 = vmul.f32 %v1101_v44, %v1101_v44  ;;  %v389_v52 = vmul.f32 0.0625, %v376_v49  ;;  %v403_v53 = vmul.f32 %v1105_v46, %v1105_v46  ;;  %v876_v47 = vld [vmem:[%s1234_s2] ss:$0 sm:$0xff] }
  0xa7   : > { %v1113_v54 = vsub.f32 %v1072_v19, %v388_v48  ;;  %v411_v55 = vsel %vm358_vm0, %v401_v51, 0.0  ;;  %v1117_v56 = vsub.f32 %v1076_v21, %v389_v52  ;;  %v417_v60 = vsel %vm358_vm0, %v403_v53, 0.0  ;;  %v877_v52 = vld [vmem:[%s1235_s3] ss:$0 sm:$0xff] }
  0xa8   : > { %415 = vadd.xlane.f32.xlu0 %v414_v50  ;;  %412 = vadd.xlane.f32.xlu1 %v411_v55  ;;  %v379_v57 = vpop.xlane.xlu0 %378  ;;  %v382_v59 = vpop.xlane.xlu1 %381 }
  0xa9   : > { %v390_v58 = vmul.f32 0.0625, %v379_v57  ;;  %v404_v61 = vmul.f32 %v1113_v54, %v1113_v54  ;;  %v391_v62 = vmul.f32 0.0625, %v382_v59  ;;  %v405_v63 = vmul.f32 %v1117_v56, %v1117_v56 }
  0xab   : > { %v1125_v0 = vsub.f32 %v1080_v27, %v390_v58  ;;  %v420_v1 = vsel %vm358_vm0, %v404_v61, 0.0  ;;  %v1129_v2 = vsub.f32 %v1084_v29, %v391_v62  ;;  %v423_v4 = vsel %vm358_vm0, %v405_v63, 0.0 }
  0xac   : > { %418 = vadd.xlane.f32.xlu1 %v417_v60  ;;  %421 = vadd.xlane.f32.xlu0 %v420_v1 }
  0xad   : > { %v406_v5 = vmul.f32 %v1125_v0, %v1125_v0  ;;  %v407_v6 = vmul.f32 %v1129_v2, %v1129_v2 }
  0xaf   : > { %v426_v9 = vsel %vm358_vm0, %v406_v5, 0.0  ;;  %v429_v10 = vsel %vm358_vm0, %v407_v6, 0.0 }
  0xb0   : > { %424 = vadd.xlane.f32.xlu1 %v423_v4  ;;  %427 = vadd.xlane.f32.xlu0 %v426_v9 }
  0xb4   : > { %430 = vadd.xlane.f32.xlu1 %v429_v10 }
 0x12d   : > { %v410_v12 = vpop.xlane.xlu0 %409 }
 0x12e   : > { %v432_v14 = vmul.f32 0.0625, %v410_v12 }
 0x130   : > { %v440_v15 = vadd.f32 1e-05, %v432_v14 }
 0x131   : > { %v413_v16 = vpop.xlane.xlu1 %412  ;;  %v416_v17 = vpop.xlane.xlu0 %415 }
 0x132   : > { %955 = vrsqrt.f32 %v440_v15  ;;  %v433_v18 = vmul.f32 0.0625, %v413_v16  ;;  %v434_v20 = vmul.f32 0.0625, %v416_v17 }
 0x134   : > { %v441_v22 = vadd.f32 1e-05, %v433_v18  ;;  %v442_v23 = vadd.f32 1e-05, %v434_v20 }
 0x135   : > { %v419_v24 = vpop.xlane.xlu1 %418  ;;  %v422_v25 = vpop.xlane.xlu0 %421 }
 0x136   : > { %957 = vrsqrt.f32 %v441_v22  ;;  %v435_v26 = vmul.f32 0.0625, %v419_v24  ;;  %v436_v28 = vmul.f32 0.0625, %v422_v25  ;;  %v954_v24 = vld [vmem:[%s1238_s6] sm:$0xff]  }
 0x137   : > { %959 = vrsqrt.f32 %v442_v23  ;;  %v953_v23 = vld [vmem:[%s1238_s6 + $0x8] sm:$0xff]   ;;  %v878_v25 = vld [vmem:[%s1237_s5] ss:$0 sm:$0xff] }
 0x138   : > { %v443_v30 = vadd.f32 1e-05, %v435_v26  ;;  %v444_v31 = vadd.f32 1e-05, %v436_v28 }
 0x139   : > { %v425_v32 = vpop.xlane.xlu1 %424  ;;  %v428_v33 = vpop.xlane.xlu0 %427 }
 0x13a   : > { %961 = vrsqrt.f32 %v443_v30  ;;  %v437_v34 = vmul.f32 0.0625, %v425_v32  ;;  %v438_v35 = vmul.f32 0.0625, %v428_v33 }
 0x13b   : > { %963 = vrsqrt.f32 %v444_v31 }
 0x13c   : > { %v445_v38 = vadd.f32 1e-05, %v437_v34  ;;  %v446_v39 = vadd.f32 1e-05, %v438_v35 }
 0x13d   : > { %v431_v40 = vpop.xlane.xlu1 %430 }
 0x13e   : > { %965 = vrsqrt.f32 %v445_v38  ;;  %v439_v41 = vmul.f32 0.0625, %v431_v40 }
 0x13f   : > { %v956_v42 = vpop.eup %955  ;;  %967 = vrsqrt.f32 %v446_v39 }
 0x140   : > { %v447_v43 = vadd.f32 1e-05, %v439_v41  ;;  %v456_v45 = vmul.f32 %v956_v42, %v1091_v36 }
 0x142   : > { %969 = vrsqrt.f32 %v447_v43  ;;  %v470_v51 = vmul.f32 %v876_v47, %v456_v45 }
 0x143   : > { %v958_v48 = vpop.eup %957 }
 0x144   : > { %v960_v49 = vpop.eup %959  ;;  %v457_v50 = vmul.f32 %v958_v48, %v1101_v44  ;;  %v484_v36 = vadd.f32 %v877_v52, %v470_v51 }
 0x145   : > { %v458_v53 = vmul.f32 %v960_v49, %v1094_v37 }
 0x146   : > { %v471_v55 = vmul.f32 %v876_v47, %v457_v50 }
 0x147   : > { %v962_v57 = vpop.eup %961  ;;  %v472_v61 = vmul.f32 %v876_v47, %v458_v53 }
 0x148   : > { %v964_v58 = vpop.eup %963  ;;  %v485_v59 = vadd.f32 %v877_v52, %v471_v55  ;;  %v459_v60 = vmul.f32 %v962_v57, %v1105_v46 }
 0x149   : > { %v460_v62 = vmul.f32 %v964_v58, %v1113_v54  ;;  %v486_v5 = vadd.f32 %v877_v52, %v472_v61 }
 0x14a   : > { %v492_v63 = vpack.c.bf16 %v485_v59, %v484_v36  ;;  %v473_v1 = vmul.f32 %v876_v47, %v459_v60 }
 0x14b   : > { %v966_v44 = vpop.eup %965  ;;  %v474_v9 = vmul.f32 %v876_v47, %v460_v62 }
 0x14c   : > { %v968_v4 = vpop.eup %967  ;;  %910 = vmatprep.mubr.msk.bf16.mxu0 %vm358_vm0, %v492_v63  ;;  %v487_v6 = vadd.f32 %v877_v52, %v473_v1  ;;  %v461_v37 = vmul.f32 %v966_v44, %v1117_v56 }
 0x14d   : > { %v462_v10 = vmul.f32 %v968_v4, %v1125_v0  ;;  %v488_v46 = vadd.f32 %v877_v52, %v474_v9  ;;  %v951_v0 = vld [vmem:[%s1238_s6 + $0x18] sm:$0xff]  }
 0x14e   : > { %v493_v11 = vpack.c.bf16 %v487_v6, %v486_v5  ;;  %v475_v12 = vmul.f32 %v876_v47, %v461_v37  ;;  %918 = vmatprep.subr.bf16.mxu0 %v951_v0  ;;  %934 = vmatprep.subr.bf16.mxu1 %v951_v0 }
 0x14f   : > { %v970_v14 = vpop.eup %969  ;;  %v476_v16 = vmul.f32 %v876_v47, %v462_v10  ;;  %938 = vmatpush3.bf16.msra.mxu1 %v951_v0 }
 0x150   : > { %911 = vmatmul.mubr.msk.bf16.vlgmr.msra.gmra.mxu0 %vm358_vm0, %v493_v11  ;;  %v489_v54 = vadd.f32 %v877_v52, %v475_v12  ;;  %v463_v15 = vmul.f32 %v970_v14, %v1129_v2  ;;  %v952_v2 = vld [vmem:[%s1238_s6 + $0x10] sm:$0xff]  }
 0x151   : > { %v490_v20 = vadd.f32 %v877_v52, %v476_v16  ;;  %919 = vmatpush3.bf16.msra.mxu0 %v951_v0  ;;  %935 = vmatprep.subr.bf16.mxu1 %v952_v2 }
 0x152   : > { %v494_v17 = vpack.c.bf16 %v489_v54, %v488_v46  ;;  %v477_v18 = vmul.f32 %v876_v47, %v463_v15  ;;  %920 = vmatprep.subr.bf16.mxu0 %v952_v2 }
 0x153   : > { %939 = vmatpush3.bf16.msra.mxu1 %v952_v2 }
 0x154   : > { %914 = vmatprep.mubr.msk.bf16.mxu0 %vm358_vm0, %v494_v17  ;;  %v491_v22 = vadd.f32 %v877_v52, %v477_v18  ;;  %936 = vmatprep.subr.bf16.mxu1 %v953_v23 }
 0x155   : > { %921 = vmatpush3.bf16.msra.mxu0 %v952_v2 }
 0x156   : > { %v495_v56 = vpack.c.bf16 %v491_v22, %v490_v20  ;;  %922 = vmatprep.subr.bf16.mxu0 %v953_v23 }
 0x157   : > { %940 = vmatpush3.bf16.msra.mxu1 %v953_v23 }
 0x158   : > { %915 = vmatmul.mubr.msk.bf16.gmra.mxu0 %vm358_vm0, %v495_v56  ;;  %937 = vmatprep.subr.bf16.mxu1 %v954_v24 }
 0x159   : > { %923 = vmatpush3.bf16.msra.mxu0 %v953_v23 }
 0x15a   : > { %924 = vmatprep.subr.bf16.mxu0 %v954_v24 }
 0x15b   : > { %941 = vmatpush3.bf16.msra.mxu1 %v954_v24 }
 0x15d   : > { %925 = vmatpush3.bf16.msra.mxu0 %v954_v24 }
 0x210   : > { %v912_v26 = vpop.f32.mrf.mxu0 }
 0x211   : > { %v1174_v28 = vadd.f32 %v912_v26, %v878_v25 }
 0x212   : > { %v557_v30 = vpop.f32.mrf.mxu0 }
 0x213   : > { %v598_v31 = vmul.f32 0.044715, %v1174_v28  ;;  %v1177_v32 = vadd.f32 %v878_v25, %v557_v30 }
 0x214   : > { %v913_v33 = vpop.f32.mrf.mxu0 }
 0x215   : > { %v606_v34 = vmul.f32 %v598_v31, %v1174_v28  ;;  %v596_v35 = vmul.f32 0.044715, %v1177_v32  ;;  %v569_v38 = vadd.f32 %v913_v33, %v878_v25 }
 0x216   : > { %v560_v39 = vpop.f32.mrf.mxu0 }
 0x217   : > { %v614_v40 = vmul.f32 %v606_v34, %v1174_v28  ;;  %v604_v41 = vmul.f32 %v596_v35, %v1177_v32  ;;  %v599_v42 = vmul.f32 0.044715, %v569_v38  ;;  %v561_v43 = vadd.f32 %v878_v25, %v560_v39 }
 0x218   : > { %v916_v45 = vpop.f32.mrf.mxu0 }
 0x219   : > { %v622_v47 = vadd.f32 %v614_v40, %v1174_v28  ;;  %v612_v48 = vmul.f32 %v604_v41, %v1177_v32  ;;  %v607_v49 = vmul.f32 %v599_v42, %v569_v38  ;;  %v1185_v50 = vadd.f32 %v916_v45, %v878_v25 }
 0x21a   : > { %v597_v51 = vmul.f32 0.044715, %v561_v43  ;;  %v573_v52 = vpop.f32.mrf.mxu0  ;;  %v591_v40 = vmul.f32 0.5, %v569_v38  ;;  %v588_v41 = vmul.f32 0.5, %v1177_v32  ;;  %v589_v42 = vmul.f32 0.5, %v561_v43 }
 0x21b   : > { %v630_v53 = vmul.f32 0.7978846, %v622_v47  ;;  %v620_v55 = vadd.f32 %v612_v48, %v1177_v32  ;;  %v615_v57 = vmul.f32 %v607_v49, %v569_v38  ;;  %v602_v58 = vmul.f32 0.044715, %v1185_v50 }
 0x21c   : > { %v605_v36 = vmul.f32 %v597_v51, %v561_v43  ;;  %v1189_v59 = vadd.f32 %v878_v25, %v573_v52  ;;  %v917_v60 = vpop.f32.mrf.mxu0  ;;  %v590_v47 = vmul.f32 0.5, %v1174_v28 }
 0x21d   : > { %v628_v61 = vmul.f32 0.7978846, %v620_v55  ;;  %v623_v62 = vadd.f32 %v615_v57, %v569_v38  ;;  %v610_v63 = vmul.f32 %v602_v58, %v1185_v50  ;;  %v585_v4 = vadd.f32 %v917_v60, %v878_v25 }
 0x21e   : > { %v613_v1 = vmul.f32 %v605_v36, %v561_v43  ;;  %v600_v44 = vmul.f32 0.044715, %v1189_v59  ;;  %v576_v5 = vpop.f32.mrf.mxu0  ;;  %971 = vtanh.f32 %v630_v53  ;;  %v592_v28 = vmul.f32 0.5, %v1189_v59 }
 0x21f   : > { %v631_v6 = vmul.f32 0.7978846, %v623_v62  ;;  %v618_v37 = vmul.f32 %v610_v63, %v1185_v50  ;;  %v577_v9 = vadd.f32 %v878_v25, %v576_v5  ;;  %973 = vtanh.f32 %v628_v61 }
 0x220   : > { %v621_v10 = vadd.f32 %v613_v1, %v561_v43  ;;  %v608_v11 = vmul.f32 %v600_v44, %v1189_v59  ;;  %v603_v12 = vmul.f32 0.044715, %v585_v4  ;;  %v595_v38 = vmul.f32 0.5, %v585_v4 }
 0x221   : > { %975 = vtanh.f32 %v631_v6  ;;  %v626_v14 = vadd.f32 %v618_v37, %v1185_v50  ;;  %v601_v46 = vmul.f32 0.044715, %v577_v9  ;;  %v593_v62 = vmul.f32 0.5, %v577_v9 }
 0x222   : > { %v629_v54 = vmul.f32 0.7978846, %v621_v10  ;;  %v611_v15 = vmul.f32 %v603_v12, %v585_v4  ;;  %v616_v16 = vmul.f32 %v608_v11, %v1189_v59  ;;  %v594_v1 = vmul.f32 0.5, %v1185_v50 }
 0x223   : > { %v634_v17 = vmul.f32 0.7978846, %v626_v14  ;;  %v609_v18 = vmul.f32 %v601_v46, %v577_v9 }
 0x224   : > { %977 = vtanh.f32 %v629_v54  ;;  %v619_v20 = vmul.f32 %v611_v15, %v585_v4  ;;  %v624_v22 = vadd.f32 %v616_v16, %v1189_v59 }
 0x225   : > { %v617_v56 = vmul.f32 %v609_v18, %v577_v9  ;;  %979 = vtanh.f32 %v634_v17 }
 0x226   : > { %v627_v0 = vadd.f32 %v619_v20, %v585_v4  ;;  %v632_v2 = vmul.f32 0.7978846, %v624_v22  ;;  %v884_v4 = vld [vmem:[%s1239_s7] ss:$0 sm:$0xff] }
 0x227   : > { %v625_v23 = vadd.f32 %v617_v56, %v577_v9 }
 0x228   : > { %v635_v24 = vmul.f32 0.7978846, %v627_v0  ;;  %981 = vtanh.f32 %v632_v2 }
 0x229   : > { %v633_v25 = vmul.f32 0.7978846, %v625_v23 }
 0x22a   : > { %983 = vtanh.f32 %v635_v24 }
 0x22b   : > { %985 = vtanh.f32 %v633_v25  ;;  %v972_v26 = vpop.eup %971 }
 0x22c   : > { %v974_v30 = vpop.eup %973  ;;  %v646_v39 = vadd.f32 1.0, %v972_v26 }
 0x22d   : > { %v644_v34 = vadd.f32 1.0, %v974_v30 }
 0x22e   : > { %v976_v31 = vpop.eup %975  ;;  %v654_v55 = vmul.f32 %v646_v39, %v590_v47 }
 0x22f   : > { %v647_v33 = vadd.f32 1.0, %v976_v31  ;;  %v652_v51 = vmul.f32 %v644_v34, %v588_v41 }
 0x231   : > { %v978_v35 = vpop.eup %977  ;;  %v655_v48 = vmul.f32 %v647_v33, %v591_v40 }
 0x232   : > { %v645_v45 = vadd.f32 1.0, %v978_v35  ;;  %v980_v49 = vpop.eup %979 }
 0x233   : > { %v661_v36 = vpack.c.bf16 %v655_v48, %v654_v55  ;;  %v650_v32 = vadd.f32 1.0, %v980_v49 }
 0x234   : > { %v653_v52 = vmul.f32 %v645_v45, %v589_v42 }
 0x235   : > { %v982_v53 = vpop.eup %981  ;;  %v658_v37 = vmul.f32 %v650_v32, %v594_v1 }
 0x236   : > { %v660_v57 = vpack.c.bf16 %v653_v52, %v652_v51  ;;  %v648_v60 = vadd.f32 1.0, %v982_v53 }
 0x237   : > { %v984_v58 = vpop.eup %983 }
 0x238   : > { %v986_v61 = vpop.eup %985  ;;  %926 = vmatprep.mubr.msk.bf16.mxu0 %vm703_vm1, %v660_v57  ;;  %v651_v43 = vadd.f32 1.0, %v984_v58  ;;  %v656_v5 = vmul.f32 %v648_v60, %v592_v28 }
 0x239   : > { %927 = vmatmul.mubr.msk.bf16.vlgmr.msra.gmra.mxu0 %vm703_vm1, %v661_v36  ;;  %v649_v63 = vadd.f32 1.0, %v986_v61 }
 0x23a   : > { %v659_v44 = vmul.f32 %v651_v43, %v595_v38 }
 0x23b   : > { %v657_v6 = vmul.f32 %v649_v63, %v593_v62 }
 0x23c   : > { %v663_v11 = vpack.c.bf16 %v659_v44, %v658_v37 }
 0x23d   : > { %v662_v10 = vpack.c.bf16 %v657_v6, %v656_v5 }
 0x23f   : > { %930 = vmatprep.mubr.msk.bf16.mxu1 %vm703_vm1, %v662_v10 }
 0x240   : > { %931 = vmatmul.mubr.msk.bf16.vlgmr.msra.gmra.mxu1 %vm703_vm1, %v663_v11 }
 0x2f9   : > { %v928_v12 = vpop.f32.mrf.mxu0 }
 0x2fa   : > { %v759_v59 = vadd.f32 %v928_v12, %v884_v4 }
 0x2fb   : > { %v750_v50 = vpop.f32.mrf.mxu0 }
 0x2fc   : > { %v783_v9 = vadd.f32 %v759_v59, %v1060_v7  ;;  %v751_v14 = vadd.f32 %v884_v4, %v750_v50 }
 0x2fd   : > { %v929_v46 = vpop.f32.mrf.mxu0 }
 0x2fe   : > { %791 = vst.msk [vmem:[%s329_s15 + $0x10] sm:$0xff] %vm358_vm0, %v783_v9  ;;  %v781_v54 = vadd.f32 %v751_v14, %v1058_v3  ;;  %v762_v15 = vadd.f32 %v929_v46, %v884_v4 }
 0x2ff   : > { %v753_v16 = vpop.f32.mrf.mxu0 }
 0x300   : > { %789 = vst.msk [vmem:[%s329_s15] sm:$0xff] %vm358_vm0, %v781_v54  ;;  %v784_v17 = vadd.f32 %v762_v15, %v1066_v13  ;;  %v754_v18 = vadd.f32 %v884_v4, %v753_v16  ;;  %v932_v20 = vpop.f32.mrf.mxu1 }
 0x301   : > { %v775_v22 = vadd.f32 %v932_v20, %v884_v4 }
 0x302   : > { %792 = vst.msk [vmem:[%s329_s15 + $0x18] sm:$0xff] %vm358_vm0, %v784_v17  ;;  %v782_v56 = vadd.f32 %v754_v18, %v1062_v8  ;;  %v766_v7 = vpop.f32.mrf.mxu1 }
 0x303   : > { %v787_v0 = vadd.f32 %v775_v22, %v1080_v27  ;;  %v767_v2 = vadd.f32 %v884_v4, %v766_v7 }
 0x304   : > { %790 = vst.msk [vmem:[%s329_s15 + $0x8] sm:$0xff] %vm358_vm0, %v782_v56  ;;  %v933_v3 = vpop.f32.mrf.mxu1 }
 0x305   : > { %795 = vst.msk [vmem:[%s329_s15 + $0x30] sm:$0xff] %vm358_vm0, %v787_v0  ;;  %v785_v23 = vadd.f32 %v767_v2, %v1072_v19  ;;  %v778_v24 = vadd.f32 %v933_v3, %v884_v4 }
 0x306   : > { %v769_v13 = vpop.f32.mrf.mxu1 }
 0x307   : > { %793 = vst.msk [vmem:[%s329_s15 + $0x20] sm:$0xff] %vm358_vm0, %v785_v23  ;;  %v788_v25 = vadd.f32 %v778_v24, %v1084_v29  ;;  %v770_v26 = vadd.f32 %v884_v4, %v769_v13 }
 0x309   : > { %796 = vst.msk [vmem:[%s329_s15 + $0x38] sm:$0xff] %vm358_vm0, %v788_v25  ;;  %v786_v8 = vadd.f32 %v770_v26, %v1076_v21 }
 0x30b   : > { %794 = vst.msk [vmem:[%s329_s15 + $0x28] sm:$0xff] %vm358_vm0, %v786_v8 }
 0x30c PF: > { %s18_s27 = sadd.s32 1, %s993_s27  }
 0x30d   : > { %p15_p4 = scmp.ge.s32.totalorder %s18_s27, 4  }
 0x30f   :  { %17 = sbr.rel (!%p15_p4) target bundleno = 1 (0x1), region = 85 }

// kernel: hybrid_swin_stage_forward.5
= control target key start
LH: loop header
LB: loop body
LE: loop exit
PB: predicated region body
PF: predicated region fallthrough
CT: control target
= control target key end

     0   :  { %s2744_s21 = smov 0   ;;  %s3141_s0 = inlined_call_operand.vmem [shape: f32[8,16,16], index: 0, kind: input, shape index: {}]   ;;  %s3142_s1 = inlined_call_operand.vmem [shape: f32[1,16], index: 1, kind: input, shape index: {}]   ;;  %s3143_s2 = inlined_call_operand.vmem [shape: f32[1,16], index: 2, kind: input, shape index: {}]   ;;  %s3144_s3 = inlined_call_operand.vmem [shape: bf16[2,16,8], index: 3, kind: input, shape index: {}]   ;;  %s3145_s4 = inlined_call_operand.vmem [shape: bf16[2,16,8], index: 4, kind: input, shape index: {}]   ;;  %s3146_s5 = inlined_call_operand.vmem [shape: bf16[2,16,8], index: 5, kind: input, shape index: {}]   ;;  %s3147_s6 = inlined_call_operand.vmem [shape: f32[2,1,8], index: 6, kind: input, shape index: {}]   ;;  %s3148_s7 = inlined_call_operand.vmem [shape: f32[2,1,8], index: 7, kind: input, shape index: {}]   ;;  %s3149_s8 = inlined_call_operand.vmem [shape: f32[2,1,8], index: 8, kind: input, shape index: {}]   ;;  %s3150_s9 = inlined_call_operand.vmem [shape: f32[2,16,16], index: 9, kind: input, shape index: {}]   ;;  %s3151_s10 = inlined_call_operand.vmem [shape: bf16[16,16], index: 10, kind: input, shape index: {}]   ;;  %s3152_s11 = inlined_call_operand.vmem [shape: f32[1,16], index: 11, kind: input, shape index: {}]   ;;  %s3153_s12 = inlined_call_operand.vmem [shape: f32[8,16,16], index: 12, kind: output, shape index: {}]  }
   0x1 LB: > { %s2229_s22 = sadd.s32 4294967295, %s2674_s21   ;;  %p2233_p0 = scmp.ge.s32.totalorder %s2674_s21, 1  ;;  %s2674_s21 = sphi %s2744_s21, %s22_s21  }
   0x2   : > { %p364_p1 = scmp.lt.s32.totalorder %s2674_s21, 3 }
   0x4   : > { %p365_p2 = pnand %p2233_p0, %p364_p1 }
   0x5   : > { %s2234_s23 = sshll.u32 (!%p365_p2), %s2229_s22, 2  ;;  %s2678_s18 = smov (!%p365_p2), 8  }
   0x6   : > { %368 = sbr.rel (%p365_p2) target bundleno = 2352 (0x930), region = 68  ;;  %p409_p3 = scmp.lt.s32.totalorder (!%p365_p2), %s2234_s23, 7 }
   0xb   : > { %s3155_s23 = smov (!%p409_p3, %s2234_s23), 7  ;;  %vm433_vm0 = vcmask 130048   ;;  %v2581_v56 = vld [vmem:[%s3144_s3] sm:$0xff]   ;;  %vm2677_vm1 = vmmov 0   ;;  %vm845_vm2 = vcmask 64512  }
   0xc   : > { %s2313_s24 = sshll.u32 %s3155_s23, 4  ;;  %2548 = vmatprep.subr.bf16.mxu1 %v2581_v56  ;;  %2382 = vmatprep.subr.bf16.mxu0 %v2581_v56  ;;  %v2814_v57 = vld [vmem:[%s3145_s4] sm:$0xff]  }
   0xd   : > { %s413_s27 = scalar_lea.vmem %s3141_s0, %s2313_s24  ;;  %2549 = vmatpush3.bf16.msra.mxu1 %v2581_v56  ;;  %2383 = vmatpush3.bf16.msra.mxu0 %v2581_v56  ;;  %v2820_v58 = vld [vmem:[%s3146_s5] sm:$0xff]   ;;  %s420_s26 = scalar_lea.vmem %s3153_s12, %s2313_s24 }
   0xe   : > { %v427_v0 = vld [vmem:[%s413_s27 + $0x20] sm:$0xff]  ;;  %v429_v1 = vld [vmem:[%s413_s27 + $0x30] sm:$0xff]  ;;  %v428_v2 = vld [vmem:[%s413_s27 + $0x28] sm:$0xff]  ;;  %2392 = vmatprep.subr.bf16.mxu1 %v2814_v57  ;;  %2402 = vmatprep.subr.bf16.mxu0 %v2820_v58 }
   0xf   : > { %v446_v3 = vsel %vm433_vm0, %v427_v0, 0.0  ;;  %v452_v4 = vsel %vm433_vm0, %v429_v1, 0.0  ;;  %v430_v5 = vld [vmem:[%s413_s27 + $0x38] sm:$0xff]  ;;  %v449_v6 = vsel %vm433_vm0, %v428_v2, 0.0  ;;  %v423_v8 = vld [vmem:[%s413_s27] sm:$0xff]  ;;  %v424_v9 = vld [vmem:[%s413_s27 + $0x8] sm:$0xff] }
  0x10   : > { %447 = vadd.xlane.f32.xlu0 %v446_v3  ;;  %453 = vadd.xlane.f32.xlu1 %v452_v4  ;;  %v455_v7 = vsel %vm433_vm0, %v430_v5, 0.0  ;;  %v434_v10 = vsel %vm433_vm0, %v423_v8, 0.0  ;;  %v437_v11 = vsel %vm433_vm0, %v424_v9, 0.0  ;;  %v425_v12 = vld [vmem:[%s413_s27 + $0x10] sm:$0xff]  ;;  %v426_v13 = vld [vmem:[%s413_s27 + $0x18] sm:$0xff] }
  0x11   : > { %v440_v14 = vsel %vm433_vm0, %v425_v12, 0.0  ;;  %v443_v15 = vsel %vm433_vm0, %v426_v13, 0.0 }
  0x14   : > { %450 = vadd.xlane.f32.xlu0 %v449_v6  ;;  %456 = vadd.xlane.f32.xlu1 %v455_v7 }
  0x18   : > { %435 = vadd.xlane.f32.xlu0 %v434_v10  ;;  %438 = vadd.xlane.f32.xlu1 %v437_v11 }
  0x1c   : > { %441 = vadd.xlane.f32.xlu0 %v440_v14  ;;  %444 = vadd.xlane.f32.xlu1 %v443_v15 }
  0x99   : > { %v448_v16 = vpop.xlane.xlu0 %447  ;;  %v454_v17 = vpop.xlane.xlu1 %453 }
  0x9a   : > { %v463_v18 = vmul.f32 0.0625, %v448_v16  ;;  %v465_v19 = vmul.f32 0.0625, %v454_v17 }
  0x9c   : > { %v2768_v20 = vsub.f32 %v427_v0, %v463_v18  ;;  %v2770_v21 = vsub.f32 %v429_v1, %v465_v19 }
  0x9d   : > { %v451_v22 = vpop.xlane.xlu0 %450  ;;  %v457_v23 = vpop.xlane.xlu1 %456 }
  0x9e   : > { %v464_v24 = vmul.f32 0.0625, %v451_v22  ;;  %v466_v25 = vmul.f32 0.0625, %v457_v23  ;;  %v479_v26 = vmul.f32 %v2768_v20, %v2768_v20  ;;  %v481_v27 = vmul.f32 %v2770_v21, %v2770_v21  ;;  %v2240_v23 = vld [vmem:[%s3142_s1] ss:$0 sm:$0xff] }
  0xa0   : > { %v2776_v28 = vsub.f32 %v428_v2, %v464_v24  ;;  %v2778_v29 = vsub.f32 %v430_v5, %v466_v25  ;;  %v495_v30 = vsel %vm433_vm0, %v479_v26, 0.0  ;;  %v501_v33 = vsel %vm433_vm0, %v481_v27, 0.0 }
  0xa1   : > { %496 = vadd.xlane.f32.xlu0 %v495_v30  ;;  %v436_v31 = vpop.xlane.xlu0 %435  ;;  %v439_v32 = vpop.xlane.xlu1 %438 }
  0xa2   : > { %v459_v34 = vmul.f32 0.0625, %v436_v31  ;;  %v480_v35 = vmul.f32 %v2776_v28, %v2776_v28  ;;  %v460_v36 = vmul.f32 0.0625, %v439_v32  ;;  %v482_v37 = vmul.f32 %v2778_v29, %v2778_v29  ;;  %v2241_v31 = vld [vmem:[%s3143_s2] ss:$0 sm:$0xff] }
  0xa4   : > { %v2786_v38 = vsub.f32 %v423_v8, %v459_v34  ;;  %v498_v39 = vsel %vm433_vm0, %v480_v35, 0.0  ;;  %v2789_v40 = vsub.f32 %v424_v9, %v460_v36  ;;  %v504_v42 = vsel %vm433_vm0, %v482_v37, 0.0 }
  0xa5   : > { %499 = vadd.xlane.f32.xlu1 %v498_v39  ;;  %502 = vadd.xlane.f32.xlu0 %v501_v33  ;;  %v442_v41 = vpop.xlane.xlu0 %441  ;;  %v445_v43 = vpop.xlane.xlu1 %444 }
  0xa6   : > { %v461_v44 = vmul.f32 0.0625, %v442_v41  ;;  %v462_v45 = vmul.f32 0.0625, %v445_v43  ;;  %v475_v46 = vmul.f32 %v2786_v38, %v2786_v38  ;;  %v476_v47 = vmul.f32 %v2789_v40, %v2789_v40 }
  0xa8   : > { %v2796_v48 = vsub.f32 %v425_v12, %v461_v44  ;;  %v2798_v49 = vsub.f32 %v426_v13, %v462_v45  ;;  %v483_v50 = vsel %vm433_vm0, %v475_v46, 0.0  ;;  %v486_v51 = vsel %vm433_vm0, %v476_v47, 0.0 }
  0xa9   : > { %505 = vadd.xlane.f32.xlu1 %v504_v42  ;;  %484 = vadd.xlane.f32.xlu0 %v483_v50 }
  0xaa   : > { %v477_v52 = vmul.f32 %v2796_v48, %v2796_v48  ;;  %v478_v53 = vmul.f32 %v2798_v49, %v2798_v49 }
  0xac   : > { %v489_v54 = vsel %vm433_vm0, %v477_v52, 0.0  ;;  %v492_v55 = vsel %vm433_vm0, %v478_v53, 0.0 }
  0xad   : > { %487 = vadd.xlane.f32.xlu1 %v486_v51  ;;  %490 = vadd.xlane.f32.xlu0 %v489_v54 }
  0xb1   : > { %493 = vadd.xlane.f32.xlu1 %v492_v55 }
 0x12a   : > { %v497_v59 = vpop.xlane.xlu0 %496 }
 0x12b   : > { %v511_v60 = vmul.f32 0.0625, %v497_v59 }
 0x12d   : > { %v519_v61 = vadd.f32 1e-05, %v511_v60 }
 0x12e   : > { %v500_v62 = vpop.xlane.xlu1 %499  ;;  %v503_v63 = vpop.xlane.xlu0 %502 }
 0x12f   : > { %2588 = vrsqrt.f32 %v519_v61  ;;  %v512_v0 = vmul.f32 0.0625, %v500_v62  ;;  %v513_v1 = vmul.f32 0.0625, %v503_v63 }
 0x131   : > { %v520_v2 = vadd.f32 1e-05, %v512_v0  ;;  %v521_v3 = vadd.f32 1e-05, %v513_v1 }
 0x132   : > { %v506_v4 = vpop.xlane.xlu1 %505  ;;  %v485_v5 = vpop.xlane.xlu0 %484 }
 0x133   : > { %2590 = vrsqrt.f32 %v520_v2  ;;  %v514_v6 = vmul.f32 0.0625, %v506_v4  ;;  %v507_v7 = vmul.f32 0.0625, %v485_v5  ;;  %v2248_v4 = vld [vmem:[%s3148_s7] ss:$0 sm:$0xff] }
 0x134   : > { %2592 = vrsqrt.f32 %v521_v3 }
 0x135   : > { %v522_v8 = vadd.f32 1e-05, %v514_v6  ;;  %v515_v9 = vadd.f32 1e-05, %v507_v7 }
 0x136   : > { %v488_v10 = vpop.xlane.xlu1 %487  ;;  %v491_v11 = vpop.xlane.xlu0 %490 }
 0x137   : > { %2594 = vrsqrt.f32 %v522_v8  ;;  %v508_v12 = vmul.f32 0.0625, %v488_v10  ;;  %v509_v13 = vmul.f32 0.0625, %v491_v11 }
 0x138   : > { %2596 = vrsqrt.f32 %v515_v9  ;;  %v2242_v9 = vld [vmem:[%s3147_s6] ss:$0 sm:$0xff] }
 0x139   : > { %v516_v14 = vadd.f32 1e-05, %v508_v12  ;;  %v517_v15 = vadd.f32 1e-05, %v509_v13 }
 0x13a   : > { %v494_v16 = vpop.xlane.xlu1 %493 }
 0x13b   : > { %2598 = vrsqrt.f32 %v516_v14  ;;  %v510_v17 = vmul.f32 0.0625, %v494_v16 }
 0x13c   : > { %v2589_v18 = vpop.eup %2588  ;;  %2600 = vrsqrt.f32 %v517_v15 }
 0x13d   : > { %v535_v19 = vmul.f32 %v2589_v18, %v2768_v20  ;;  %v518_v22 = vadd.f32 1e-05, %v510_v17 }
 0x13f   : > { %2602 = vrsqrt.f32 %v518_v22  ;;  %v549_v26 = vmul.f32 %v2240_v23, %v535_v19 }
 0x140   : > { %v2591_v24 = vpop.eup %2590 }
 0x141   : > { %v2593_v25 = vpop.eup %2592  ;;  %v536_v27 = vmul.f32 %v2591_v24, %v2776_v28  ;;  %v563_v36 = vadd.f32 %v2241_v31, %v549_v26 }
 0x142   : > { %v537_v30 = vmul.f32 %v2593_v25, %v2770_v21 }
 0x143   : > { %v550_v32 = vmul.f32 %v2240_v23, %v536_v27 }
 0x144   : > { %v2595_v33 = vpop.eup %2594  ;;  %v551_v34 = vmul.f32 %v2240_v23, %v537_v30 }
 0x145   : > { %v2597_v20 = vpop.eup %2596  ;;  %v538_v35 = vmul.f32 %v2595_v33, %v2778_v29  ;;  %v564_v37 = vadd.f32 %v2241_v31, %v550_v32 }
 0x146   : > { %v531_v39 = vmul.f32 %v2597_v20, %v2786_v38  ;;  %v565_v45 = vadd.f32 %v2241_v31, %v551_v34  ;;  %v2254_v20 = vld [vmem:[%s3149_s8] ss:$0 sm:$0xff] }
 0x147   : > { %v552_v41 = vmul.f32 %v2240_v23, %v538_v35  ;;  %v2834_v42 = vpack.c.bf16 %v564_v37, %v563_v36 }
 0x148   : > { %v2599_v28 = vpop.eup %2598  ;;  %v545_v21 = vmul.f32 %v2240_v23, %v531_v39 }
 0x149   : > { %v2601_v43 = vpop.eup %2600  ;;  %v532_v44 = vmul.f32 %v2599_v28, %v2789_v40  ;;  %2388 = vmatprep.mubr.msk.bf16.mxu1 %vm433_vm0, %v2834_v42  ;;  %v566_v46 = vadd.f32 %v2241_v31, %v552_v41 }
 0x14a   : > { %v533_v47 = vmul.f32 %v2601_v43, %v2796_v48  ;;  %v559_v53 = vadd.f32 %v2241_v31, %v545_v21 }
 0x14b   : > { %v546_v29 = vmul.f32 %v2240_v23, %v532_v44  ;;  %v2840_v50 = vpack.c.bf16 %v566_v46, %v565_v45 }
 0x14c   : > { %v2603_v51 = vpop.eup %2602  ;;  %v547_v38 = vmul.f32 %v2240_v23, %v533_v47 }
 0x14d   : > { %v534_v52 = vmul.f32 %v2603_v51, %v2798_v49  ;;  %2389 = vmatmul.mubr.msk.bf16.vlgmr.msra.gmra.mxu1 %vm433_vm0, %v2840_v50  ;;  %v560_v54 = vadd.f32 %v2241_v31, %v546_v29  ;;  %v2676_v49 = vmov 0.0  }
 0x14e   : > { %2393 = vmatpush3.bf16.msra.mxu1 %v2814_v57  ;;  %v561_v48 = vadd.f32 %v2241_v31, %v547_v38 }
 0x14f   : > { %v548_v40 = vmul.f32 %v2240_v23, %v534_v52  ;;  %v2846_v55 = vpack.c.bf16 %v560_v54, %v559_v53  ;;  %2412 = vmatprep.subr.bf16.mxu1 %v2676_v49 }
 0x151   : > { %2384 = vmatprep.mubr.msk.bf16.mxu0 %vm433_vm0, %v2846_v55  ;;  %2394 = vmatprep.mubr.msk.bf16.mxu1 %vm433_vm0, %v2846_v55  ;;  %v562_v56 = vadd.f32 %v2241_v31, %v548_v40 }
 0x153   : > { %v2852_v59 = vpack.c.bf16 %v562_v56, %v561_v48 }
 0x155   : > { %2385 = vmatmul.mubr.msk.bf16.vlgmr.msra.gmra.mxu0 %vm433_vm0, %v2852_v59  ;;  %2395 = vmatmul.mubr.msk.bf16.vlgmr.msra.gmra.mxu1 %vm433_vm0, %v2852_v59 }
 0x156   : > { %2398 = vmatprep.mubr.msk.bf16.mxu1 %vm433_vm0, %v2834_v42  ;;  %2404 = vmatprep.mubr.msk.bf16.mxu0 %vm433_vm0, %v2846_v55 }
 0x157   : > { %2403 = vmatpush3.bf16.msra.mxu0 %v2820_v58 }
 0x158   : > { %2424 = vmatprep.subr.bf16.mxu0 %v2676_v49 }
 0x15d   : > { %2399 = vmatmul.mubr.msk.bf16.gmra.mxu1 %vm433_vm0, %v2840_v50  ;;  %2405 = vmatmul.mubr.msk.bf16.vlgmr.msra.gmra.mxu0 %vm433_vm0, %v2852_v59 }
 0x15e   : > { %2408 = vmatprep.mubr.msk.bf16.mxu0 %vm433_vm0, %v2834_v42  ;;  %2414 = vmatprep.mubr.msk.bf16.mxu1 %vm2677_vm1, %v2676_v49 }
 0x165   : > { %2409 = vmatmul.mubr.msk.bf16.gmra.mxu0 %vm433_vm0, %v2840_v50 }
 0x166   : > { %2426 = vmatprep.mubr.msk.bf16.mxu0 %vm2677_vm1, %v2676_v49 }
 0x20d   : > { %v2877_v57 = vpop.f32.mrf.mxu1 }
 0x20f   : > { %v648_v58 = vpop.f32.mrf.mxu1 }
 0x210   : > { %v649_v41 = vadd.f32 %v2242_v9, %v648_v58 }
 0x211   : > { %v2879_v60 = vpop.f32.mrf.mxu1 }
 0x212   : > { %v827_v53 = vmul.f32 0.35355338, %v649_v41 }
 0x213   : > { %v651_v61 = vpop.f32.mrf.mxu1 }
 0x214   : > { %v652_v33 = vadd.f32 %v2242_v9, %v651_v61 }
 0x215   : > { %v2386_v62 = vpop.f32.mrf.mxu0  ;;  %v2396_v63 = vpop.f32.mrf.mxu1 }
 0x216   : > { %v721_v23 = vadd.f32 %v2396_v63, %v2248_v4  ;;  %v641_v28 = vadd.f32 %v2386_v62, %v2242_v9  ;;  %v828_v29 = vmul.f32 0.35355338, %v652_v33  ;;  %v660_v63 = vadd.f32 %v2879_v60, %v2242_v9 }
 0x217   : > { %v632_v0 = vpop.f32.mrf.mxu0  ;;  %v712_v1 = vpop.f32.mrf.mxu1 }
 0x218   : > { %v713_v7 = vadd.f32 %v2248_v4, %v712_v1  ;;  %v633_v16 = vadd.f32 %v2242_v9, %v632_v0  ;;  %v825_v48 = vmul.f32 0.35355338, %v641_v28  ;;  %v833_v0 = vpack.c.bf16 %v828_v29, %v827_v53 }
 0x219   : > { %v2387_v2 = vpop.f32.mrf.mxu0  ;;  %v2397_v3 = vpop.f32.mrf.mxu1 }
 0x21a   : > { %v724_v17 = vadd.f32 %v2397_v3, %v2248_v4  ;;  %v823_v27 = vmul.f32 0.35355338, %v633_v16  ;;  %v644_v35 = vadd.f32 %v2387_v2, %v2242_v9 }
 0x21b   : > { %v635_v5 = vpop.f32.mrf.mxu0  ;;  %v715_v6 = vpop.f32.mrf.mxu1 }
 0x21c   : > { %v716_v8 = vadd.f32 %v2248_v4, %v715_v6  ;;  %v636_v12 = vadd.f32 %v2242_v9, %v635_v5  ;;  %v836_v30 = vpack.c.bf16 %v724_v17, %v721_v23  ;;  %v826_v51 = vmul.f32 0.35355338, %v644_v35 }
 0x21d   : > { %v2400_v10 = vpop.f32.mrf.mxu1  ;;  %v2887_v11 = vpop.f32.mrf.mxu0  ;;  %v830_v6 = vmul.f32 0.35355338, %v660_v63 }
 0x21e   : > { %v835_v13 = vpack.c.bf16 %v716_v8, %v713_v7  ;;  %v824_v24 = vmul.f32 0.35355338, %v636_v12  ;;  %v897_v45 = vsel %vm845_vm2, %v836_v30, 0  ;;  %v737_v38 = vadd.f32 %v2400_v10, %v2248_v4 }
 0x21f   : > { %v728_v14 = vpop.f32.mrf.mxu1  ;;  %v792_v15 = vpop.f32.mrf.mxu0  ;;  %v832_v1 = vpack.c.bf16 %v826_v51, %v825_v48  ;;  %v801_v7 = vadd.f32 %v2887_v11, %v2254_v20 }
 0x220   : > { %v850_v18 = vsel %vm845_vm2, %v835_v13, 0  ;;  %v729_v31 = vadd.f32 %v2248_v4, %v728_v14  ;;  %v831_v36 = vpack.c.bf16 %v824_v24, %v823_v27  ;;  %v793_v62 = vadd.f32 %v2254_v20, %v792_v15  ;;  %v843_v15 = vld [vmem:[%s3150_s9] sm:$0xff]  ;;  %v844_v24 = vld [vmem:[%s3150_s9 + $0x8] sm:$0xff] }
 0x221   : > { %v2401_v19 = vpop.f32.mrf.mxu1  ;;  %v2407_v22 = vpop.f32.mrf.mxu0  ;;  %2413 = vmatpush3.bf16.xpose.msra.mxu1 %v850_v18 }
 0x222   : > { %2418 = vmatprep.subr.bf16.mxu1 %v2676_v49  ;;  %v740_v21 = vadd.f32 %v2401_v19, %v2248_v4  ;;  %v804_v60 = vadd.f32 %v2407_v22, %v2254_v20 }
 0x223   : > { %v731_v25 = vpop.f32.mrf.mxu1  ;;  %v795_v26 = vpop.f32.mrf.mxu0 }
 0x224   : > { %v732_v32 = vadd.f32 %v2248_v4, %v731_v25  ;;  %v796_v54 = vadd.f32 %v2254_v20, %v795_v26  ;;  %v838_v56 = vpack.c.bf16 %v740_v21, %v737_v38  ;;  %v657_v4 = vadd.f32 %v2877_v57, %v2242_v9 }
 0x225   : > { %v2410_v34 = vpop.f32.mrf.mxu0  ;;  %v840_v9 = vpack.c.bf16 %v804_v60, %v801_v7 }
 0x226   : > { %v837_v37 = vpack.c.bf16 %v732_v32, %v729_v31  ;;  %v2894_v39 = vadd.f32 %v2410_v34, %v2254_v20  ;;  %v839_v3 = vpack.c.bf16 %v796_v54, %v793_v62  ;;  %v991_v5 = vsel %vm845_vm2, %v838_v56, 0 }
 0x227   : > { %v808_v43 = vpop.f32.mrf.mxu0  ;;  %v829_v57 = vmul.f32 0.35355338, %v657_v4 }
 0x228   : > { %v2896_v44 = vadd.f32 %v2254_v20, %v808_v43  ;;  %2415 = vmatmul.mubr.msk.bf16.vlgmr.msra.gmra.mxu1 %vm845_vm2, %v831_v36  ;;  %v944_v46 = vsel %vm845_vm2, %v837_v37, 0 }
 0x229   : > { %v2411_v47 = vpop.f32.mrf.mxu0  ;;  %2419 = vmatpush3.bf16.xpose.msra.mxu1 %v897_v45  ;;  %2425 = vmatpush3.bf16.xpose.msra.mxu0 %v944_v46  ;;  %v834_v8 = vpack.c.bf16 %v830_v6, %v829_v57 }
 0x22a   : > { %v2901_v52 = vadd.f32 %v2411_v47, %v2254_v20  ;;  %2420 = vmatprep.mubr.msk.bf16.mxu1 %vm2677_vm1, %v2676_v49  ;;  %2430 = vmatprep.subr.bf16.mxu1 %v2676_v49 }
 0x22b   : > { %v811_v40 = vpop.f32.mrf.mxu0  ;;  %2436 = vmatprep.subr.bf16.mxu0 %v2676_v49 }
 0x22c   : > { %v842_v58 = vpack.c.bf16 %v2901_v52, %v2894_v39  ;;  %v2909_v61 = vadd.f32 %v2254_v20, %v811_v40 }
 0x22e   : > { %v841_v2 = vpack.c.bf16 %v2909_v61, %v2896_v44  ;;  %v2586_v44 = vld [vmem:[%s3146_s5 + $0x8] sm:$0xff]  }
 0x230   : > { %2421 = vmatmul.mubr.msk.bf16.vlgmr.msra.gmra.mxu1 %vm845_vm2, %v832_v1  ;;  %2427 = vmatmul.mubr.msk.bf16.vlgmr.msra.gmra.mxu0 %vm845_vm2, %v833_v0 }
 0x231   : > { %2431 = vmatpush3.bf16.xpose.msra.mxu1 %v991_v5  ;;  %2437 = vmatpush3.bf16.msra.mxu0 %v839_v3 }
 0x232   : > { %2432 = vmatprep.mubr.msk.bf16.mxu1 %vm2677_vm1, %v2676_v49  ;;  %2442 = vmatprep.subr.bf16.mxu1 %v2676_v49 }
 0x233   : > { %2438 = vmatprep.mubr.msk.bf16.mxu0 %vm2677_vm1, %v2676_v49  ;;  %2448 = vmatprep.subr.bf16.mxu0 %v2676_v49 }
 0x238   : > { %2433 = vmatmul.mubr.msk.bf16.vlgmr.msra.gmra.mxu1 %vm845_vm2, %v834_v8 }
 0x239   : > { %2443 = vmatpush3.bf16.msra.mxu1 %v840_v9  ;;  %2444 = vmatprep.mubr.msk.bf16.mxu1 %vm2677_vm1, %v2676_v49 }
 0x23a   : > { %2454 = vmatprep.subr.bf16.mxu1 %v2676_v49 }
 0x2e8   : > { %v886_v10 = vpop.f32.mrf.mxu1 }
 0x2e9   : > { %v887_v22 = vadd.f32 %v886_v10, %v843_v15 }
 0x2ea   : > { %v2416_v12 = vpop.f32.mrf.mxu1 }
 0x2eb   : > { %v1034_v33 = vsel %vm433_vm0, %v887_v22, -inf }
 0x2ec   : > { %v889_v13 = vpop.f32.mrf.mxu1 }
 0x2ed   : > { %v890_v32 = vadd.f32 %v889_v13, %v844_v24 }
 0x2ee   : > { %v2417_v14 = vpop.f32.mrf.mxu1 }
 0x2ef   : > { %v1037_v41 = vsel %vm433_vm0, %v890_v32, -inf }
 0x2f0   : > { %v933_v16 = vpop.f32.mrf.mxu1  ;;  %v980_v11 = vpop.f32.mrf.mxu0 }
 0x2f1   : > { %v934_v17 = vadd.f32 %v933_v16, %v843_v15  ;;  %v981_v37 = vadd.f32 %v980_v11, %v843_v15 }
 0x2f2   : > { %v2422_v18 = vpop.f32.mrf.mxu1  ;;  %v2428_v19 = vpop.f32.mrf.mxu0 }
 0x2f3   : > { %v1040_v23 = vsel %vm433_vm0, %v934_v17, -inf  ;;  %v1046_v47 = vsel %vm433_vm0, %v981_v37, -inf }
 0x2f4   : > { %v983_v25 = vpop.f32.mrf.mxu0  ;;  %1041 = vmax.xlane.f32.xlu0 %v1040_v23  ;;  %v936_v26 = vpop.f32.mrf.mxu1 }
 0x2f5   : > { %v937_v27 = vadd.f32 %v936_v26, %v844_v24  ;;  %v984_v46 = vadd.f32 %v983_v25, %v844_v24 }
 0x2f6   : > { %v2423_v30 = vpop.f32.mrf.mxu1  ;;  %v2429_v31 = vpop.f32.mrf.mxu0 }
 0x2f7   : > { %v1043_v20 = vsel %vm433_vm0, %v937_v27, -inf  ;;  %v1049_v51 = vsel %vm433_vm0, %v984_v46, -inf }
 0x2f8   : > { %1035 = vmax.xlane.f32.xlu0 %v1034_v33  ;;  %1044 = vmax.xlane.f32.xlu1 %v1043_v20  ;;  %v1027_v34 = vpop.f32.mrf.mxu1 }
 0x2f9   : > { %v1028_v35 = vadd.f32 %v1027_v34, %v843_v15 }
 0x2fa   : > { %v2434_v36 = vpop.f32.mrf.mxu1 }
 0x2fb   : > { %v1052_v28 = vsel %vm433_vm0, %v1028_v35, -inf }
 0x2fc   : > { %1038 = vmax.xlane.f32.xlu1 %v1037_v41  ;;  %1053 = vmax.xlane.f32.xlu0 %v1052_v28  ;;  %v1030_v43 = vpop.f32.mrf.mxu1 }
 0x2fd   : > { %v1031_v21 = vadd.f32 %v1030_v43, %v844_v24 }
 0x2fe   : > { %v2435_v45 = vpop.f32.mrf.mxu1 }
 0x2ff   : > { %v1055_v29 = vsel %vm433_vm0, %v1031_v21, -inf }
 0x300   : > { %1047 = vmax.xlane.f32.xlu0 %v1046_v47  ;;  %1056 = vmax.xlane.f32.xlu1 %v1055_v29 }
 0x304   : > { %1050 = vmax.xlane.f32.xlu1 %v1049_v51 }
 0x37d   : > { %v1042_v38 = vpop.xlane.xlu0 %1041 }
 0x37e   : > { %v1060_v53 = vsub.f32 %v934_v17, %v1042_v38 }
 0x380   : > { %v1070_v54 = vmul.f32 1.442695, %v1060_v53  ;;  %v2584_v53 = vld [vmem:[%s3145_s4 + $0x8] sm:$0xff]  }
 0x381   : > { %v1036_v40 = vpop.xlane.xlu0 %1035  ;;  %v1045_v48 = vpop.xlane.xlu1 %1044 }
 0x382   : > { %2604 = vpow2.f32 %v1070_v54  ;;  %v1058_v56 = vsub.f32 %v887_v22, %v1036_v40  ;;  %v1061_v62 = vsub.f32 %v937_v27, %v1045_v48 }
 0x384   : > { %v1066_v63 = vmul.f32 1.442695, %v1058_v56  ;;  %v1072_v0 = vmul.f32 1.442695, %v1061_v62 }
 0x385   : > { %v1039_v1 = vpop.xlane.xlu1 %1038  ;;  %v1054_v3 = vpop.xlane.xlu0 %1053 }
 0x386   : > { %2606 = vpow2.f32 %v1066_v63  ;;  %v1059_v4 = vsub.f32 %v890_v32, %v1039_v1  ;;  %v1064_v5 = vsub.f32 %v1028_v35, %v1054_v3  ;;  %v2585_v63 = vld [vmem:[%s3144_s3 + $0x8] sm:$0xff]  }
 0x387   : > { %2608 = vpow2.f32 %v1072_v0 }
 0x388   : > { %v1068_v6 = vmul.f32 1.442695, %v1059_v4  ;;  %v1078_v60 = vmul.f32 1.442695, %v1064_v5 }
 0x389   : > { %v1048_v57 = vpop.xlane.xlu0 %1047  ;;  %v1057_v7 = vpop.xlane.xlu1 %1056 }
 0x38a   : > { %2610 = vpow2.f32 %v1068_v6  ;;  %v1062_v8 = vsub.f32 %v981_v37, %v1048_v57  ;;  %v1065_v9 = vsub.f32 %v1031_v21, %v1057_v7 }
 0x38b   : > { %2612 = vpow2.f32 %v1078_v60 }
 0x38c   : > { %v1074_v10 = vmul.f32 1.442695, %v1062_v8  ;;  %v1080_v12 = vmul.f32 1.442695, %v1065_v9 }
 0x38d   : > { %v1051_v13 = vpop.xlane.xlu1 %1050 }
 0x38e   : > { %2614 = vpow2.f32 %v1074_v10  ;;  %v1063_v14 = vsub.f32 %v984_v46, %v1051_v13 }
 0x38f   : > { %v2605_v15 = vpop.eup %2604  ;;  %2616 = vpow2.f32 %v1080_v12 }
 0x390   : > { %v1076_v16 = vmul.f32 1.442695, %v1063_v14  ;;  %v1088_v11 = vsel %vm433_vm0, %v2605_v15, 0.0 }
 0x391   : > { %1089 = vadd.xlane.f32.xlu0 %v1088_v11 }
 0x392   : > { %2618 = vpow2.f32 %v1076_v16 }
 0x393   : > { %v2607_v17 = vpop.eup %2606 }
 0x394   : > { %v2609_v18 = vpop.eup %2608  ;;  %v1082_v19 = vsel %vm433_vm0, %v2607_v17, 0.0 }
 0x395   : > { %1083 = vadd.xlane.f32.xlu0 %v1082_v19  ;;  %v1091_v22 = vsel %vm433_vm0, %v2609_v18, 0.0  ;;  %v2280_v19 = vld [vmem:[%s3148_s7 + $0x1] ss:$0 sm:$0xff] }
 0x396   : > { %1092 = vadd.xlane.f32.xlu1 %v1091_v22 }
 0x397   : > { %v2611_v23 = vpop.eup %2610 }
 0x398   : > { %v2613_v24 = vpop.eup %2612  ;;  %v1085_v25 = vsel %vm433_vm0, %v2611_v23, 0.0 }
 0x399   : > { %v1100_v26 = vsel %vm433_vm0, %v2613_v24, 0.0 }
 0x39a   : > { %1101 = vadd.xlane.f32.xlu0 %v1100_v26  ;;  %1086 = vadd.xlane.f32.xlu1 %v1085_v25 }
 0x39b   : > { %v2615_v27 = vpop.eup %2614 }
 0x39c   : > { %v2617_v30 = vpop.eup %2616  ;;  %v1094_v31 = vsel %vm433_vm0, %v2615_v27, 0.0 }
 0x39d   : > { %v1103_v32 = vsel %vm433_vm0, %v2617_v30, 0.0 }
 0x39e   : > { %1095 = vadd.xlane.f32.xlu0 %v1094_v31  ;;  %1104 = vadd.xlane.f32.xlu1 %v1103_v32  ;;  %v2271_v31 = vld [vmem:[%s3147_s6 + $0x1] ss:$0 sm:$0xff] }
 0x39f   : > { %v2619_v33 = vpop.eup %2618 }
 0x3a0   : > { %v1097_v20 = vsel %vm433_vm0, %v2619_v33, 0.0 }
 0x3a2   : > { %1098 = vadd.xlane.f32.xlu1 %v1097_v20 }
 0x41a   : > { %v1090_v34 = vpop.xlane.xlu0 %1089 }
 0x41b   : > { %2620 = vrcp.f32 %v1090_v34 }
 0x41e   : > { %v1084_v35 = vpop.xlane.xlu0 %1083 }
 0x41f   : > { %v1093_v36 = vpop.xlane.xlu1 %1092 }
 0x420   : > { %2622 = vrcp.f32 %v1093_v36 }
 0x421   : > { %2624 = vrcp.f32 %v1084_v35 }
 0x423   : > { %v1102_v37 = vpop.xlane.xlu0 %1101  ;;  %v1087_v41 = vpop.xlane.xlu1 %1086 }
 0x424   : > { %2626 = vrcp.f32 %v1087_v41 }
 0x425   : > { %2628 = vrcp.f32 %v1102_v37 }
 0x427   : > { %v1096_v28 = vpop.xlane.xlu0 %1095  ;;  %v1105_v43 = vpop.xlane.xlu1 %1104 }
 0x428   : > { %2630 = vrcp.f32 %v1105_v43  ;;  %v2621_v21 = vpop.eup %2620 }
 0x429   : > { %2632 = vrcp.f32 %v1096_v28  ;;  %v1116_v47 = vmul.f32 %v2621_v21, %v2605_v15 }
 0x42b   : > { %v1099_v45 = vpop.xlane.xlu1 %1098 }
 0x42c   : > { %2634 = vrcp.f32 %v1099_v45 }
 0x42d   : > { %v2623_v46 = vpop.eup %2622 }
 0x42e   : > { %v1117_v29 = vmul.f32 %v2623_v46, %v2609_v18  ;;  %v2625_v51 = vpop.eup %2624 }
 0x42f   : > { %v1114_v40 = vmul.f32 %v2625_v51, %v2607_v17 }
 0x430   : > { %v1123_v38 = vpack.c.bf16 %v1117_v29, %v1116_v47 }
 0x431   : > { %v2627_v54 = vpop.eup %2626 }
 0x432   : > { %2445 = vmatmul.mubr.msk.bf16.vlgmr.msra.gmra.mxu1 %vm433_vm0, %v1123_v38  ;;  %v1115_v48 = vmul.f32 %v2627_v54, %v2611_v23  ;;  %v2629_v56 = vpop.eup %2628 }
 0x433   : > { %2455 = vmatpush3.bf16.msra.mxu1 %v842_v58  ;;  %2456 = vmatprep.mubr.msk.bf16.mxu1 %vm2677_vm1, %v2676_v49  ;;  %v1120_v3 = vmul.f32 %v2629_v56, %v2613_v24 }
 0x434   : > { %2470 = vmatprep.subr.bf16.mxu1 %v2584_v53  ;;  %v1122_v62 = vpack.c.bf16 %v1115_v48, %v1114_v40 }
 0x435   : > { %v2631_v0 = vpop.eup %2630 }
 0x436   : > { %v2633_v1 = vpop.eup %2632  ;;  %2439 = vmatmul.mubr.msk.bf16.vlgmr.msra.gmra.mxu0 %vm433_vm0, %v1122_v62  ;;  %v1121_v4 = vmul.f32 %v2631_v0, %v2617_v30 }
 0x437   : > { %2449 = vmatpush3.bf16.msra.mxu0 %v841_v2  ;;  %2450 = vmatprep.mubr.msk.bf16.mxu0 %vm2677_vm1, %v2676_v49  ;;  %v1118_v58 = vmul.f32 %v2633_v1, %v2615_v27 }
 0x438   : > { %v1125_v52 = vpack.c.bf16 %v1121_v4, %v1120_v3  ;;  %2460 = vmatprep.subr.bf16.mxu0 %v2585_v63 }
 0x439   : > { %v2635_v39 = vpop.eup %2634 }
 0x43a   : > { %v1119_v5 = vmul.f32 %v2635_v39, %v2619_v33  ;;  %2457 = vmatmul.mubr.msk.bf16.vlgmr.msra.gmra.mxu1 %vm433_vm0, %v1125_v52 }
 0x43b   : > { %2472 = vmatprep.mubr.msk.bf16.mxu1 %vm433_vm0, %v2846_v55  ;;  %2471 = vmatpush3.bf16.msra.mxu1 %v2584_v53 }
 0x43c   : > { %v1124_v6 = vpack.c.bf16 %v1119_v5, %v1118_v58  ;;  %2490 = vmatprep.subr.bf16.mxu1 %v2676_v49 }
 0x43e   : > { %2451 = vmatmul.mubr.msk.bf16.vlgmr.msra.gmra.mxu0 %vm433_vm0, %v1124_v6 }
 0x43f   : > { %2462 = vmatprep.mubr.msk.bf16.mxu0 %vm433_vm0, %v2846_v55  ;;  %2461 = vmatpush3.bf16.msra.mxu0 %v2585_v63 }
 0x440   : > { %2480 = vmatprep.subr.bf16.mxu0 %v2586_v44 }
 0x442   : > { %2473 = vmatmul.mubr.msk.bf16.vlgmr.msra.gmra.mxu1 %vm433_vm0, %v2852_v59 }
 0x443   : > { %2476 = vmatprep.mubr.msk.bf16.mxu1 %vm433_vm0, %v2834_v42 }
 0x446   : > { %2463 = vmatmul.mubr.msk.bf16.vlgmr.msra.gmra.mxu0 %vm433_vm0, %v2852_v59 }
 0x447   : > { %2466 = vmatprep.mubr.msk.bf16.mxu0 %vm433_vm0, %v2834_v42  ;;  %2481 = vmatpush3.bf16.msra.mxu0 %v2586_v44 }
 0x448   : > { %2502 = vmatprep.subr.bf16.mxu0 %v2676_v49 }
 0x44a   : > { %2477 = vmatmul.mubr.msk.bf16.gmra.mxu1 %vm433_vm0, %v2840_v50 }
 0x44b   : > { %2492 = vmatprep.mubr.msk.bf16.mxu1 %vm2677_vm1, %v2676_v49 }
 0x44e   : > { %2467 = vmatmul.mubr.msk.bf16.gmra.mxu0 %vm433_vm0, %v2840_v50 }
 0x44f   : > { %2482 = vmatprep.mubr.msk.bf16.mxu0 %vm433_vm0, %v2846_v55 }
 0x456   : > { %2483 = vmatmul.mubr.msk.bf16.vlgmr.msra.gmra.mxu0 %vm433_vm0, %v2852_v59 }
 0x457   : > { %2486 = vmatprep.mubr.msk.bf16.mxu0 %vm433_vm0, %v2834_v42 }
 0x45e   : > { %2487 = vmatmul.mubr.msk.bf16.gmra.mxu0 %vm433_vm0, %v2840_v50 }
 0x45f   : > { %2504 = vmatprep.mubr.msk.bf16.mxu0 %vm2677_vm1, %v2676_v49 }
 0x4f2   : > { %v3004_v61 = vpop.f32.mrf.mxu1 }
 0x4f4   : > { %v2446_v2 = vpop.f32.mrf.mxu1 }
 0x4f6   : > { %v3006_v60 = vpop.f32.mrf.mxu1  ;;  %v3008_v57 = vpop.f32.mrf.mxu0 }
 0x4f8   : > { %v2447_v55 = vpop.f32.mrf.mxu1  ;;  %v2440_v7 = vpop.f32.mrf.mxu0 }
 0x4fa   : > { %v3010_v8 = vpop.f32.mrf.mxu0  ;;  %v3012_v59 = vpop.f32.mrf.mxu1 }
 0x4fc   : > { %v2441_v42 = vpop.f32.mrf.mxu0  ;;  %v2458_v9 = vpop.f32.mrf.mxu1 }
 0x4fe   : > { %v3014_v10 = vpop.f32.mrf.mxu0  ;;  %v3016_v50 = vpop.f32.mrf.mxu1 }
 0x500   : > { %v2452_v12 = vpop.f32.mrf.mxu0  ;;  %v2459_v13 = vpop.f32.mrf.mxu1 }
 0x501   : > { %v2289_v12 = vld [vmem:[%s3149_s8 + $0x1] ss:$0 sm:$0xff] }
 0x502   : > { %v3018_v14 = vpop.f32.mrf.mxu0  ;;  %v2474_v15 = vpop.f32.mrf.mxu1 }
 0x503   : > { %v1444_v28 = vadd.f32 %v2474_v15, %v2280_v19 }
 0x504   : > { %v2453_v16 = vpop.f32.mrf.mxu0  ;;  %v1435_v11 = vpop.f32.mrf.mxu1 }
 0x505   : > { %v1436_v24 = vadd.f32 %v2280_v19, %v1435_v11 }
 0x506   : > { %v2464_v17 = vpop.f32.mrf.mxu0  ;;  %v2475_v18 = vpop.f32.mrf.mxu1 }
 0x507   : > { %v1447_v20 = vadd.f32 %v2475_v18, %v2280_v19  ;;  %v1362_v56 = vadd.f32 %v2464_v17, %v2271_v31 }
 0x508   : > { %v1353_v22 = vpop.f32.mrf.mxu0  ;;  %v1438_v23 = vpop.f32.mrf.mxu1 }
 0x509   : > { %v1439_v25 = vadd.f32 %v2280_v19, %v1438_v23  ;;  %v1354_v34 = vadd.f32 %v2271_v31, %v1353_v22  ;;  %v1561_v46 = vpack.c.bf16 %v1447_v20, %v1444_v28  ;;  %v1550_v6 = vmul.f32 0.35355338, %v1362_v56 }
 0x50a   : > { %v2465_v26 = vpop.f32.mrf.mxu0  ;;  %v2478_v27 = vpop.f32.mrf.mxu1 }
 0x50b   : > { %v1560_v30 = vpack.c.bf16 %v1439_v25, %v1436_v24  ;;  %v1548_v47 = vmul.f32 0.35355338, %v1354_v34  ;;  %v1365_v53 = vadd.f32 %v2465_v26, %v2271_v31  ;;  %v1622_v0 = vsel %vm845_vm2, %v1561_v46, 0 }
 0x50c   : > { %v1356_v32 = vpop.f32.mrf.mxu0  ;;  %v1451_v33 = vpop.f32.mrf.mxu1  ;;  %v1460_v52 = vadd.f32 %v2478_v27, %v2280_v19 }
 0x50d   : > { %v1357_v35 = vadd.f32 %v2271_v31, %v1356_v32  ;;  %v1575_v36 = vsel %vm845_vm2, %v1560_v30, 0  ;;  %v1452_v29 = vadd.f32 %v2280_v19, %v1451_v33  ;;  %v1551_v39 = vmul.f32 0.35355338, %v1365_v53 }
 0x50e   : > { %v2468_v37 = vpop.f32.mrf.mxu0  ;;  %v2479_v41 = vpop.f32.mrf.mxu1  ;;  %2491 = vmatpush3.bf16.xpose.msra.mxu1 %v1575_v36 }
 0x50f   : > { %v1549_v43 = vmul.f32 0.35355338, %v1357_v35  ;;  %2496 = vmatprep.subr.bf16.mxu1 %v2676_v49  ;;  %v1463_v62 = vadd.f32 %v2479_v41, %v2280_v19  ;;  %v1557_v7 = vpack.c.bf16 %v1551_v39, %v1550_v6  ;;  %v1378_v15 = vadd.f32 %v2468_v37, %v2271_v31  ;;  %v2295_v41 = vld [vmem:[%s3150_s9 + $0x10] sm:$0xff] }
 0x510   : > { %v1369_v21 = vpop.f32.mrf.mxu0  ;;  %v1454_v45 = vpop.f32.mrf.mxu1 }
 0x511   : > { %v1455_v51 = vadd.f32 %v2280_v19, %v1454_v45  ;;  %v1556_v54 = vpack.c.bf16 %v1549_v43, %v1548_v47  ;;  %v1370_v1 = vadd.f32 %v2271_v31, %v1369_v21  ;;  %v1563_v44 = vpack.c.bf16 %v1463_v62, %v1460_v52  ;;  %v2296_v45 = vld [vmem:[%s3150_s9 + $0x18] sm:$0xff] }
 0x512   : > { %v2469_v38 = vpop.f32.mrf.mxu0  ;;  %v1554_v26 = vmul.f32 0.35355338, %v1378_v15 }
 0x513   : > { %v1562_v40 = vpack.c.bf16 %v1455_v51, %v1452_v29  ;;  %v1552_v2 = vmul.f32 0.35355338, %v1370_v1  ;;  %v1381_v42 = vadd.f32 %v2469_v38, %v2271_v31  ;;  %v1716_v17 = vsel %vm845_vm2, %v1563_v44, 0 }
 0x514   : > { %v1372_v48 = vpop.f32.mrf.mxu0 }
 0x515   : > { %v1373_v63 = vadd.f32 %v2271_v31, %v1372_v48  ;;  %2493 = vmatmul.mubr.msk.bf16.vlgmr.msra.gmra.mxu1 %vm845_vm2, %v1556_v54  ;;  %v1669_v4 = vsel %vm845_vm2, %v1562_v40, 0  ;;  %v1555_v19 = vmul.f32 0.35355338, %v1381_v42 }
 0x516   : > { %v2484_v3 = vpop.f32.mrf.mxu0  ;;  %2497 = vmatpush3.bf16.xpose.msra.mxu1 %v1622_v0  ;;  %2498 = vmatprep.mubr.msk.bf16.mxu1 %vm2677_vm1, %v2676_v49 }
 0x517   : > { %2503 = vmatpush3.bf16.xpose.msra.mxu0 %v1669_v4  ;;  %2508 = vmatprep.subr.bf16.mxu1 %v2676_v49  ;;  %v1553_v58 = vmul.f32 0.35355338, %v1373_v63  ;;  %v1526_v30 = vadd.f32 %v2484_v3, %v2289_v12  ;;  %v1559_v32 = vpack.c.bf16 %v1555_v19, %v1554_v26 }
 0x518   : > { %v1517_v5 = vpop.f32.mrf.mxu0  ;;  %2514 = vmatprep.subr.bf16.mxu0 %v2676_v49 }
 0x519   : > { %v1558_v9 = vpack.c.bf16 %v1553_v58, %v1552_v2  ;;  %v1518_v16 = vadd.f32 %v2289_v12, %v1517_v5 }
 0x51a   : > { %v2485_v55 = vpop.f32.mrf.mxu0 }
 0x51b   : > { %v1529_v24 = vadd.f32 %v2485_v55, %v2289_v12 }
 0x51c   : > { %v1520_v13 = vpop.f32.mrf.mxu0 }
 0x51d   : > { %v1521_v11 = vadd.f32 %v2289_v12, %v1520_v13  ;;  %2499 = vmatmul.mubr.msk.bf16.vlgmr.msra.gmra.mxu1 %vm845_vm2, %v1557_v7  ;;  %v1565_v20 = vpack.c.bf16 %v1529_v24, %v1526_v30 }
 0x51e   : > { %2505 = vmatmul.mubr.msk.bf16.vlgmr.msra.gmra.mxu0 %vm845_vm2, %v1558_v9  ;;  %v2488_v18 = vpop.f32.mrf.mxu0  ;;  %2509 = vmatpush3.bf16.xpose.msra.mxu1 %v1716_v17 }
 0x51f   : > { %v1564_v22 = vpack.c.bf16 %v1521_v11, %v1518_v16  ;;  %v3041_v23 = vadd.f32 %v2488_v18, %v2289_v12  ;;  %2510 = vmatprep.mubr.msk.bf16.mxu1 %vm2677_vm1, %v2676_v49  ;;  %2520 = vmatprep.subr.bf16.mxu1 %v2676_v49 }
 0x520   : > { %v1533_v25 = vpop.f32.mrf.mxu0  ;;  %2516 = vmatprep.mubr.msk.bf16.mxu0 %vm2677_vm1, %v2676_v49 }
 0x521   : > { %v3048_v27 = vadd.f32 %v2289_v12, %v1533_v25  ;;  %2515 = vmatpush3.bf16.msra.mxu0 %v1564_v22 }
 0x522   : > { %v2489_v31 = vpop.f32.mrf.mxu0  ;;  %2526 = vmatprep.subr.bf16.mxu0 %v2676_v49 }
 0x523   : > { %v3051_v33 = vadd.f32 %v2489_v31, %v2289_v12 }
 0x524   : > { %v1536_v34 = vpop.f32.mrf.mxu0 }
 0x525   : > { %v1567_v35 = vpack.c.bf16 %v3051_v33, %v3041_v23  ;;  %v3055_v36 = vadd.f32 %v2289_v12, %v1536_v34  ;;  %2511 = vmatmul.mubr.msk.bf16.vlgmr.msra.gmra.mxu1 %vm845_vm2, %v1559_v32  ;;  %v2587_v23 = vld [vmem:[%s3151_s10] sm:$0xff]  }
 0x526   : > { %2521 = vmatpush3.bf16.msra.mxu1 %v1565_v20  ;;  %2522 = vmatprep.mubr.msk.bf16.mxu1 %vm2677_vm1, %v2676_v49 }
 0x527   : > { %v1566_v37 = vpack.c.bf16 %v3055_v36, %v3048_v27  ;;  %2532 = vmatprep.subr.bf16.mxu1 %v2676_v49 }
 0x5d5   : > { %v1611_v28 = vpop.f32.mrf.mxu1 }
 0x5d6   : > { %v1612_v43 = vadd.f32 %v2295_v41, %v1611_v28 }
 0x5d7   : > { %v2494_v21 = vpop.f32.mrf.mxu1 }
 0x5d8   : > { %v1759_v46 = vsel %vm433_vm0, %v1612_v43, -inf }
 0x5d9   : > { %1760 = vmax.xlane.f32.xlu0 %v1759_v46  ;;  %v1614_v47 = vpop.f32.mrf.mxu1 }
 0x5da   : > { %v1615_v29 = vadd.f32 %v2296_v45, %v1614_v47 }
 0x5db   : > { %v2495_v51 = vpop.f32.mrf.mxu1 }
 0x5dc   : > { %v1762_v38 = vsel %vm433_vm0, %v1615_v29, -inf }
 0x5dd   : > { %1763 = vmax.xlane.f32.xlu1 %v1762_v38  ;;  %v1658_v53 = vpop.f32.mrf.mxu1 }
 0x5de   : > { %v1705_v54 = vpop.f32.mrf.mxu0  ;;  %v1659_v40 = vadd.f32 %v2295_v41, %v1658_v53 }
 0x5df   : > { %v2500_v48 = vpop.f32.mrf.mxu1  ;;  %v1706_v56 = vadd.f32 %v2295_v41, %v1705_v54 }
 0x5e0   : > { %v2506_v62 = vpop.f32.mrf.mxu0  ;;  %v1765_v63 = vsel %vm433_vm0, %v1659_v40, -inf }
 0x5e1   : > { %1766 = vmax.xlane.f32.xlu0 %v1765_v63  ;;  %v1661_v0 = vpop.f32.mrf.mxu1  ;;  %v1771_v58 = vsel %vm433_vm0, %v1706_v56, -inf }
 0x5e2   : > { %v1708_v1 = vpop.f32.mrf.mxu0  ;;  %v1662_v3 = vadd.f32 %v2296_v45, %v1661_v0 }
 0x5e3   : > { %v2501_v4 = vpop.f32.mrf.mxu1  ;;  %v1709_v39 = vadd.f32 %v2296_v45, %v1708_v1 }
 0x5e4   : > { %v2507_v52 = vpop.f32.mrf.mxu0  ;;  %v1768_v5 = vsel %vm433_vm0, %v1662_v3, -inf }
 0x5e5   : > { %1772 = vmax.xlane.f32.xlu0 %v1771_v58  ;;  %1769 = vmax.xlane.f32.xlu1 %v1768_v5  ;;  %v1752_v6 = vpop.f32.mrf.mxu1  ;;  %v1774_v55 = vsel %vm433_vm0, %v1709_v39, -inf }
 0x5e6   : > { %v1753_v44 = vadd.f32 %v2295_v41, %v1752_v6 }
 0x5e7   : > { %v2512_v2 = vpop.f32.mrf.mxu1 }
 0x5e8   : > { %v1777_v7 = vsel %vm433_vm0, %v1753_v44, -inf }
 0x5e9   : > { %1775 = vmax.xlane.f32.xlu1 %v1774_v55  ;;  %1778 = vmax.xlane.f32.xlu0 %v1777_v7  ;;  %v1755_v42 = vpop.f32.mrf.mxu1 }
 0x5ea   : > { %v1756_v9 = vadd.f32 %v2296_v45, %v1755_v42 }
 0x5eb   : > { %v2513_v12 = vpop.f32.mrf.mxu1 }
 0x5ec   : > { %v1780_v13 = vsel %vm433_vm0, %v1756_v9, -inf }
 0x5ed   : > { %1781 = vmax.xlane.f32.xlu1 %v1780_v13 }
 0x662   : > { %v1761_v15 = vpop.xlane.xlu0 %1760 }
 0x663   : > { %v1783_v16 = vsub.f32 %v1612_v43, %v1761_v15 }
 0x665   : > { %v1791_v11 = vmul.f32 1.442695, %v1783_v16 }
 0x666   : > { %v1764_v17 = vpop.xlane.xlu1 %1763 }
 0x667   : > { %2636 = vpow2.f32 %v1791_v11  ;;  %v1784_v18 = vsub.f32 %v1615_v29, %v1764_v17 }
 0x669   : > { %v1793_v19 = vmul.f32 1.442695, %v1784_v18 }
 0x66a   : > { %v1767_v22 = vpop.xlane.xlu0 %1766 }
 0x66b   : > { %2638 = vpow2.f32 %v1793_v19  ;;  %v1785_v24 = vsub.f32 %v1659_v40, %v1767_v22 }
 0x66d   : > { %v1795_v25 = vmul.f32 1.442695, %v1785_v24 }
 0x66e   : > { %v1773_v26 = vpop.xlane.xlu0 %1772  ;;  %v1770_v30 = vpop.xlane.xlu1 %1769 }
 0x66f   : > { %2640 = vpow2.f32 %v1795_v25  ;;  %v1787_v31 = vsub.f32 %v1706_v56, %v1773_v26  ;;  %v1786_v32 = vsub.f32 %v1662_v3, %v1770_v30 }
 0x671   : > { %v1799_v20 = vmul.f32 1.442695, %v1787_v31  ;;  %v1797_v34 = vmul.f32 1.442695, %v1786_v32 }
 0x672   : > { %v1776_v41 = vpop.xlane.xlu1 %1775  ;;  %v1779_v28 = vpop.xlane.xlu0 %1778 }
 0x673   : > { %2642 = vpow2.f32 %v1799_v20  ;;  %v1788_v43 = vsub.f32 %v1709_v39, %v1776_v41  ;;  %v1789_v21 = vsub.f32 %v1753_v44, %v1779_v28 }
 0x674   : > { %v2637_v45 = vpop.eup %2636  ;;  %2644 = vpow2.f32 %v1797_v34 }
 0x675   : > { %v1801_v46 = vmul.f32 1.442695, %v1788_v43  ;;  %v1803_v47 = vmul.f32 1.442695, %v1789_v21  ;;  %v1807_v29 = vsel %vm433_vm0, %v2637_v45, 0.0 }
 0x676   : > { %1808 = vadd.xlane.f32.xlu0 %v1807_v29  ;;  %v1782_v51 = vpop.xlane.xlu1 %1781 }
 0x677   : > { %2646 = vpow2.f32 %v1801_v46  ;;  %v1790_v38 = vsub.f32 %v1756_v9, %v1782_v51 }
 0x678   : > { %v2639_v53 = vpop.eup %2638  ;;  %2648 = vpow2.f32 %v1803_v47 }
 0x679   : > { %v1805_v54 = vmul.f32 1.442695, %v1790_v38  ;;  %v1810_v40 = vsel %vm433_vm0, %v2639_v53, 0.0 }
 0x67a   : > { %1811 = vadd.xlane.f32.xlu1 %v1810_v40 }
 0x67b   : > { %2650 = vpow2.f32 %v1805_v54 }
 0x67c   : > { %v2641_v48 = vpop.eup %2640 }
 0x67d   : > { %v1813_v56 = vsel %vm433_vm0, %v2641_v48, 0.0 }
 0x67e   : > { %1814 = vadd.xlane.f32.xlu0 %v1813_v56 }
 0x680   : > { %v2643_v62 = vpop.eup %2642 }
 0x681   : > { %v2645_v63 = vpop.eup %2644  ;;  %v1819_v0 = vsel %vm433_vm0, %v2643_v62, 0.0 }
 0x682   : > { %1820 = vadd.xlane.f32.xlu0 %v1819_v0  ;;  %v1816_v1 = vsel %vm433_vm0, %v2645_v63, 0.0 }
 0x683   : > { %1817 = vadd.xlane.f32.xlu1 %v1816_v1 }
 0x684   : > { %v2647_v3 = vpop.eup %2646 }
 0x685   : > { %v2649_v4 = vpop.eup %2648  ;;  %v1822_v39 = vsel %vm433_vm0, %v2647_v3, 0.0 }
 0x686   : > { %v1825_v52 = vsel %vm433_vm0, %v2649_v4, 0.0 }
 0x687   : > { %1826 = vadd.xlane.f32.xlu0 %v1825_v52  ;;  %1823 = vadd.xlane.f32.xlu1 %v1822_v39 }
 0x688   : > { %v2651_v58 = vpop.eup %2650 }
 0x689   : > { %v1828_v5 = vsel %vm433_vm0, %v2651_v58, 0.0 }
 0x68b   : > { %1829 = vadd.xlane.f32.xlu1 %v1828_v5 }
 0x6ff   : > { %v1809_v6 = vpop.xlane.xlu0 %1808 }
 0x700   : > { %2652 = vrcp.f32 %v1809_v6 }
 0x703   : > { %v1812_v44 = vpop.xlane.xlu1 %1811 }
 0x704   : > { %2654 = vrcp.f32 %v1812_v44 }
 0x707   : > { %v1815_v2 = vpop.xlane.xlu0 %1814 }
 0x708   : > { %2656 = vrcp.f32 %v1815_v2 }
 0x70b   : > { %v1821_v55 = vpop.xlane.xlu0 %1820 }
 0x70c   : > { %v1818_v7 = vpop.xlane.xlu1 %1817 }
 0x70d   : > { %2658 = vrcp.f32 %v1818_v7  ;;  %v2653_v42 = vpop.eup %2652 }
 0x70e   : > { %2660 = vrcp.f32 %v1821_v55  ;;  %v1839_v15 = vmul.f32 %v2653_v42, %v2637_v45 }
 0x710   : > { %v1827_v9 = vpop.xlane.xlu0 %1826  ;;  %v1824_v12 = vpop.xlane.xlu1 %1823 }
 0x711   : > { %v2655_v13 = vpop.eup %2654  ;;  %2662 = vrcp.f32 %v1824_v12 }
 0x712   : > { %v1840_v16 = vmul.f32 %v2655_v13, %v2639_v53  ;;  %2664 = vrcp.f32 %v1827_v9 }
 0x714   : > { %v1830_v11 = vpop.xlane.xlu1 %1829  ;;  %v1847_v17 = vpack.c.bf16 %v1840_v16, %v1839_v15 }
 0x715   : > { %2666 = vrcp.f32 %v1830_v11  ;;  %v2657_v18 = vpop.eup %2656 }
 0x716   : > { %2517 = vmatmul.mubr.msk.bf16.vlgmr.msra.gmra.mxu0 %vm433_vm0, %v1847_v17  ;;  %v1841_v22 = vmul.f32 %v2657_v18, %v2641_v48 }
 0x717   : > { %2527 = vmatpush3.bf16.msra.mxu0 %v1566_v37  ;;  %2528 = vmatprep.mubr.msk.bf16.mxu0 %vm2677_vm1, %v2676_v49 }
 0x718   : > { %2538 = vmatprep.subr.bf16.mxu0 %v2587_v23 }
 0x71a   : > { %v2659_v19 = vpop.eup %2658 }
 0x71b   : > { %v1842_v24 = vmul.f32 %v2659_v19, %v2645_v63  ;;  %v2661_v25 = vpop.eup %2660 }
 0x71c   : > { %v1843_v32 = vmul.f32 %v2661_v25, %v2643_v62 }
 0x71d   : > { %v1848_v26 = vpack.c.bf16 %v1842_v24, %v1841_v22 }
 0x71e   : > { %v2663_v30 = vpop.eup %2662 }
 0x71f   : > { %2523 = vmatmul.mubr.msk.bf16.vlgmr.msra.gmra.mxu1 %vm433_vm0, %v1848_v26  ;;  %v2665_v31 = vpop.eup %2664  ;;  %v1844_v27 = vmul.f32 %v2663_v30, %v2647_v3 }
 0x720   : > { %2533 = vmatpush3.bf16.msra.mxu1 %v1567_v35  ;;  %2534 = vmatprep.mubr.msk.bf16.mxu1 %vm2677_vm1, %v2676_v49  ;;  %v1845_v20 = vmul.f32 %v2665_v31, %v2649_v4 }
 0x721   : > { %v1849_v37 = vpack.c.bf16 %v1844_v27, %v1843_v32 }
 0x722   : > { %v2667_v36 = vpop.eup %2666 }
 0x723   : > { %v1846_v34 = vmul.f32 %v2667_v36, %v2651_v58  ;;  %2529 = vmatmul.mubr.msk.bf16.vlgmr.msra.gmra.mxu0 %vm433_vm0, %v1849_v37 }
 0x724   : > { %2539 = vmatpush3.bf16.msra.mxu0 %v2587_v23 }
 0x725   : > { %v1850_v41 = vpack.c.bf16 %v1846_v34, %v1845_v20 }
 0x727   : > { %2535 = vmatmul.mubr.msk.bf16.vlgmr.msra.gmra.mxu1 %vm433_vm0, %v1850_v41 }
 0x7d6   : > { %v1888_v28 = vpop.f32.mrf.mxu0 }
 0x7d8   : > { %v2518_v43 = vpop.f32.mrf.mxu0 }
 0x7da   : > { %v1891_v33 = vpop.f32.mrf.mxu0 }
 0x7db   : > { %v2561_v35 = vpack.i.bf16 %v1891_v33, %v1888_v28 }
 0x7dc   : > { %v2519_v21 = vpop.f32.mrf.mxu0 }
 0x7dd   : > { %2562 = vrot.lane.b32.xlu0 %v2561_v35, %s2678_s18 }
 0x7df   : > { %v1932_v49 = vpop.f32.mrf.mxu1 }
 0x7e1   : > { %v2524_v45 = vpop.f32.mrf.mxu1 }
 0x7e3   : > { %v1935_v46 = vpop.f32.mrf.mxu1  ;;  %v1976_v29 = vpop.f32.mrf.mxu0 }
 0x7e4   : > { %v2566_v47 = vpack.i.bf16 %v1935_v46, %v1932_v49 }
 0x7e5   : > { %v2525_v51 = vpop.f32.mrf.mxu1  ;;  %v2530_v38 = vpop.f32.mrf.mxu0 }
 0x7e6   : > { %2567 = vrot.lane.b32.xlu1 %v2566_v47, %s2678_s18 }
 0x7e7   : > { %v2020_v53 = vpop.f32.mrf.mxu1  ;;  %v1979_v54 = vpop.f32.mrf.mxu0 }
 0x7e8   : > { %v2571_v40 = vpack.i.bf16 %v1979_v54, %v1976_v29 }
 0x7e9   : > { %v2536_v48 = vpop.f32.mrf.mxu1  ;;  %v2531_v56 = vpop.f32.mrf.mxu0 }
 0x7ea   : > { %2572 = vrot.lane.b32.xlu1 %v2571_v40, %s2678_s18 }
 0x7eb   : > { %v2023_v62 = vpop.f32.mrf.mxu1 }
 0x7ec   : > { %v2576_v63 = vpack.i.bf16 %v2023_v62, %v2020_v53 }
 0x7ed   : > { %v2537_v0 = vpop.f32.mrf.mxu1 }
 0x7ee   : > { %2577 = vrot.lane.b32.xlu1 %v2576_v63, %s2678_s18 }
 0x84f   : > { %v2563_v1 = vpop.permute.xlu0 %2562 }
 0x850   : > { %v2565_v3 = vunpack.i.h.bf16 %v2563_v1  ;;  %v2564_v4 = vunpack.i.l.bf16 %v2563_v1 }
 0x852   : > { %v2060_v39 = vsel %vm845_vm2, %v3010_v8, %v2565_v3  ;;  %v2059_v52 = vsel %vm845_vm2, %v3008_v57, %v2564_v4 }
 0x853   : > { %v2067_v58 = vpack.c.bf16 %v2060_v39, %v2059_v52 }
 0x855   : > { %2540 = vmatprep.mubr.msk.bf16.mxu0 %vm433_vm0, %v2067_v58 }
 0x858   : > { %v2568_v5 = vpop.permute.xlu1 %2567 }
 0x859   : > { %v2570_v6 = vunpack.i.h.bf16 %v2568_v5  ;;  %v2569_v44 = vunpack.i.l.bf16 %v2568_v5 }
 0x85b   : > { %v2062_v2 = vsel %vm845_vm2, %v3006_v60, %v2570_v6  ;;  %v2061_v55 = vsel %vm845_vm2, %v3004_v61, %v2569_v44 }
 0x85c   : > { %v2068_v7 = vpack.c.bf16 %v2062_v2, %v2061_v55  ;;  %v2573_v42 = vpop.permute.xlu1 %2572 }
 0x85d   : > { %v2575_v9 = vunpack.i.h.bf16 %v2573_v42  ;;  %v2574_v8 = vunpack.i.l.bf16 %v2573_v42 }
 0x85e   : > { %2541 = vmatmul.mubr.msk.bf16.vlgmr.msra.gmra.mxu0 %vm433_vm0, %v2068_v7 }
 0x85f   : > { %v2064_v57 = vsel %vm845_vm2, %v3018_v14, %v2575_v9  ;;  %v2063_v12 = vsel %vm845_vm2, %v3014_v10, %v2574_v8  ;;  %v2305_v10 = vld [vmem:[%s3152_s11] ss:$0 sm:$0xff] }
 0x860   : > { %v2069_v13 = vpack.c.bf16 %v2064_v57, %v2063_v12  ;;  %v2578_v15 = vpop.permute.xlu1 %2577 }
 0x861   : > { %v2580_v16 = vunpack.i.h.bf16 %v2578_v15  ;;  %v2579_v60 = vunpack.i.l.bf16 %v2578_v15 }
 0x862   : > { %2544 = vmatprep.mubr.msk.bf16.mxu0 %vm433_vm0, %v2069_v13 }
 0x863   : > { %v2066_v61 = vsel %vm845_vm2, %v3016_v50, %v2580_v16  ;;  %v2065_v11 = vsel %vm845_vm2, %v3012_v59, %v2579_v60 }
 0x864   : > { %v2070_v17 = vpack.c.bf16 %v2066_v61, %v2065_v11 }
 0x866   : > { %2545 = vmatmul.mubr.msk.bf16.gmra.mxu0 %vm433_vm0, %v2070_v17 }
 0x91e   : > { %v2542_v18 = vpop.f32.mrf.mxu0 }
 0x91f   : > { %v2141_v22 = vadd.f32 %v2542_v18, %v2305_v10 }
 0x920   : > { %v2132_v14 = vpop.f32.mrf.mxu0 }
 0x921   : > { %v2133_v19 = vadd.f32 %v2305_v10, %v2132_v14  ;;  %2165 = vst.msk [vmem:[%s420_s26 + $0x10] sm:$0xff] %vm433_vm0, %v2141_v22 }
 0x922   : > { %v2543_v50 = vpop.f32.mrf.mxu0 }
 0x923   : > { %2163 = vst.msk [vmem:[%s420_s26] sm:$0xff] %vm433_vm0, %v2133_v19  ;;  %v2144_v25 = vadd.f32 %v2543_v50, %v2305_v10 }
 0x924   : > { %v2135_v59 = vpop.f32.mrf.mxu0 }
 0x925   : > { %v2136_v24 = vadd.f32 %v2305_v10, %v2135_v59  ;;  %2166 = vst.msk [vmem:[%s420_s26 + $0x18] sm:$0xff] %vm433_vm0, %v2144_v25 }
 0x926   : > { %v2546_v26 = vpop.f32.mrf.mxu0 }
 0x927   : > { %2164 = vst.msk [vmem:[%s420_s26 + $0x8] sm:$0xff] %vm433_vm0, %v2136_v24  ;;  %v2157_v32 = vadd.f32 %v2546_v26, %v2305_v10 }
 0x928   : > { %v2148_v30 = vpop.f32.mrf.mxu0 }
 0x929   : > { %v2149_v31 = vadd.f32 %v2305_v10, %v2148_v30  ;;  %2169 = vst.msk [vmem:[%s420_s26 + $0x30] sm:$0xff] %vm433_vm0, %v2157_v32 }
 0x92a   : > { %v2547_v27 = vpop.f32.mrf.mxu0 }
 0x92b   : > { %2167 = vst.msk [vmem:[%s420_s26 + $0x20] sm:$0xff] %vm433_vm0, %v2149_v31  ;;  %v2160_v20 = vadd.f32 %v2547_v27, %v2305_v10 }
 0x92c   : > { %v2151_v36 = vpop.f32.mrf.mxu0 }
 0x92d   : > { %v2152_v37 = vadd.f32 %v2305_v10, %v2151_v36  ;;  %2170 = vst.msk [vmem:[%s420_s26 + $0x38] sm:$0xff] %vm433_vm0, %v2160_v20 }
 0x92f   : > { %2168 = vst.msk [vmem:[%s420_s26 + $0x28] sm:$0xff] %vm433_vm0, %v2152_v37 }
 0x930 PF: > { %s22_s21 = sadd.s32 1, %s2674_s21  }
 0x931   : > { %p19_p4 = scmp.ge.s32.totalorder %s22_s21, 4  }
 0x933   :  { %21 = sbr.rel (!%p19_p4) target bundleno = 1 (0x1), region = 105 }

// kernel: hybrid_swin_stage_forward.7
= control target key start
LH: loop header
LB: loop body
LE: loop exit
PB: predicated region body
PF: predicated region fallthrough
CT: control target
= control target key end

     0   :  { %s2808_s25 = smov 0   ;;  %s3261_s0 = inlined_call_operand.vmem [shape: f32[8,16,16], index: 0, kind: input, shape index: {}]   ;;  %s3262_s1 = inlined_call_operand.vmem [shape: f32[1,16], index: 1, kind: input, shape index: {}]   ;;  %s3263_s2 = inlined_call_operand.vmem [shape: f32[1,16], index: 2, kind: input, shape index: {}]   ;;  %s3264_s3 = inlined_call_operand.vmem [shape: bf16[2,16,8], index: 3, kind: input, shape index: {}]   ;;  %s3265_s4 = inlined_call_operand.vmem [shape: bf16[2,16,8], index: 4, kind: input, shape index: {}]   ;;  %s3266_s5 = inlined_call_operand.vmem [shape: bf16[2,16,8], index: 5, kind: input, shape index: {}]   ;;  %s3267_s6 = inlined_call_operand.vmem [shape: f32[2,1,8], index: 6, kind: input, shape index: {}]   ;;  %s3268_s7 = inlined_call_operand.vmem [shape: f32[2,1,8], index: 7, kind: input, shape index: {}]   ;;  %s3269_s8 = inlined_call_operand.vmem [shape: f32[2,1,8], index: 8, kind: input, shape index: {}]   ;;  %s3270_s9 = inlined_call_operand.vmem [shape: f32[2,16,16], index: 9, kind: input, shape index: {}]   ;;  %s3271_s10 = inlined_call_operand.vmem [shape: f32[4,16,16], index: 10, kind: input, shape index: {}]   ;;  %s3272_s11 = inlined_call_operand.vmem [shape: bf16[16,16], index: 11, kind: input, shape index: {}]   ;;  %s3273_s12 = inlined_call_operand.vmem [shape: f32[1,16], index: 12, kind: input, shape index: {}]   ;;  %s3274_s13 = inlined_call_operand.vmem [shape: f32[8,16,16], index: 13, kind: output, shape index: {}]  }
   0x1 LB: > { %s2288_s26 = sadd.s32 4294967295, %s2733_s25   ;;  %p2292_p0 = scmp.ge.s32.totalorder %s2733_s25, 1  ;;  %s2733_s25 = sphi %s2808_s25, %s23_s25  }
   0x2   : > { %p389_p1 = scmp.lt.s32.totalorder %s2733_s25, 3 }
   0x4   : > { %p390_p2 = pnand %p2292_p0, %p389_p1 }
   0x5   : > { %s2293_s27 = sshll.u32 (!%p390_p2), %s2288_s26, 2  ;;  %s2737_s30 = smov (!%p390_p2), 8  }
   0x6   : > { %393 = sbr.rel (%p390_p2) target bundleno = 2356 (0x934), region = 72  ;;  %p436_p3 = scmp.lt.s32.totalorder (!%p390_p2), %s2293_s27, 7 }
   0xb   : > { %s3276_s27 = smov (!%p436_p3, %s2293_s27), 7  ;;  %vm460_vm0 = vcmask 130048   ;;  %v2640_v56 = vld [vmem:[%s3264_s3] sm:$0xff]   ;;  %vm2736_vm1 = vmmov 0   ;;  %vm872_vm2 = vcmask 64512  }
   0xc   : > { %s2372_s28 = sshll.u32 %s3276_s27, 4  ;;  %2607 = vmatprep.subr.bf16.mxu1 %v2640_v56  ;;  %2441 = vmatprep.subr.bf16.mxu0 %v2640_v56  ;;  %v2878_v57 = vld [vmem:[%s3265_s4] sm:$0xff]  }
   0xd   : > { %s440_s14 = scalar_lea.vmem %s3261_s0, %s2372_s28  ;;  %2608 = vmatpush3.bf16.msra.mxu1 %v2640_v56  ;;  %2442 = vmatpush3.bf16.msra.mxu0 %v2640_v56  ;;  %v2884_v58 = vld [vmem:[%s3266_s5] sm:$0xff]   ;;  %s447_s18 = scalar_lea.vmem %s3274_s13, %s2372_s28 }
   0xe   : > { %v454_v0 = vld [vmem:[%s440_s14 + $0x20] sm:$0xff]  ;;  %v456_v1 = vld [vmem:[%s440_s14 + $0x30] sm:$0xff]  ;;  %v455_v2 = vld [vmem:[%s440_s14 + $0x28] sm:$0xff]  ;;  %2451 = vmatprep.subr.bf16.mxu1 %v2878_v57  ;;  %2461 = vmatprep.subr.bf16.mxu0 %v2884_v58 }
   0xf   : > { %v473_v3 = vsel %vm460_vm0, %v454_v0, 0.0  ;;  %v479_v4 = vsel %vm460_vm0, %v456_v1, 0.0  ;;  %v457_v5 = vld [vmem:[%s440_s14 + $0x38] sm:$0xff]  ;;  %v476_v6 = vsel %vm460_vm0, %v455_v2, 0.0  ;;  %v450_v8 = vld [vmem:[%s440_s14] sm:$0xff]  ;;  %v451_v9 = vld [vmem:[%s440_s14 + $0x8] sm:$0xff] }
  0x10   : > { %474 = vadd.xlane.f32.xlu0 %v473_v3  ;;  %480 = vadd.xlane.f32.xlu1 %v479_v4  ;;  %v482_v7 = vsel %vm460_vm0, %v457_v5, 0.0  ;;  %v461_v10 = vsel %vm460_vm0, %v450_v8, 0.0  ;;  %v464_v11 = vsel %vm460_vm0, %v451_v9, 0.0  ;;  %v452_v12 = vld [vmem:[%s440_s14 + $0x10] sm:$0xff]  ;;  %v453_v13 = vld [vmem:[%s440_s14 + $0x18] sm:$0xff] }
  0x11   : > { %v467_v14 = vsel %vm460_vm0, %v452_v12, 0.0  ;;  %v470_v15 = vsel %vm460_vm0, %v453_v13, 0.0 }
  0x14   : > { %477 = vadd.xlane.f32.xlu0 %v476_v6  ;;  %483 = vadd.xlane.f32.xlu1 %v482_v7 }
  0x18   : > { %462 = vadd.xlane.f32.xlu0 %v461_v10  ;;  %465 = vadd.xlane.f32.xlu1 %v464_v11 }
  0x1c   : > { %468 = vadd.xlane.f32.xlu0 %v467_v14  ;;  %471 = vadd.xlane.f32.xlu1 %v470_v15 }
  0x99   : > { %v475_v16 = vpop.xlane.xlu0 %474  ;;  %v481_v17 = vpop.xlane.xlu1 %480 }
  0x9a   : > { %v490_v18 = vmul.f32 0.0625, %v475_v16  ;;  %v492_v19 = vmul.f32 0.0625, %v481_v17 }
  0x9c   : > { %v2832_v20 = vsub.f32 %v454_v0, %v490_v18  ;;  %v2834_v21 = vsub.f32 %v456_v1, %v492_v19 }
  0x9d   : > { %v478_v22 = vpop.xlane.xlu0 %477  ;;  %v484_v23 = vpop.xlane.xlu1 %483 }
  0x9e   : > { %v491_v24 = vmul.f32 0.0625, %v478_v22  ;;  %v493_v25 = vmul.f32 0.0625, %v484_v23  ;;  %v506_v26 = vmul.f32 %v2832_v20, %v2832_v20  ;;  %v508_v27 = vmul.f32 %v2834_v21, %v2834_v21  ;;  %v2299_v23 = vld [vmem:[%s3262_s1] ss:$0 sm:$0xff] }
  0xa0   : > { %v2840_v28 = vsub.f32 %v455_v2, %v491_v24  ;;  %v2842_v29 = vsub.f32 %v457_v5, %v493_v25  ;;  %v522_v30 = vsel %vm460_vm0, %v506_v26, 0.0  ;;  %v528_v33 = vsel %vm460_vm0, %v508_v27, 0.0 }
  0xa1   : > { %523 = vadd.xlane.f32.xlu0 %v522_v30  ;;  %v463_v31 = vpop.xlane.xlu0 %462  ;;  %v466_v32 = vpop.xlane.xlu1 %465 }
  0xa2   : > { %v486_v34 = vmul.f32 0.0625, %v463_v31  ;;  %v507_v35 = vmul.f32 %v2840_v28, %v2840_v28  ;;  %v487_v36 = vmul.f32 0.0625, %v466_v32  ;;  %v509_v37 = vmul.f32 %v2842_v29, %v2842_v29  ;;  %v2300_v31 = vld [vmem:[%s3263_s2] ss:$0 sm:$0xff] }
  0xa4   : > { %v2850_v38 = vsub.f32 %v450_v8, %v486_v34  ;;  %v525_v39 = vsel %vm460_vm0, %v507_v35, 0.0  ;;  %v2853_v40 = vsub.f32 %v451_v9, %v487_v36  ;;  %v531_v42 = vsel %vm460_vm0, %v509_v37, 0.0 }
  0xa5   : > { %526 = vadd.xlane.f32.xlu1 %v525_v39  ;;  %529 = vadd.xlane.f32.xlu0 %v528_v33  ;;  %v469_v41 = vpop.xlane.xlu0 %468  ;;  %v472_v43 = vpop.xlane.xlu1 %471 }
  0xa6   : > { %v488_v44 = vmul.f32 0.0625, %v469_v41  ;;  %v489_v45 = vmul.f32 0.0625, %v472_v43  ;;  %v502_v46 = vmul.f32 %v2850_v38, %v2850_v38  ;;  %v503_v47 = vmul.f32 %v2853_v40, %v2853_v40 }
  0xa8   : > { %v2860_v48 = vsub.f32 %v452_v12, %v488_v44  ;;  %v2862_v49 = vsub.f32 %v453_v13, %v489_v45  ;;  %v510_v50 = vsel %vm460_vm0, %v502_v46, 0.0  ;;  %v513_v51 = vsel %vm460_vm0, %v503_v47, 0.0 }
  0xa9   : > { %532 = vadd.xlane.f32.xlu1 %v531_v42  ;;  %511 = vadd.xlane.f32.xlu0 %v510_v50 }
  0xaa   : > { %v504_v52 = vmul.f32 %v2860_v48, %v2860_v48  ;;  %v505_v53 = vmul.f32 %v2862_v49, %v2862_v49 }
  0xac   : > { %v516_v54 = vsel %vm460_vm0, %v504_v52, 0.0  ;;  %v519_v55 = vsel %vm460_vm0, %v505_v53, 0.0 }
  0xad   : > { %514 = vadd.xlane.f32.xlu1 %v513_v51  ;;  %517 = vadd.xlane.f32.xlu0 %v516_v54 }
  0xb1   : > { %520 = vadd.xlane.f32.xlu1 %v519_v55 }
 0x12a   : > { %v524_v59 = vpop.xlane.xlu0 %523 }
 0x12b   : > { %v538_v60 = vmul.f32 0.0625, %v524_v59 }
 0x12d   : > { %v546_v61 = vadd.f32 1e-05, %v538_v60 }
 0x12e   : > { %v527_v62 = vpop.xlane.xlu1 %526  ;;  %v530_v63 = vpop.xlane.xlu0 %529 }
 0x12f   : > { %2647 = vrsqrt.f32 %v546_v61  ;;  %v539_v0 = vmul.f32 0.0625, %v527_v62  ;;  %v540_v1 = vmul.f32 0.0625, %v530_v63 }
 0x131   : > { %v547_v2 = vadd.f32 1e-05, %v539_v0  ;;  %v548_v3 = vadd.f32 1e-05, %v540_v1 }
 0x132   : > { %v533_v4 = vpop.xlane.xlu1 %532  ;;  %v512_v5 = vpop.xlane.xlu0 %511 }
 0x133   : > { %2649 = vrsqrt.f32 %v547_v2  ;;  %v541_v6 = vmul.f32 0.0625, %v533_v4  ;;  %v534_v7 = vmul.f32 0.0625, %v512_v5  ;;  %v2307_v4 = vld [vmem:[%s3268_s7] ss:$0 sm:$0xff] }
 0x134   : > { %2651 = vrsqrt.f32 %v548_v3 }
 0x135   : > { %v549_v8 = vadd.f32 1e-05, %v541_v6  ;;  %v542_v9 = vadd.f32 1e-05, %v534_v7 }
 0x136   : > { %v515_v10 = vpop.xlane.xlu1 %514  ;;  %v518_v11 = vpop.xlane.xlu0 %517 }
 0x137   : > { %2653 = vrsqrt.f32 %v549_v8  ;;  %v535_v12 = vmul.f32 0.0625, %v515_v10  ;;  %v536_v13 = vmul.f32 0.0625, %v518_v11 }
 0x138   : > { %2655 = vrsqrt.f32 %v542_v9  ;;  %v2301_v9 = vld [vmem:[%s3267_s6] ss:$0 sm:$0xff] }
 0x139   : > { %v543_v14 = vadd.f32 1e-05, %v535_v12  ;;  %v544_v15 = vadd.f32 1e-05, %v536_v13 }
 0x13a   : > { %v521_v16 = vpop.xlane.xlu1 %520 }
 0x13b   : > { %2657 = vrsqrt.f32 %v543_v14  ;;  %v537_v17 = vmul.f32 0.0625, %v521_v16 }
 0x13c   : > { %v2648_v18 = vpop.eup %2647  ;;  %2659 = vrsqrt.f32 %v544_v15 }
 0x13d   : > { %v562_v19 = vmul.f32 %v2648_v18, %v2832_v20  ;;  %v545_v22 = vadd.f32 1e-05, %v537_v17 }
 0x13f   : > { %2661 = vrsqrt.f32 %v545_v22  ;;  %v576_v26 = vmul.f32 %v2299_v23, %v562_v19 }
 0x140   : > { %v2650_v24 = vpop.eup %2649 }
 0x141   : > { %v2652_v25 = vpop.eup %2651  ;;  %v563_v27 = vmul.f32 %v2650_v24, %v2840_v28  ;;  %v590_v36 = vadd.f32 %v2300_v31, %v576_v26 }
 0x142   : > { %v564_v30 = vmul.f32 %v2652_v25, %v2834_v21 }
 0x143   : > { %v577_v32 = vmul.f32 %v2299_v23, %v563_v27 }
 0x144   : > { %v2654_v33 = vpop.eup %2653  ;;  %v578_v34 = vmul.f32 %v2299_v23, %v564_v30 }
 0x145   : > { %v2656_v20 = vpop.eup %2655  ;;  %v565_v35 = vmul.f32 %v2654_v33, %v2842_v29  ;;  %v591_v37 = vadd.f32 %v2300_v31, %v577_v32 }
 0x146   : > { %v558_v39 = vmul.f32 %v2656_v20, %v2850_v38  ;;  %v592_v45 = vadd.f32 %v2300_v31, %v578_v34  ;;  %v2313_v20 = vld [vmem:[%s3269_s8] ss:$0 sm:$0xff] }
 0x147   : > { %v579_v41 = vmul.f32 %v2299_v23, %v565_v35  ;;  %v2898_v42 = vpack.c.bf16 %v591_v37, %v590_v36 }
 0x148   : > { %v2658_v28 = vpop.eup %2657  ;;  %v572_v21 = vmul.f32 %v2299_v23, %v558_v39 }
 0x149   : > { %v2660_v43 = vpop.eup %2659  ;;  %v559_v44 = vmul.f32 %v2658_v28, %v2853_v40  ;;  %2447 = vmatprep.mubr.msk.bf16.mxu1 %vm460_vm0, %v2898_v42  ;;  %v593_v46 = vadd.f32 %v2300_v31, %v579_v41 }
 0x14a   : > { %v560_v47 = vmul.f32 %v2660_v43, %v2860_v48  ;;  %v586_v53 = vadd.f32 %v2300_v31, %v572_v21 }
 0x14b   : > { %v573_v29 = vmul.f32 %v2299_v23, %v559_v44  ;;  %v2904_v50 = vpack.c.bf16 %v593_v46, %v592_v45 }
 0x14c   : > { %v2662_v51 = vpop.eup %2661  ;;  %v574_v38 = vmul.f32 %v2299_v23, %v560_v47 }
 0x14d   : > { %v561_v52 = vmul.f32 %v2662_v51, %v2862_v49  ;;  %2448 = vmatmul.mubr.msk.bf16.vlgmr.msra.gmra.mxu1 %vm460_vm0, %v2904_v50  ;;  %v587_v54 = vadd.f32 %v2300_v31, %v573_v29  ;;  %v2735_v49 = vmov 0.0  }
 0x14e   : > { %2452 = vmatpush3.bf16.msra.mxu1 %v2878_v57  ;;  %v588_v48 = vadd.f32 %v2300_v31, %v574_v38 }
 0x14f   : > { %v575_v40 = vmul.f32 %v2299_v23, %v561_v52  ;;  %v2910_v55 = vpack.c.bf16 %v587_v54, %v586_v53  ;;  %2471 = vmatprep.subr.bf16.mxu1 %v2735_v49 }
 0x151   : > { %2443 = vmatprep.mubr.msk.bf16.mxu0 %vm460_vm0, %v2910_v55  ;;  %2453 = vmatprep.mubr.msk.bf16.mxu1 %vm460_vm0, %v2910_v55  ;;  %v589_v56 = vadd.f32 %v2300_v31, %v575_v40 }
 0x153   : > { %v2916_v59 = vpack.c.bf16 %v589_v56, %v588_v48 }
 0x155   : > { %2444 = vmatmul.mubr.msk.bf16.vlgmr.msra.gmra.mxu0 %vm460_vm0, %v2916_v59  ;;  %2454 = vmatmul.mubr.msk.bf16.vlgmr.msra.gmra.mxu1 %vm460_vm0, %v2916_v59 }
 0x156   : > { %2457 = vmatprep.mubr.msk.bf16.mxu1 %vm460_vm0, %v2898_v42  ;;  %2463 = vmatprep.mubr.msk.bf16.mxu0 %vm460_vm0, %v2910_v55 }
 0x157   : > { %2462 = vmatpush3.bf16.msra.mxu0 %v2884_v58 }
 0x158   : > { %2483 = vmatprep.subr.bf16.mxu0 %v2735_v49 }
 0x15d   : > { %2458 = vmatmul.mubr.msk.bf16.gmra.mxu1 %vm460_vm0, %v2904_v50  ;;  %2464 = vmatmul.mubr.msk.bf16.vlgmr.msra.gmra.mxu0 %vm460_vm0, %v2916_v59 }
 0x15e   : > { %2467 = vmatprep.mubr.msk.bf16.mxu0 %vm460_vm0, %v2898_v42  ;;  %2473 = vmatprep.mubr.msk.bf16.mxu1 %vm2736_vm1, %v2735_v49 }
 0x165   : > { %2468 = vmatmul.mubr.msk.bf16.gmra.mxu0 %vm460_vm0, %v2904_v50 }
 0x166   : > { %2485 = vmatprep.mubr.msk.bf16.mxu0 %vm2736_vm1, %v2735_v49 }
 0x20d   : > { %v2941_v57 = vpop.f32.mrf.mxu1 }
 0x20f   : > { %v675_v58 = vpop.f32.mrf.mxu1 }
 0x210   : > { %v676_v41 = vadd.f32 %v2301_v9, %v675_v58 }
 0x211   : > { %v2943_v60 = vpop.f32.mrf.mxu1 }
 0x212   : > { %v854_v53 = vmul.f32 0.35355338, %v676_v41 }
 0x213   : > { %v678_v61 = vpop.f32.mrf.mxu1 }
 0x214   : > { %v679_v33 = vadd.f32 %v2301_v9, %v678_v61 }
 0x215   : > { %v2445_v62 = vpop.f32.mrf.mxu0  ;;  %v2455_v63 = vpop.f32.mrf.mxu1 }
 0x216   : > { %v748_v23 = vadd.f32 %v2455_v63, %v2307_v4  ;;  %v668_v28 = vadd.f32 %v2445_v62, %v2301_v9  ;;  %v855_v29 = vmul.f32 0.35355338, %v679_v33  ;;  %v687_v63 = vadd.f32 %v2943_v60, %v2301_v9 }
 0x217   : > { %v659_v0 = vpop.f32.mrf.mxu0  ;;  %v739_v1 = vpop.f32.mrf.mxu1 }
 0x218   : > { %v740_v7 = vadd.f32 %v2307_v4, %v739_v1  ;;  %v660_v16 = vadd.f32 %v2301_v9, %v659_v0  ;;  %v852_v48 = vmul.f32 0.35355338, %v668_v28  ;;  %v860_v0 = vpack.c.bf16 %v855_v29, %v854_v53 }
 0x219   : > { %v2446_v2 = vpop.f32.mrf.mxu0  ;;  %v2456_v3 = vpop.f32.mrf.mxu1 }
 0x21a   : > { %v751_v17 = vadd.f32 %v2456_v3, %v2307_v4  ;;  %v850_v27 = vmul.f32 0.35355338, %v660_v16  ;;  %v671_v35 = vadd.f32 %v2446_v2, %v2301_v9 }
 0x21b   : > { %v662_v5 = vpop.f32.mrf.mxu0  ;;  %v742_v6 = vpop.f32.mrf.mxu1 }
 0x21c   : > { %v743_v8 = vadd.f32 %v2307_v4, %v742_v6  ;;  %v663_v12 = vadd.f32 %v2301_v9, %v662_v5  ;;  %v863_v30 = vpack.c.bf16 %v751_v17, %v748_v23  ;;  %v853_v51 = vmul.f32 0.35355338, %v671_v35  ;;  %v2999_v17 = vld [vmem:[%s3271_s10 + $0x10] sm:$0xff]  ;;  %v3020_v35 = vld [vmem:[%s3271_s10 + $0x8] sm:$0xff] }
 0x21d   : > { %v2459_v10 = vpop.f32.mrf.mxu1  ;;  %v2951_v11 = vpop.f32.mrf.mxu0  ;;  %v857_v6 = vmul.f32 0.35355338, %v687_v63 }
 0x21e   : > { %v862_v13 = vpack.c.bf16 %v743_v8, %v740_v7  ;;  %v851_v24 = vmul.f32 0.35355338, %v663_v12  ;;  %v924_v45 = vsel %vm872_vm2, %v863_v30, 0  ;;  %v764_v38 = vadd.f32 %v2459_v10, %v2307_v4 }
 0x21f   : > { %v755_v14 = vpop.f32.mrf.mxu1  ;;  %v819_v15 = vpop.f32.mrf.mxu0  ;;  %v859_v1 = vpack.c.bf16 %v853_v51, %v852_v48  ;;  %v828_v7 = vadd.f32 %v2951_v11, %v2313_v20  ;;  %v3041_v48 = vld [vmem:[%s3271_s10 + $0x38] sm:$0xff] }
 0x220   : > { %v877_v18 = vsel %vm872_vm2, %v862_v13, 0  ;;  %v756_v31 = vadd.f32 %v2307_v4, %v755_v14  ;;  %v858_v36 = vpack.c.bf16 %v851_v24, %v850_v27  ;;  %v820_v62 = vadd.f32 %v2313_v20, %v819_v15  ;;  %v870_v14 = vld [vmem:[%s3270_s9] sm:$0xff] }
 0x221   : > { %v2460_v19 = vpop.f32.mrf.mxu1  ;;  %v2466_v22 = vpop.f32.mrf.mxu0  ;;  %2472 = vmatpush3.bf16.xpose.msra.mxu1 %v877_v18 }
 0x222   : > { %2477 = vmatprep.subr.bf16.mxu1 %v2735_v49  ;;  %v767_v21 = vadd.f32 %v2460_v19, %v2307_v4  ;;  %v831_v60 = vadd.f32 %v2466_v22, %v2313_v20  ;;  %v871_v19 = vld [vmem:[%s3270_s9 + $0x8] sm:$0xff] }
 0x223   : > { %v758_v25 = vpop.f32.mrf.mxu1  ;;  %v822_v26 = vpop.f32.mrf.mxu0 }
 0x224   : > { %v759_v32 = vadd.f32 %v2307_v4, %v758_v25  ;;  %v823_v54 = vadd.f32 %v2313_v20, %v822_v26  ;;  %v865_v56 = vpack.c.bf16 %v767_v21, %v764_v38  ;;  %v684_v4 = vadd.f32 %v2941_v57, %v2301_v9  ;;  %v3007_v25 = vld [vmem:[%s3271_s10] sm:$0xff]  ;;  %v3027_v21 = vld [vmem:[%s3271_s10 + $0x30] sm:$0xff] }
 0x225   : > { %v2469_v34 = vpop.f32.mrf.mxu0  ;;  %v867_v9 = vpack.c.bf16 %v831_v60, %v828_v7  ;;  %v3034_v38 = vld [vmem:[%s3271_s10 + $0x20] sm:$0xff] }
 0x226   : > { %v864_v37 = vpack.c.bf16 %v759_v32, %v756_v31  ;;  %v2958_v39 = vadd.f32 %v2469_v34, %v2313_v20  ;;  %v866_v3 = vpack.c.bf16 %v823_v54, %v820_v62  ;;  %v1018_v5 = vsel %vm872_vm2, %v865_v56, 0  ;;  %v3013_v32 = vld [vmem:[%s3271_s10 + $0x18] sm:$0xff] }
 0x227   : > { %v835_v43 = vpop.f32.mrf.mxu0  ;;  %v856_v57 = vmul.f32 0.35355338, %v684_v4 }
 0x228   : > { %v2960_v44 = vadd.f32 %v2313_v20, %v835_v43  ;;  %2474 = vmatmul.mubr.msk.bf16.vlgmr.msra.gmra.mxu1 %vm872_vm2, %v858_v36  ;;  %v971_v46 = vsel %vm872_vm2, %v864_v37, 0 }
 0x229   : > { %v2470_v47 = vpop.f32.mrf.mxu0  ;;  %2478 = vmatpush3.bf16.xpose.msra.mxu1 %v924_v45  ;;  %2484 = vmatpush3.bf16.xpose.msra.mxu0 %v971_v46  ;;  %v861_v8 = vpack.c.bf16 %v857_v6, %v856_v57 }
 0x22a   : > { %v2965_v52 = vadd.f32 %v2470_v47, %v2313_v20  ;;  %2479 = vmatprep.mubr.msk.bf16.mxu1 %vm2736_vm1, %v2735_v49  ;;  %2489 = vmatprep.subr.bf16.mxu1 %v2735_v49 }
 0x22b   : > { %v838_v40 = vpop.f32.mrf.mxu0  ;;  %2495 = vmatprep.subr.bf16.mxu0 %v2735_v49 }
 0x22c   : > { %v869_v58 = vpack.c.bf16 %v2965_v52, %v2958_v39  ;;  %v2973_v61 = vadd.f32 %v2313_v20, %v838_v40 }
 0x22e   : > { %v868_v2 = vpack.c.bf16 %v2973_v61, %v2960_v44  ;;  %v2645_v44 = vld [vmem:[%s3266_s5 + $0x8] sm:$0xff]  }
 0x230   : > { %2480 = vmatmul.mubr.msk.bf16.vlgmr.msra.gmra.mxu1 %vm872_vm2, %v859_v1  ;;  %2486 = vmatmul.mubr.msk.bf16.vlgmr.msra.gmra.mxu0 %vm872_vm2, %v860_v0 }
 0x231   : > { %2490 = vmatpush3.bf16.xpose.msra.mxu1 %v1018_v5  ;;  %2496 = vmatpush3.bf16.msra.mxu0 %v866_v3  ;;  %v3048_v3 = vld [vmem:[%s3271_s10 + $0x28] sm:$0xff] }
 0x232   : > { %2491 = vmatprep.mubr.msk.bf16.mxu1 %vm2736_vm1, %v2735_v49  ;;  %2501 = vmatprep.subr.bf16.mxu1 %v2735_v49 }
 0x233   : > { %2497 = vmatprep.mubr.msk.bf16.mxu0 %vm2736_vm1, %v2735_v49  ;;  %2507 = vmatprep.subr.bf16.mxu0 %v2735_v49 }
 0x238   : > { %2492 = vmatmul.mubr.msk.bf16.vlgmr.msra.gmra.mxu1 %vm872_vm2, %v861_v8 }
 0x239   : > { %2502 = vmatpush3.bf16.msra.mxu1 %v867_v9  ;;  %2503 = vmatprep.mubr.msk.bf16.mxu1 %vm2736_vm1, %v2735_v49 }
 0x23a   : > { %2513 = vmatprep.subr.bf16.mxu1 %v2735_v49 }
 0x2e8   : > { %v913_v10 = vpop.f32.mrf.mxu1 }
 0x2e9   : > { %v914_v18 = vadd.f32 %v913_v10, %v870_v14 }
 0x2ea   : > { %v2475_v12 = vpop.f32.mrf.mxu1 }
 0x2eb   : > { %v1069_v34 = vadd.f32 %v3007_v25, %v914_v18 }
 0x2ec   : > { %v916_v13 = vpop.f32.mrf.mxu1 }
 0x2ed   : > { %v917_v27 = vadd.f32 %v916_v13, %v871_v19  ;;  %v1077_v47 = vsel %vm460_vm0, %v1069_v34, -inf }
 0x2ee   : > { %v2476_v15 = vpop.f32.mrf.mxu1 }
 0x2ef   : > { %v1070_v43 = vadd.f32 %v3020_v35, %v917_v27 }
 0x2f0   : > { %v960_v16 = vpop.f32.mrf.mxu1  ;;  %v1007_v11 = vpop.f32.mrf.mxu0 }
 0x2f1   : > { %v961_v22 = vadd.f32 %v960_v16, %v870_v14  ;;  %v1008_v45 = vadd.f32 %v1007_v11, %v870_v14  ;;  %v1080_v40 = vsel %vm460_vm0, %v1070_v43, -inf }
 0x2f2   : > { %v2481_v23 = vpop.f32.mrf.mxu1  ;;  %v2487_v24 = vpop.f32.mrf.mxu0 }
 0x2f3   : > { %v1071_v26 = vadd.f32 %v2999_v17, %v961_v22  ;;  %v1073_v0 = vadd.f32 %v3034_v38, %v1008_v45 }
 0x2f4   : > { %v963_v30 = vpop.f32.mrf.mxu1  ;;  %v1010_v31 = vpop.f32.mrf.mxu0 }
 0x2f5   : > { %v964_v33 = vadd.f32 %v963_v30, %v871_v19  ;;  %v1083_v20 = vsel %vm460_vm0, %v1071_v26, -inf  ;;  %v1011_v56 = vadd.f32 %v1010_v31, %v871_v19  ;;  %v1089_v5 = vsel %vm460_vm0, %v1073_v0, -inf }
 0x2f6   : > { %v2488_v36 = vpop.f32.mrf.mxu0  ;;  %1084 = vmax.xlane.f32.xlu0 %v1083_v20  ;;  %v2482_v37 = vpop.f32.mrf.mxu1 }
 0x2f7   : > { %v1072_v41 = vadd.f32 %v3013_v32, %v964_v33  ;;  %v1074_v60 = vadd.f32 %v3048_v3, %v1011_v56 }
 0x2f8   : > { %v1054_v28 = vpop.f32.mrf.mxu1 }
 0x2f9   : > { %v1055_v46 = vadd.f32 %v1054_v28, %v870_v14  ;;  %v1086_v29 = vsel %vm460_vm0, %v1072_v41, -inf  ;;  %v1092_v57 = vsel %vm460_vm0, %v1074_v60, -inf }
 0x2fa   : > { %1078 = vmax.xlane.f32.xlu0 %v1077_v47  ;;  %1087 = vmax.xlane.f32.xlu1 %v1086_v29  ;;  %v2493_v51 = vpop.f32.mrf.mxu1 }
 0x2fb   : > { %v1075_v53 = vadd.f32 %v3027_v21, %v1055_v46 }
 0x2fc   : > { %v1057_v54 = vpop.f32.mrf.mxu1 }
 0x2fd   : > { %v1058_v62 = vadd.f32 %v1057_v54, %v871_v19  ;;  %v1095_v63 = vsel %vm460_vm0, %v1075_v53, -inf }
 0x2fe   : > { %1081 = vmax.xlane.f32.xlu1 %v1080_v40  ;;  %1096 = vmax.xlane.f32.xlu0 %v1095_v63  ;;  %v2494_v1 = vpop.f32.mrf.mxu1 }
 0x2ff   : > { %v1076_v4 = vadd.f32 %v3041_v48, %v1058_v62 }
 0x301   : > { %v1098_v6 = vsel %vm460_vm0, %v1076_v4, -inf }
 0x302   : > { %1090 = vmax.xlane.f32.xlu0 %v1089_v5  ;;  %1099 = vmax.xlane.f32.xlu1 %v1098_v6 }
 0x306   : > { %1093 = vmax.xlane.f32.xlu1 %v1092_v57 }
 0x37f   : > { %v1085_v7 = vpop.xlane.xlu0 %1084 }
 0x380   : > { %v1103_v8 = vsub.f32 %v1071_v26, %v1085_v7 }
 0x382   : > { %v1113_v9 = vmul.f32 1.442695, %v1103_v8 }
 0x383   : > { %v1079_v10 = vpop.xlane.xlu0 %1078  ;;  %v1088_v12 = vpop.xlane.xlu1 %1087 }
 0x384   : > { %2663 = vpow2.f32 %v1113_v9  ;;  %v1101_v13 = vsub.f32 %v1069_v34, %v1079_v10  ;;  %v1104_v14 = vsub.f32 %v1072_v41, %v1088_v12 }
 0x386   : > { %v1109_v15 = vmul.f32 1.442695, %v1101_v13  ;;  %v1115_v16 = vmul.f32 1.442695, %v1104_v14 }
 0x387   : > { %v1082_v11 = vpop.xlane.xlu1 %1081  ;;  %v1097_v18 = vpop.xlane.xlu0 %1096 }
 0x388   : > { %2665 = vpow2.f32 %v1109_v15  ;;  %v1102_v19 = vsub.f32 %v1070_v43, %v1082_v11  ;;  %v1107_v22 = vsub.f32 %v1075_v53, %v1097_v18  ;;  %v2643_v11 = vld [vmem:[%s3265_s4 + $0x8] sm:$0xff]  }
 0x389   : > { %2667 = vpow2.f32 %v1115_v16 }
 0x38a   : > { %v1111_v23 = vmul.f32 1.442695, %v1102_v19  ;;  %v1121_v24 = vmul.f32 1.442695, %v1107_v22 }
 0x38b   : > { %v1091_v27 = vpop.xlane.xlu0 %1090  ;;  %v1100_v30 = vpop.xlane.xlu1 %1099 }
 0x38c   : > { %2669 = vpow2.f32 %v1111_v23  ;;  %v1105_v26 = vsub.f32 %v1073_v0, %v1091_v27  ;;  %v1108_v31 = vsub.f32 %v1076_v4, %v1100_v30  ;;  %v2644_v27 = vld [vmem:[%s3264_s3 + $0x8] sm:$0xff]  }
 0x38d   : > { %2671 = vpow2.f32 %v1121_v24 }
 0x38e   : > { %v1117_v33 = vmul.f32 1.442695, %v1105_v26  ;;  %v1123_v20 = vmul.f32 1.442695, %v1108_v31 }
 0x38f   : > { %v1094_v34 = vpop.xlane.xlu1 %1093 }
 0x390   : > { %2673 = vpow2.f32 %v1117_v33  ;;  %v1106_v36 = vsub.f32 %v1074_v60, %v1094_v34 }
 0x391   : > { %v2664_v37 = vpop.eup %2663  ;;  %2675 = vpow2.f32 %v1123_v20 }
 0x392   : > { %v1119_v41 = vmul.f32 1.442695, %v1106_v36  ;;  %v1131_v28 = vsel %vm460_vm0, %v2664_v37, 0.0 }
 0x393   : > { %1132 = vadd.xlane.f32.xlu0 %v1131_v28 }
 0x394   : > { %2677 = vpow2.f32 %v1119_v41 }
 0x395   : > { %v2666_v43 = vpop.eup %2665 }
 0x396   : > { %v2668_v45 = vpop.eup %2667  ;;  %v1125_v46 = vsel %vm460_vm0, %v2666_v43, 0.0 }
 0x397   : > { %1126 = vadd.xlane.f32.xlu0 %v1125_v46  ;;  %v1134_v47 = vsel %vm460_vm0, %v2668_v45, 0.0 }
 0x398   : > { %1135 = vadd.xlane.f32.xlu1 %v1134_v47 }
 0x399   : > { %v2670_v29 = vpop.eup %2669 }
 0x39a   : > { %v2672_v51 = vpop.eup %2671  ;;  %v1128_v53 = vsel %vm460_vm0, %v2670_v29, 0.0 }
 0x39b   : > { %v1143_v54 = vsel %vm460_vm0, %v2672_v51, 0.0 }
 0x39c   : > { %1144 = vadd.xlane.f32.xlu0 %v1143_v54  ;;  %1129 = vadd.xlane.f32.xlu1 %v1128_v53 }
 0x39d   : > { %v2674_v40 = vpop.eup %2673 }
 0x39e   : > { %v2676_v56 = vpop.eup %2675  ;;  %v1137_v62 = vsel %vm460_vm0, %v2674_v40, 0.0 }
 0x39f   : > { %v1146_v63 = vsel %vm460_vm0, %v2676_v56, 0.0 }
 0x3a0   : > { %1138 = vadd.xlane.f32.xlu0 %v1137_v62  ;;  %1147 = vadd.xlane.f32.xlu1 %v1146_v63  ;;  %v2339_v62 = vld [vmem:[%s3268_s7 + $0x1] ss:$0 sm:$0xff] }
 0x3a1   : > { %v2678_v0 = vpop.eup %2677 }
 0x3a2   : > { %v1140_v1 = vsel %vm460_vm0, %v2678_v0, 0.0 }
 0x3a4   : > { %1141 = vadd.xlane.f32.xlu1 %v1140_v1 }
 0x41c   : > { %v1133_v4 = vpop.xlane.xlu0 %1132 }
 0x41d   : > { %2679 = vrcp.f32 %v1133_v4 }
 0x420   : > { %v1127_v5 = vpop.xlane.xlu0 %1126 }
 0x421   : > { %v1136_v6 = vpop.xlane.xlu1 %1135 }
 0x422   : > { %2681 = vrcp.f32 %v1136_v6 }
 0x423   : > { %2683 = vrcp.f32 %v1127_v5 }
 0x425   : > { %v1145_v60 = vpop.xlane.xlu0 %1144  ;;  %v1130_v57 = vpop.xlane.xlu1 %1129 }
 0x426   : > { %2685 = vrcp.f32 %v1130_v57  ;;  %v2330_v57 = vld [vmem:[%s3267_s6 + $0x1] ss:$0 sm:$0xff] }
 0x427   : > { %2687 = vrcp.f32 %v1145_v60 }
 0x429   : > { %v1139_v7 = vpop.xlane.xlu0 %1138  ;;  %v1148_v8 = vpop.xlane.xlu1 %1147 }
 0x42a   : > { %2689 = vrcp.f32 %v1148_v8  ;;  %v2680_v9 = vpop.eup %2679 }
 0x42b   : > { %2691 = vrcp.f32 %v1139_v7  ;;  %v1159_v13 = vmul.f32 %v2680_v9, %v2664_v37 }
 0x42d   : > { %v1142_v10 = vpop.xlane.xlu1 %1141 }
 0x42e   : > { %2693 = vrcp.f32 %v1142_v10 }
 0x42f   : > { %v2682_v12 = vpop.eup %2681 }
 0x430   : > { %v1160_v14 = vmul.f32 %v2682_v12, %v2668_v45  ;;  %v2684_v15 = vpop.eup %2683 }
 0x431   : > { %v1157_v19 = vmul.f32 %v2684_v15, %v2666_v43 }
 0x432   : > { %v1166_v16 = vpack.c.bf16 %v1160_v14, %v1159_v13 }
 0x433   : > { %v2686_v18 = vpop.eup %2685 }
 0x434   : > { %2504 = vmatmul.mubr.msk.bf16.vlgmr.msra.gmra.mxu1 %vm460_vm0, %v1166_v16  ;;  %v1158_v22 = vmul.f32 %v2686_v18, %v2670_v29  ;;  %v2688_v23 = vpop.eup %2687 }
 0x435   : > { %2514 = vmatpush3.bf16.msra.mxu1 %v869_v58  ;;  %2515 = vmatprep.mubr.msk.bf16.mxu1 %vm2736_vm1, %v2735_v49  ;;  %v1163_v31 = vmul.f32 %v2688_v23, %v2672_v51 }
 0x436   : > { %2529 = vmatprep.subr.bf16.mxu1 %v2643_v11  ;;  %v1165_v24 = vpack.c.bf16 %v1158_v22, %v1157_v19 }
 0x437   : > { %v2690_v30 = vpop.eup %2689 }
 0x438   : > { %v2692_v26 = vpop.eup %2691  ;;  %2498 = vmatmul.mubr.msk.bf16.vlgmr.msra.gmra.mxu0 %vm460_vm0, %v1165_v24  ;;  %v1164_v33 = vmul.f32 %v2690_v30, %v2676_v56 }
 0x439   : > { %2508 = vmatpush3.bf16.msra.mxu0 %v868_v2  ;;  %2509 = vmatprep.mubr.msk.bf16.mxu0 %vm2736_vm1, %v2735_v49  ;;  %v1161_v58 = vmul.f32 %v2692_v26, %v2674_v40 }
 0x43a   : > { %v1168_v52 = vpack.c.bf16 %v1164_v33, %v1163_v31  ;;  %2519 = vmatprep.subr.bf16.mxu0 %v2644_v27 }
 0x43b   : > { %v2694_v39 = vpop.eup %2693 }
 0x43c   : > { %v1162_v20 = vmul.f32 %v2694_v39, %v2678_v0  ;;  %2516 = vmatmul.mubr.msk.bf16.vlgmr.msra.gmra.mxu1 %vm460_vm0, %v1168_v52 }
 0x43d   : > { %2531 = vmatprep.mubr.msk.bf16.mxu1 %vm460_vm0, %v2910_v55  ;;  %2530 = vmatpush3.bf16.msra.mxu1 %v2643_v11 }
 0x43e   : > { %v1167_v34 = vpack.c.bf16 %v1162_v20, %v1161_v58  ;;  %2549 = vmatprep.subr.bf16.mxu1 %v2735_v49 }
 0x440   : > { %2510 = vmatmul.mubr.msk.bf16.vlgmr.msra.gmra.mxu0 %vm460_vm0, %v1167_v34 }
 0x441   : > { %2521 = vmatprep.mubr.msk.bf16.mxu0 %vm460_vm0, %v2910_v55  ;;  %2520 = vmatpush3.bf16.msra.mxu0 %v2644_v27 }
 0x442   : > { %2539 = vmatprep.subr.bf16.mxu0 %v2645_v44 }
 0x444   : > { %2532 = vmatmul.mubr.msk.bf16.vlgmr.msra.gmra.mxu1 %vm460_vm0, %v2916_v59 }
 0x445   : > { %2535 = vmatprep.mubr.msk.bf16.mxu1 %vm460_vm0, %v2898_v42 }
 0x448   : > { %2522 = vmatmul.mubr.msk.bf16.vlgmr.msra.gmra.mxu0 %vm460_vm0, %v2916_v59 }
 0x449   : > { %2525 = vmatprep.mubr.msk.bf16.mxu0 %vm460_vm0, %v2898_v42  ;;  %2540 = vmatpush3.bf16.msra.mxu0 %v2645_v44 }
 0x44a   : > { %2561 = vmatprep.subr.bf16.mxu0 %v2735_v49 }
 0x44c   : > { %2536 = vmatmul.mubr.msk.bf16.gmra.mxu1 %vm460_vm0, %v2904_v50 }
 0x44d   : > { %2551 = vmatprep.mubr.msk.bf16.mxu1 %vm2736_vm1, %v2735_v49 }
 0x450   : > { %2526 = vmatmul.mubr.msk.bf16.gmra.mxu0 %vm460_vm0, %v2904_v50 }
 0x451   : > { %2541 = vmatprep.mubr.msk.bf16.mxu0 %vm460_vm0, %v2910_v55 }
 0x458   : > { %2542 = vmatmul.mubr.msk.bf16.vlgmr.msra.gmra.mxu0 %vm460_vm0, %v2916_v59 }
 0x459   : > { %2545 = vmatprep.mubr.msk.bf16.mxu0 %vm460_vm0, %v2898_v42 }
 0x460   : > { %2546 = vmatmul.mubr.msk.bf16.gmra.mxu0 %vm460_vm0, %v2904_v50 }
 0x461   : > { %2563 = vmatprep.mubr.msk.bf16.mxu0 %vm2736_vm1, %v2735_v49 }
 0x4f4   : > { %v3116_v61 = vpop.f32.mrf.mxu1 }
 0x4f6   : > { %v2505_v2 = vpop.f32.mrf.mxu1 }
 0x4f8   : > { %v3118_v36 = vpop.f32.mrf.mxu1  ;;  %v3120_v37 = vpop.f32.mrf.mxu0 }
 0x4fa   : > { %v2506_v55 = vpop.f32.mrf.mxu1  ;;  %v2499_v41 = vpop.f32.mrf.mxu0 }
 0x4fc   : > { %v3122_v28 = vpop.f32.mrf.mxu0  ;;  %v3124_v59 = vpop.f32.mrf.mxu1 }
 0x4fe   : > { %v2500_v42 = vpop.f32.mrf.mxu0  ;;  %v2517_v43 = vpop.f32.mrf.mxu1 }
 0x500   : > { %v3126_v45 = vpop.f32.mrf.mxu0  ;;  %v3128_v50 = vpop.f32.mrf.mxu1 }
 0x502   : > { %v2511_v46 = vpop.f32.mrf.mxu0  ;;  %v2518_v47 = vpop.f32.mrf.mxu1 }
 0x504   : > { %v3130_v29 = vpop.f32.mrf.mxu0  ;;  %v2533_v51 = vpop.f32.mrf.mxu1 }
 0x505   : > { %v1487_v16 = vadd.f32 %v2533_v51, %v2339_v62 }
 0x506   : > { %v2512_v53 = vpop.f32.mrf.mxu0  ;;  %v1478_v54 = vpop.f32.mrf.mxu1 }
 0x507   : > { %v1479_v1 = vadd.f32 %v2339_v62, %v1478_v54 }
 0x508   : > { %v2523_v40 = vpop.f32.mrf.mxu0  ;;  %v2534_v56 = vpop.f32.mrf.mxu1 }
 0x509   : > { %v1490_v9 = vadd.f32 %v2534_v56, %v2339_v62  ;;  %v1405_v52 = vadd.f32 %v2523_v40, %v2330_v57 }
 0x50a   : > { %v1396_v63 = vpop.f32.mrf.mxu0  ;;  %v1481_v0 = vpop.f32.mrf.mxu1 }
 0x50b   : > { %v1482_v4 = vadd.f32 %v2339_v62, %v1481_v0  ;;  %v1397_v10 = vadd.f32 %v2330_v57, %v1396_v63  ;;  %v1604_v22 = vpack.c.bf16 %v1490_v9, %v1487_v16  ;;  %v1593_v47 = vmul.f32 0.35355338, %v1405_v52  ;;  %v2348_v0 = vld [vmem:[%s3269_s8 + $0x1] ss:$0 sm:$0xff] }
 0x50c   : > { %v2524_v5 = vpop.f32.mrf.mxu0  ;;  %v2537_v6 = vpop.f32.mrf.mxu1 }
 0x50d   : > { %v1603_v60 = vpack.c.bf16 %v1482_v4, %v1479_v1  ;;  %v1591_v23 = vmul.f32 0.35355338, %v1397_v10  ;;  %v1408_v26 = vadd.f32 %v2524_v5, %v2330_v57  ;;  %v1665_v34 = vsel %vm872_vm2, %v1604_v22, 0 }
 0x50e   : > { %v1399_v7 = vpop.f32.mrf.mxu0  ;;  %v1494_v8 = vpop.f32.mrf.mxu1  ;;  %v1503_v42 = vadd.f32 %v2537_v6, %v2339_v62 }
 0x50f   : > { %v1400_v12 = vadd.f32 %v2330_v57, %v1399_v7  ;;  %v1618_v13 = vsel %vm872_vm2, %v1603_v60, 0  ;;  %v1495_v24 = vadd.f32 %v2339_v62, %v1494_v8  ;;  %v1594_v41 = vmul.f32 0.35355338, %v1408_v26 }
 0x510   : > { %v2527_v14 = vpop.f32.mrf.mxu0  ;;  %v2538_v15 = vpop.f32.mrf.mxu1  ;;  %2550 = vmatpush3.bf16.xpose.msra.mxu1 %v1618_v13 }
 0x511   : > { %v1592_v11 = vmul.f32 0.35355338, %v1400_v12  ;;  %2555 = vmatprep.subr.bf16.mxu1 %v2735_v49  ;;  %v1506_v58 = vadd.f32 %v2538_v15, %v2339_v62  ;;  %v1600_v40 = vpack.c.bf16 %v1594_v41, %v1593_v47 }
 0x512   : > { %v1412_v18 = vpop.f32.mrf.mxu0  ;;  %v1497_v19 = vpop.f32.mrf.mxu1 }
 0x513   : > { %v1498_v27 = vadd.f32 %v2339_v62, %v1497_v19  ;;  %v1599_v31 = vpack.c.bf16 %v1592_v11, %v1591_v23  ;;  %v1413_v44 = vadd.f32 %v2330_v57, %v1412_v18  ;;  %v1606_v51 = vpack.c.bf16 %v1506_v58, %v1503_v42 }
 0x514   : > { %v2528_v30 = vpop.f32.mrf.mxu0  ;;  %v1421_v62 = vadd.f32 %v2527_v14, %v2330_v57 }
 0x515   : > { %v1605_v33 = vpack.c.bf16 %v1498_v27, %v1495_v24  ;;  %v1595_v53 = vmul.f32 0.35355338, %v1413_v44  ;;  %v1424_v56 = vadd.f32 %v2528_v30, %v2330_v57  ;;  %v1759_v6 = vsel %vm872_vm2, %v1606_v51, 0  ;;  %v2354_v27 = vld [vmem:[%s3270_s9 + $0x10] sm:$0xff] }
 0x516   : > { %v1415_v39 = vpop.f32.mrf.mxu0  ;;  %v1597_v12 = vmul.f32 0.35355338, %v1421_v62 }
 0x517   : > { %v1416_v20 = vadd.f32 %v2330_v57, %v1415_v39  ;;  %2552 = vmatmul.mubr.msk.bf16.vlgmr.msra.gmra.mxu1 %vm872_vm2, %v1599_v31  ;;  %v1712_v55 = vsel %vm872_vm2, %v1605_v33, 0  ;;  %v1598_v7 = vmul.f32 0.35355338, %v1424_v56  ;;  %v2355_v33 = vld [vmem:[%s3270_s9 + $0x18] sm:$0xff] }
 0x518   : > { %v2543_v2 = vpop.f32.mrf.mxu0  ;;  %2556 = vmatpush3.bf16.xpose.msra.mxu1 %v1665_v34  ;;  %2557 = vmatprep.mubr.msk.bf16.mxu1 %vm2736_vm1, %v2735_v49 }
 0x519   : > { %2562 = vmatpush3.bf16.xpose.msra.mxu0 %v1712_v55  ;;  %2567 = vmatprep.subr.bf16.mxu1 %v2735_v49  ;;  %v1596_v43 = vmul.f32 0.35355338, %v1416_v20  ;;  %v1569_v14 = vadd.f32 %v2543_v2, %v2348_v0  ;;  %v1602_v16 = vpack.c.bf16 %v1598_v7, %v1597_v12 }
 0x51a   : > { %v1560_v46 = vpop.f32.mrf.mxu0  ;;  %2573 = vmatprep.subr.bf16.mxu0 %v2735_v49 }
 0x51b   : > { %v1601_v63 = vpack.c.bf16 %v1596_v43, %v1595_v53  ;;  %v1561_v4 = vadd.f32 %v2348_v0, %v1560_v46 }
 0x51c   : > { %v2544_v54 = vpop.f32.mrf.mxu0 }
 0x51d   : > { %v1572_v57 = vadd.f32 %v2544_v54, %v2348_v0 }
 0x51e   : > { %v1563_v1 = vpop.f32.mrf.mxu0 }
 0x51f   : > { %v1564_v5 = vadd.f32 %v2348_v0, %v1563_v1  ;;  %2558 = vmatmul.mubr.msk.bf16.vlgmr.msra.gmra.mxu1 %vm872_vm2, %v1600_v40  ;;  %v1608_v18 = vpack.c.bf16 %v1572_v57, %v1569_v14 }
 0x520   : > { %2564 = vmatmul.mubr.msk.bf16.vlgmr.msra.gmra.mxu0 %vm872_vm2, %v1601_v63  ;;  %v2547_v60 = vpop.f32.mrf.mxu0  ;;  %2568 = vmatpush3.bf16.xpose.msra.mxu1 %v1759_v6 }
 0x521   : > { %v1607_v8 = vpack.c.bf16 %v1564_v5, %v1561_v4  ;;  %v3153_v9 = vadd.f32 %v2547_v60, %v2348_v0  ;;  %2569 = vmatprep.mubr.msk.bf16.mxu1 %vm2736_vm1, %v2735_v49  ;;  %2579 = vmatprep.subr.bf16.mxu1 %v2735_v49 }
 0x522   : > { %v1576_v10 = vpop.f32.mrf.mxu0  ;;  %2575 = vmatprep.mubr.msk.bf16.mxu0 %vm2736_vm1, %v2735_v49 }
 0x523   : > { %v3160_v13 = vadd.f32 %v2348_v0, %v1576_v10  ;;  %2574 = vmatpush3.bf16.msra.mxu0 %v1607_v8 }
 0x524   : > { %v2548_v15 = vpop.f32.mrf.mxu0  ;;  %2585 = vmatprep.subr.bf16.mxu0 %v2735_v49 }
 0x525   : > { %v3163_v11 = vadd.f32 %v2548_v15, %v2348_v0 }
 0x526   : > { %v1579_v19 = vpop.f32.mrf.mxu0 }
 0x527   : > { %v1610_v22 = vpack.c.bf16 %v3163_v11, %v3153_v9  ;;  %v3167_v23 = vadd.f32 %v2348_v0, %v1579_v19  ;;  %2570 = vmatmul.mubr.msk.bf16.vlgmr.msra.gmra.mxu1 %vm872_vm2, %v1602_v16  ;;  %v2646_v9 = vld [vmem:[%s3272_s11] sm:$0xff]  }
 0x528   : > { %2580 = vmatpush3.bf16.msra.mxu1 %v1608_v18  ;;  %2581 = vmatprep.mubr.msk.bf16.mxu1 %vm2736_vm1, %v2735_v49 }
 0x529   : > { %v1609_v24 = vpack.c.bf16 %v3167_v23, %v3160_v13  ;;  %2591 = vmatprep.subr.bf16.mxu1 %v2735_v49 }
 0x5d7   : > { %v1654_v30 = vpop.f32.mrf.mxu1 }
 0x5d8   : > { %v1655_v26 = vadd.f32 %v2354_v27, %v1654_v30 }
 0x5d9   : > { %v2553_v31 = vpop.f32.mrf.mxu1 }
 0x5da   : > { %v1810_v39 = vadd.f32 %v1655_v26, %v3007_v25 }
 0x5db   : > { %v1657_v52 = vpop.f32.mrf.mxu1 }
 0x5dc   : > { %v1658_v58 = vadd.f32 %v2355_v33, %v1657_v52  ;;  %v1818_v20 = vsel %vm460_vm0, %v1810_v39, -inf }
 0x5dd   : > { %1819 = vmax.xlane.f32.xlu0 %v1818_v20  ;;  %v2554_v34 = vpop.f32.mrf.mxu1 }
 0x5de   : > { %v1811_v44 = vadd.f32 %v1658_v58, %v3020_v35 }
 0x5df   : > { %v1701_v2 = vpop.f32.mrf.mxu1 }
 0x5e0   : > { %v1702_v55 = vadd.f32 %v2354_v27, %v1701_v2  ;;  %v1748_v41 = vpop.f32.mrf.mxu0  ;;  %v1821_v42 = vsel %vm460_vm0, %v1811_v44, -inf }
 0x5e1   : > { %v1749_v43 = vadd.f32 %v2354_v27, %v1748_v41  ;;  %1822 = vmax.xlane.f32.xlu1 %v1821_v42  ;;  %v2559_v46 = vpop.f32.mrf.mxu1 }
 0x5e2   : > { %v2565_v47 = vpop.f32.mrf.mxu0  ;;  %v1812_v51 = vadd.f32 %v1702_v55, %v2999_v17 }
 0x5e3   : > { %v1704_v25 = vpop.f32.mrf.mxu1  ;;  %v1814_v56 = vadd.f32 %v1749_v43, %v3034_v38 }
 0x5e4   : > { %v1705_v53 = vadd.f32 %v2355_v33, %v1704_v25  ;;  %v1751_v54 = vpop.f32.mrf.mxu0  ;;  %v1824_v40 = vsel %vm460_vm0, %v1812_v51, -inf }
 0x5e5   : > { %v1752_v63 = vadd.f32 %v2355_v33, %v1751_v54  ;;  %1825 = vmax.xlane.f32.xlu0 %v1824_v40  ;;  %v2560_v35 = vpop.f32.mrf.mxu1  ;;  %v1830_v5 = vsel %vm460_vm0, %v1814_v56, -inf }
 0x5e6   : > { %v2566_v0 = vpop.f32.mrf.mxu0  ;;  %v1813_v1 = vadd.f32 %v1705_v53, %v3013_v32 }
 0x5e7   : > { %v1795_v62 = vpop.f32.mrf.mxu1  ;;  %v1815_v17 = vadd.f32 %v1752_v63, %v3048_v3 }
 0x5e8   : > { %v1796_v4 = vadd.f32 %v2354_v27, %v1795_v62  ;;  %v1827_v6 = vsel %vm460_vm0, %v1813_v1, -inf }
 0x5e9   : > { %1831 = vmax.xlane.f32.xlu0 %v1830_v5  ;;  %1828 = vmax.xlane.f32.xlu1 %v1827_v6  ;;  %v2571_v60 = vpop.f32.mrf.mxu1  ;;  %v1833_v57 = vsel %vm460_vm0, %v1815_v17, -inf }
 0x5ea   : > { %v1816_v7 = vadd.f32 %v1796_v4, %v3027_v21 }
 0x5eb   : > { %v1798_v38 = vpop.f32.mrf.mxu1 }
 0x5ec   : > { %v1799_v8 = vadd.f32 %v2355_v33, %v1798_v38  ;;  %v1836_v10 = vsel %vm460_vm0, %v1816_v7, -inf }
 0x5ed   : > { %1834 = vmax.xlane.f32.xlu1 %v1833_v57  ;;  %1837 = vmax.xlane.f32.xlu0 %v1836_v10  ;;  %v2572_v32 = vpop.f32.mrf.mxu1 }
 0x5ee   : > { %v1817_v12 = vadd.f32 %v1799_v8, %v3041_v48 }
 0x5f0   : > { %v1839_v14 = vsel %vm460_vm0, %v1817_v12, -inf }
 0x5f1   : > { %1840 = vmax.xlane.f32.xlu1 %v1839_v14 }
 0x666   : > { %v1820_v3 = vpop.xlane.xlu0 %1819 }
 0x667   : > { %v1842_v15 = vsub.f32 %v1810_v39, %v1820_v3 }
 0x669   : > { %v1850_v16 = vmul.f32 1.442695, %v1842_v15 }
 0x66a   : > { %v1823_v18 = vpop.xlane.xlu1 %1822 }
 0x66b   : > { %2695 = vpow2.f32 %v1850_v16  ;;  %v1843_v21 = vsub.f32 %v1811_v44, %v1823_v18 }
 0x66d   : > { %v1852_v19 = vmul.f32 1.442695, %v1843_v21 }
 0x66e   : > { %v1826_v27 = vpop.xlane.xlu0 %1825 }
 0x66f   : > { %2697 = vpow2.f32 %v1852_v19  ;;  %v1844_v30 = vsub.f32 %v1812_v51, %v1826_v27 }
 0x671   : > { %v1854_v26 = vmul.f32 1.442695, %v1844_v30 }
 0x672   : > { %v1832_v31 = vpop.xlane.xlu0 %1831  ;;  %v1829_v33 = vpop.xlane.xlu1 %1828 }
 0x673   : > { %2699 = vpow2.f32 %v1854_v26  ;;  %v1846_v52 = vsub.f32 %v1814_v56, %v1832_v31  ;;  %v1845_v58 = vsub.f32 %v1813_v1, %v1829_v33 }
 0x675   : > { %v1858_v48 = vmul.f32 1.442695, %v1846_v52  ;;  %v1856_v20 = vmul.f32 1.442695, %v1845_v58 }
 0x676   : > { %v1835_v34 = vpop.xlane.xlu1 %1834  ;;  %v1838_v2 = vpop.xlane.xlu0 %1837 }
 0x677   : > { %2701 = vpow2.f32 %v1858_v48  ;;  %v1847_v39 = vsub.f32 %v1815_v17, %v1835_v34  ;;  %v1848_v55 = vsub.f32 %v1816_v7, %v1838_v2 }
 0x678   : > { %v2696_v41 = vpop.eup %2695  ;;  %2703 = vpow2.f32 %v1856_v20 }
 0x679   : > { %v1860_v44 = vmul.f32 1.442695, %v1847_v39  ;;  %v1862_v42 = vmul.f32 1.442695, %v1848_v55  ;;  %v1866_v43 = vsel %vm460_vm0, %v2696_v41, 0.0 }
 0x67a   : > { %1867 = vadd.xlane.f32.xlu0 %v1866_v43  ;;  %v1841_v46 = vpop.xlane.xlu1 %1840 }
 0x67b   : > { %2705 = vpow2.f32 %v1860_v44  ;;  %v1849_v47 = vsub.f32 %v1817_v12, %v1841_v46 }
 0x67c   : > { %v2698_v51 = vpop.eup %2697  ;;  %2707 = vpow2.f32 %v1862_v42 }
 0x67d   : > { %v1864_v25 = vmul.f32 1.442695, %v1849_v47  ;;  %v1869_v53 = vsel %vm460_vm0, %v2698_v51, 0.0 }
 0x67e   : > { %1870 = vadd.xlane.f32.xlu1 %v1869_v53 }
 0x67f   : > { %2709 = vpow2.f32 %v1864_v25 }
 0x680   : > { %v2700_v54 = vpop.eup %2699 }
 0x681   : > { %v1872_v40 = vsel %vm460_vm0, %v2700_v54, 0.0 }
 0x682   : > { %1873 = vadd.xlane.f32.xlu0 %v1872_v40 }
 0x684   : > { %v2702_v56 = vpop.eup %2701 }
 0x685   : > { %v2704_v63 = vpop.eup %2703  ;;  %v1878_v35 = vsel %vm460_vm0, %v2702_v56, 0.0 }
 0x686   : > { %1879 = vadd.xlane.f32.xlu0 %v1878_v35  ;;  %v1875_v0 = vsel %vm460_vm0, %v2704_v63, 0.0 }
 0x687   : > { %1876 = vadd.xlane.f32.xlu1 %v1875_v0 }
 0x688   : > { %v2706_v1 = vpop.eup %2705 }
 0x689   : > { %v2708_v62 = vpop.eup %2707  ;;  %v1881_v4 = vsel %vm460_vm0, %v2706_v1, 0.0 }
 0x68a   : > { %v1884_v5 = vsel %vm460_vm0, %v2708_v62, 0.0 }
 0x68b   : > { %1885 = vadd.xlane.f32.xlu0 %v1884_v5  ;;  %1882 = vadd.xlane.f32.xlu1 %v1881_v4 }
 0x68c   : > { %v2710_v6 = vpop.eup %2709 }
 0x68d   : > { %v1887_v17 = vsel %vm460_vm0, %v2710_v6, 0.0 }
 0x68f   : > { %1888 = vadd.xlane.f32.xlu1 %v1887_v17 }
 0x703   : > { %v1868_v60 = vpop.xlane.xlu0 %1867 }
 0x704   : > { %2711 = vrcp.f32 %v1868_v60 }
 0x707   : > { %v1871_v7 = vpop.xlane.xlu1 %1870 }
 0x708   : > { %2713 = vrcp.f32 %v1871_v7 }
 0x70b   : > { %v1874_v38 = vpop.xlane.xlu0 %1873 }
 0x70c   : > { %2715 = vrcp.f32 %v1874_v38 }
 0x70f   : > { %v1880_v8 = vpop.xlane.xlu0 %1879 }
 0x710   : > { %v1877_v57 = vpop.xlane.xlu1 %1876 }
 0x711   : > { %2717 = vrcp.f32 %v1877_v57  ;;  %v2712_v10 = vpop.eup %2711 }
 0x712   : > { %2719 = vrcp.f32 %v1880_v8  ;;  %v1898_v3 = vmul.f32 %v2712_v10, %v2696_v41 }
 0x714   : > { %v1886_v32 = vpop.xlane.xlu0 %1885  ;;  %v1883_v12 = vpop.xlane.xlu1 %1882 }
 0x715   : > { %v2714_v14 = vpop.eup %2713  ;;  %2721 = vrcp.f32 %v1883_v12 }
 0x716   : > { %v1899_v15 = vmul.f32 %v2714_v14, %v2698_v51  ;;  %2723 = vrcp.f32 %v1886_v32 }
 0x718   : > { %v1889_v16 = vpop.xlane.xlu1 %1888  ;;  %v1906_v18 = vpack.c.bf16 %v1899_v15, %v1898_v3 }
 0x719   : > { %2725 = vrcp.f32 %v1889_v16  ;;  %v2716_v21 = vpop.eup %2715 }
 0x71a   : > { %2576 = vmatmul.mubr.msk.bf16.vlgmr.msra.gmra.mxu0 %vm460_vm0, %v1906_v18  ;;  %v1900_v27 = vmul.f32 %v2716_v21, %v2700_v54 }
 0x71b   : > { %2586 = vmatpush3.bf16.msra.mxu0 %v1609_v24  ;;  %2587 = vmatprep.mubr.msk.bf16.mxu0 %vm2736_vm1, %v2735_v49 }
 0x71c   : > { %2597 = vmatprep.subr.bf16.mxu0 %v2646_v9 }
 0x71e   : > { %v2718_v19 = vpop.eup %2717 }
 0x71f   : > { %v1901_v30 = vmul.f32 %v2718_v19, %v2704_v63  ;;  %v2720_v26 = vpop.eup %2719 }
 0x720   : > { %v1902_v58 = vmul.f32 %v2720_v26, %v2702_v56 }
 0x721   : > { %v1907_v31 = vpack.c.bf16 %v1901_v30, %v1900_v27 }
 0x722   : > { %v2722_v33 = vpop.eup %2721 }
 0x723   : > { %2582 = vmatmul.mubr.msk.bf16.vlgmr.msra.gmra.mxu1 %vm460_vm0, %v1907_v31  ;;  %v2724_v52 = vpop.eup %2723  ;;  %v1903_v13 = vmul.f32 %v2722_v33, %v2706_v1 }
 0x724   : > { %2592 = vmatpush3.bf16.msra.mxu1 %v1610_v22  ;;  %2593 = vmatprep.mubr.msk.bf16.mxu1 %vm2736_vm1, %v2735_v49  ;;  %v1904_v48 = vmul.f32 %v2724_v52, %v2708_v62 }
 0x725   : > { %v1908_v24 = vpack.c.bf16 %v1903_v13, %v1902_v58 }
 0x726   : > { %v2726_v23 = vpop.eup %2725 }
 0x727   : > { %v1905_v20 = vmul.f32 %v2726_v23, %v2710_v6  ;;  %2588 = vmatmul.mubr.msk.bf16.vlgmr.msra.gmra.mxu0 %vm460_vm0, %v1908_v24 }
 0x728   : > { %2598 = vmatpush3.bf16.msra.mxu0 %v2646_v9 }
 0x729   : > { %v1909_v34 = vpack.c.bf16 %v1905_v20, %v1904_v48 }
 0x72b   : > { %2594 = vmatmul.mubr.msk.bf16.vlgmr.msra.gmra.mxu1 %vm460_vm0, %v1909_v34 }
 0x7da   : > { %v1947_v2 = vpop.f32.mrf.mxu0 }
 0x7dc   : > { %v2577_v39 = vpop.f32.mrf.mxu0 }
 0x7de   : > { %v1950_v11 = vpop.f32.mrf.mxu0 }
 0x7df   : > { %v2620_v22 = vpack.i.bf16 %v1950_v11, %v1947_v2 }
 0x7e0   : > { %v2578_v55 = vpop.f32.mrf.mxu0 }
 0x7e1   : > { %2621 = vrot.lane.b32.xlu0 %v2620_v22, %s2737_s30 }
 0x7e3   : > { %v1991_v49 = vpop.f32.mrf.mxu1 }
 0x7e5   : > { %v2583_v41 = vpop.f32.mrf.mxu1 }
 0x7e7   : > { %v1994_v44 = vpop.f32.mrf.mxu1  ;;  %v2035_v43 = vpop.f32.mrf.mxu0 }
 0x7e8   : > { %v2625_v42 = vpack.i.bf16 %v1994_v44, %v1991_v49 }
 0x7e9   : > { %v2584_v46 = vpop.f32.mrf.mxu1  ;;  %v2589_v47 = vpop.f32.mrf.mxu0 }
 0x7ea   : > { %2626 = vrot.lane.b32.xlu1 %v2625_v42, %s2737_s30 }
 0x7eb   : > { %v2079_v51 = vpop.f32.mrf.mxu1  ;;  %v2038_v25 = vpop.f32.mrf.mxu0 }
 0x7ec   : > { %v2630_v53 = vpack.i.bf16 %v2038_v25, %v2035_v43 }
 0x7ed   : > { %v2595_v54 = vpop.f32.mrf.mxu1  ;;  %v2590_v40 = vpop.f32.mrf.mxu0 }
 0x7ee   : > { %2631 = vrot.lane.b32.xlu1 %v2630_v53, %s2737_s30 }
 0x7ef   : > { %v2082_v56 = vpop.f32.mrf.mxu1 }
 0x7f0   : > { %v2635_v63 = vpack.i.bf16 %v2082_v56, %v2079_v51 }
 0x7f1   : > { %v2596_v35 = vpop.f32.mrf.mxu1 }
 0x7f2   : > { %2636 = vrot.lane.b32.xlu1 %v2635_v63, %s2737_s30 }
 0x853   : > { %v2622_v0 = vpop.permute.xlu0 %2621 }
 0x854   : > { %v2624_v1 = vunpack.i.h.bf16 %v2622_v0  ;;  %v2623_v62 = vunpack.i.l.bf16 %v2622_v0 }
 0x856   : > { %v2119_v4 = vsel %vm872_vm2, %v3122_v28, %v2624_v1  ;;  %v2118_v5 = vsel %vm872_vm2, %v3120_v37, %v2623_v62 }
 0x857   : > { %v2126_v6 = vpack.c.bf16 %v2119_v4, %v2118_v5 }
 0x859   : > { %2599 = vmatprep.mubr.msk.bf16.mxu0 %vm460_vm0, %v2126_v6 }
 0x85c   : > { %v2627_v17 = vpop.permute.xlu1 %2626 }
 0x85d   : > { %v2629_v60 = vunpack.i.h.bf16 %v2627_v17  ;;  %v2628_v7 = vunpack.i.l.bf16 %v2627_v17 }
 0x85f   : > { %v2121_v38 = vsel %vm872_vm2, %v3118_v36, %v2629_v60  ;;  %v2120_v8 = vsel %vm872_vm2, %v3116_v61, %v2628_v7 }
 0x860   : > { %v2127_v57 = vpack.c.bf16 %v2121_v38, %v2120_v8  ;;  %v2632_v10 = vpop.permute.xlu1 %2631 }
 0x861   : > { %v2634_v32 = vunpack.i.h.bf16 %v2632_v10  ;;  %v2633_v28 = vunpack.i.l.bf16 %v2632_v10 }
 0x862   : > { %2600 = vmatmul.mubr.msk.bf16.vlgmr.msra.gmra.mxu0 %vm460_vm0, %v2127_v57 }
 0x863   : > { %v2123_v37 = vsel %vm872_vm2, %v3130_v29, %v2634_v32  ;;  %v2122_v12 = vsel %vm872_vm2, %v3126_v45, %v2633_v28  ;;  %v2364_v45 = vld [vmem:[%s3273_s12] ss:$0 sm:$0xff] }
 0x864   : > { %v2128_v14 = vpack.c.bf16 %v2123_v37, %v2122_v12  ;;  %v2637_v3 = vpop.permute.xlu1 %2636 }
 0x865   : > { %v2639_v15 = vunpack.i.h.bf16 %v2637_v3  ;;  %v2638_v36 = vunpack.i.l.bf16 %v2637_v3 }
 0x866   : > { %2603 = vmatprep.mubr.msk.bf16.mxu0 %vm460_vm0, %v2128_v14 }
 0x867   : > { %v2125_v61 = vsel %vm872_vm2, %v3128_v50, %v2639_v15  ;;  %v2124_v16 = vsel %vm872_vm2, %v3124_v59, %v2638_v36 }
 0x868   : > { %v2129_v18 = vpack.c.bf16 %v2125_v61, %v2124_v16 }
 0x86a   : > { %2604 = vmatmul.mubr.msk.bf16.gmra.mxu0 %vm460_vm0, %v2129_v18 }
 0x922   : > { %v2601_v21 = vpop.f32.mrf.mxu0 }
 0x923   : > { %v2200_v27 = vadd.f32 %v2601_v21, %v2364_v45 }
 0x924   : > { %v2191_v29 = vpop.f32.mrf.mxu0 }
 0x925   : > { %v2192_v19 = vadd.f32 %v2364_v45, %v2191_v29  ;;  %2224 = vst.msk [vmem:[%s447_s18 + $0x10] sm:$0xff] %vm460_vm0, %v2200_v27 }
 0x926   : > { %v2602_v50 = vpop.f32.mrf.mxu0 }
 0x927   : > { %2222 = vst.msk [vmem:[%s447_s18] sm:$0xff] %vm460_vm0, %v2192_v19  ;;  %v2203_v26 = vadd.f32 %v2602_v50, %v2364_v45 }
 0x928   : > { %v2194_v59 = vpop.f32.mrf.mxu0 }
 0x929   : > { %v2195_v30 = vadd.f32 %v2364_v45, %v2194_v59  ;;  %2225 = vst.msk [vmem:[%s447_s18 + $0x18] sm:$0xff] %vm460_vm0, %v2203_v26 }
 0x92a   : > { %v2605_v31 = vpop.f32.mrf.mxu0 }
 0x92b   : > { %2223 = vst.msk [vmem:[%s447_s18 + $0x8] sm:$0xff] %vm460_vm0, %v2195_v30  ;;  %v2216_v58 = vadd.f32 %v2605_v31, %v2364_v45 }
 0x92c   : > { %v2207_v33 = vpop.f32.mrf.mxu0 }
 0x92d   : > { %v2208_v52 = vadd.f32 %v2364_v45, %v2207_v33  ;;  %2228 = vst.msk [vmem:[%s447_s18 + $0x30] sm:$0xff] %vm460_vm0, %v2216_v58 }
 0x92e   : > { %v2606_v13 = vpop.f32.mrf.mxu0 }
 0x92f   : > { %2226 = vst.msk [vmem:[%s447_s18 + $0x20] sm:$0xff] %vm460_vm0, %v2208_v52  ;;  %v2219_v48 = vadd.f32 %v2606_v13, %v2364_v45 }
 0x930   : > { %v2210_v23 = vpop.f32.mrf.mxu0 }
 0x931   : > { %v2211_v24 = vadd.f32 %v2364_v45, %v2210_v23  ;;  %2229 = vst.msk [vmem:[%s447_s18 + $0x38] sm:$0xff] %vm460_vm0, %v2219_v48 }
 0x933   : > { %2227 = vst.msk [vmem:[%s447_s18 + $0x28] sm:$0xff] %vm460_vm0, %v2211_v24 }
 0x934 PF: > { %s23_s25 = sadd.s32 1, %s2733_s25  }
 0x935   : > { %p20_p4 = scmp.ge.s32.totalorder %s23_s25, 4  }
 0x937   :  { %22 = sbr.rel (!%p20_p4) target bundleno = 1 (0x1), region = 109 }

// kernel: hybrid_swin_stage_forward.9
= control target key start
LH: loop header
LB: loop body
LE: loop exit
PB: predicated region body
PF: predicated region fallthrough
CT: control target
= control target key end

     0   :  { %8 = vsyncpa [#allocation3], 0  ;;  %s625_s0 = inlined_call_operand.vmem [shape: f32[32,64], index: 0, kind: input, shape index: {}]   ;;  %s626_s1 = inlined_call_operand.vmem [shape: bf16[64,32], index: 1, kind: input, shape index: {}]   ;;  %s627_s2 = inlined_call_operand.vmem [shape: f32[1,32], index: 2, kind: input, shape index: {}]   ;;  %s628_s3 = inlined_call_operand.hbm [shape: f32[32,32], index: 3, kind: output, shape index: {}]  }
   0x1   :  { %10 = vsyncpa [#allocation3 + $0x1], 0  ;;  %s509_s12 = smov 0   ;;  %s511_s13 = smov 0  }
   0x2   :  { %s513_s14 = smov 0   ;;  %s515_s15 = smov 0  }
   0x3 LB: > { %s530_s16 = sadd.s32 4294967295, %s482_s15   ;;  %s339_s17 = sadd.s32 4294967294, %s482_s15   ;;  %s482_s15 = sphi %s515_s15, %s634_s15   ;;  %s478_s14 = sphi %s513_s14, %s633_s14   ;;  %s474_s13 = sphi %s511_s13, %s632_s13   ;;  %s470_s12 = sphi %s509_s12, %s631_s12  }
   0x4   : > { %s534_s18 = sadd.s32 1, %s482_s15   ;;  %s91_s19 = sadd.s32 1, %s478_s14 }
   0x5   : > { %s88_s20 = ssub.s32 %s482_s15, %s534_s18  ;;  %p101_p0 = scmp.ne.s32.totalorder %s478_s14, %s474_s13 }
   0x6   : > { %p89_p1 = scmp.eq.s32.totalorder %s88_s20, 0  ;;  %p102_p2 = scmp.eq.s32.totalorder %s530_s16, 1 }
   0x7   : > { %p107_p3 = scmp.ne.s32.totalorder %s474_s13, %s470_s12  ;;  %p108_p4 = scmp.eq.s32.totalorder %s339_s17, 1 }
   0x8   : > { %s545_s21 = scalar_select %p89_p1, %s478_s14, %s91_s19  }
   0x9   : > { %p547_p5 = por %p102_p2, %p101_p0  ;;  %p551_p6 = por %p108_p4, %p107_p3 }
   0xa   : > { %p342_p7 = scmp.ge.s32.totalorder %s482_s15, 1  ;;  %p141_p8 = scmp.lt.s32.totalorder %s482_s15, 3 }
   0xc   : > { %p142_p9 = pnand %p342_p7, %p141_p8 }
   0xd   : > { %s344_s28 = sshll.u32 (!%p142_p9), %s530_s16, 1  ;;  %s162_s10 = sand.u32 (!%p142_p9), 1, %s474_s13  }
   0xe   : > { %145 = sbr.rel (%p142_p9) target bundleno = 249 (0xf9), region = 32  ;;  %p166_p10 = scmp.lt.s32.totalorder (!%p142_p9), %s344_s28, 3 }
   0xf   : > { %s343_s11 = sshll.u32 (!%p142_p9), %s162_s10, 4  ;;  %s357_s25 = sshll.u32 (!%p142_p9), %s530_s16, 8 }
  0x10   : > { %s164_s20 = scalar_lea.vmem (!%p142_p9), [#allocation2], %s343_s11  ;;  %s585_s29 = scalar_lea.sflag (!%p142_p9), [#allocation3], %s162_s10 }
  0x11   : > { %s277_s24 = sshll.u32 (!%p142_p9), %s164_s20, 4  ;;  %s486_s16 = smov (!%p142_p9), [#allocation2]   ;;  %s578_s24 = int_to_ptr.vmem [resolvable:$true] %s277_s24 }
  0x12   : > { %s422_s30 = scalar_lea.vmem (!%p142_p9), %s578_s24, 256 }
  0x13   : > { %v418_v0 = vld [vmem:[%s626_s1 + $0x18] sm:$0xff]   ;;  %v484_v1 = vmov 0.0   ;;  %v419_v2 = vld [vmem:[%s626_s1 + $0x10] sm:$0xff]   ;;  %vm485_vm0 = vmmov 0   ;;  %s636_s28 = smov (!%p166_p10, %s344_s28), 3  ;;  %v420_v3 = vld [vmem:[%s626_s1 + $0x8] sm:$0xff]   ;;  %p423_p11 = scmp.ne.s32.totalorder %s578_s24, %s422_s30 }
  0x14   : > { %363 = vmatprep.subr.bf16.mxu0 %v484_v1  ;;  %371 = vmatprep.mubr.msk.bf16.mxu0 %vm485_vm0, %v484_v1  ;;  %s345_s4 = sshll.u32 %s636_s28, 3  ;;  %v421_v4 = vld [vmem:[%s626_s1] sm:$0xff]   ;;  %vm215_vm1 = vcmask 523264   ;;  %vm260_vm2 = vcmask 261120   ;;  %s583_s28 = scalar_lea.hbm %s628_s3, %s357_s25 }
  0x15   : > { %364 = vmatpush3.bf16.msra.mxu0 %v418_v0  ;;  %s169_s7 = scalar_lea.vmem %s625_s0, %s345_s4  ;;  %v346_v8 = vld [vmem:[%s627_s2] ss:$0 sm:$0xff]  ;;  %p424_p12 = pnand %p423_p11, %p547_p5 }
  0x16   : > { %365 = vmatprep.subr.bf16.mxu0 %v484_v1  ;;  %v173_v5 = vld [vmem:[%s169_s7] sm:$0xff]  ;;  %v174_v6 = vld [vmem:[%s169_s7 + $0x8] sm:$0xff]  ;;  %s426_s4 = sshll.u32 %s486_s16, 4  ;;  %s427_s4 = int_to_ptr.vmem [resolvable:$false] %s426_s4 }
  0x17   : > { %v175_v7 = vpack.c.bf16 %v174_v6, %v173_v5  ;;  %p425_p13 = pneg %p424_p12  ;;  %s428_s5 = scalar_lea.vmem %s427_s4, 512 }
  0x18   : > { %p429_p0 = scmp.lt.s32.totalorder %s578_s24, %s427_s4  ;;  %p430_p1 = scmp.lt.s32.totalorder %s428_s5, %s422_s30 }
  0x19   : > { %366 = vmatpush3.bf16.msra.mxu0 %v419_v2 }
  0x1a   : > { %367 = vmatprep.subr.bf16.mxu0 %v484_v1  ;;  %p431_p2 = por %p430_p1, %p429_p0 }
  0x1c   : > { %p432_p3 = pnand %p431_p2, %p425_p13 }
  0x1d   : > { %368 = vmatpush3.bf16.msra.mxu0 %v420_v3 }
  0x1e   : > { %369 = vmatprep.subr.bf16.mxu0 %v484_v1 }
  0x21   : > { %370 = vmatpush3.bf16.msra.mxu0 %v421_v4 }
  0x24   : > { %372 = vmatmul.mubr.msk.bf16.vlgmr.msra.gmra.mxu0 %vm215_vm1, %v175_v7 }
  0xe4   : > { %v253_v9 = vpop.f32.mrf.mxu0 }
  0xe5   : > { %v254_v10 = vadd.f32 %v346_v8, %v253_v9 }
  0xe6   : > { %v373_v11 = vpop.f32.mrf.mxu0 }
  0xe7   : > { %261 = vst.msk [vmem:[%s164_s20] sm:$0xff] %vm260_vm2, %v254_v10 }
  0xe8   : > { %v256_v12 = vpop.f32.mrf.mxu0 }
  0xe9   : > { %v257_v13 = vadd.f32 %v346_v8, %v256_v12 }
  0xea   : > { %v374_v14 = vpop.f32.mrf.mxu0 }
  0xeb   : > { %262 = vst.msk [vmem:[%s164_s20 + $0x8] sm:$0xff] %vm260_vm2, %v257_v13 }
  0xec   : > { %435 = shalt.err (!%p432_p3)
}
  0xed   : > { %s436_s6 = scalar_lea.hbm %s583_s28, 256  ;;  %s440_s9 = scalar_lea.hbm %s628_s3, 512 }
  0xee   : > { %p437_p4 = scmp.ne.s32.totalorder %s583_s28, %s436_s6  ;;  %p441_p9 = scmp.lt.s32.totalorder %s583_s28, %s628_s3 }
  0xef   : > { %p442_p10 = scmp.lt.s32.totalorder %s440_s9, %s436_s6 }
  0xf0   : > { %p438_p7 = pnand %p437_p4, %p547_p5 }
  0xf1   : > { %p443_p11 = por %p442_p10, %p441_p9 }
  0xf2   : > { %p439_p8 = pneg %p438_p7 }
  0xf4   : > { %p444_p12 = pnand %p443_p11, %p439_p8 }
  0xf6   : > { %447 = shalt.err (!%p444_p12)
}
  0xf7   : > { %s487_s17 = smov 128   ;;  %s488_s19 = smov 8  }
  0xf8   : > { %375 = dma.vmem_to_hbm [thread:$0]  (%p547_p5), %s578_s24, 256, %s583_s28, %s585_s29, %s487_s17, %s487_s17, %s488_s19  }
  0xf9 PF: > { %p381_p13 = scmp.ge.s32.totalorder %s482_s15, 2  ;;  %s292_s20 = sand.u32 1, %s470_s12  }
  0xfa   : > { %s293_s25 = scalar_lea.sflag [#allocation3], %s292_s20 }
  0xfb   : > { %p378_p0 = pnand %p381_p13, %p551_p6 }
  0xfd   : > { %p379_p1 = pneg %p378_p0 }
  0xff   : > { %465 = dma.done.wait (%p379_p1), %s293_s25, 256  }
 0x100   : > { %467 = vsyncadd (%p379_p1), %s293_s25, 4294967040  ;;  %p13_p2 = scmp.ge.s32.totalorder %s534_s18, 4   ;;  %s631_s12 = smov %s474_s13 }
 0x101   : > { %s632_s13 = smov %s478_s14  ;;  %s633_s14 = smov %s545_s21 }
 0x102   : > { %s634_s15 = smov %s534_s18  ;;  %15 = sbr.rel (!%p13_p2) target bundleno = 3 (0x3), region = 67 }
 0x107   :  { %298 = vsyncpa [#allocation3], 1 }
 0x108   :  { %300 = vsyncpa [#allocation3 + $0x1], 1 }

</bundles_post_ra>
